<compile_context>
chip_gen: v7x
topology: tpu7x:2x2x1
jax: 0.10.0
libtpu: 0.0.40
codegen_flags: <defaults>
</compile_context>

<pallas_src>
import functools

import jax
import jax.numpy as jnp
from jax.experimental import pallas as pl

# Keep the pure-JAX reference matmuls in full f32 so it is a faithful oracle.
jax.config.update("jax_default_matmul_precision", "highest")

# ---------------- model config (small, consistent with the module) ----------------
D_MODEL = 32
D_FF = 64
N_HEADS = 4
HEAD_DIM = D_MODEL // N_HEADS
N_Q = 8          # tgt (query) sequence length
N_K = 16         # memory sequence length
BATCH = 2

POS_ENC_AT_ATTN = False           # SAM2 default
POS_ENC_AT_CA_QUERIES = False     # SAM2 default
POS_ENC_AT_CA_KEYS = True         # SAM2 default
LN_EPS = 1e-5


# ---------------- in-kernel math helpers ----------------
def _layernorm(x, gamma, beta):
    mean = jnp.mean(x, axis=-1, keepdims=True)
    var = jnp.mean((x - mean) ** 2, axis=-1, keepdims=True)
    return (x - mean) * jax.lax.rsqrt(var + LN_EPS) * gamma + beta


def _multihead_attention(qf, kf, vf, wo, bo, *, batch, n_q, n_k, n_heads):
    """Multi-head attention core (input projections already applied).

    qf: (batch*n_q, D); kf, vf: (batch*n_k, D); wo: (D, D); bo: (1, D).
    Heads use batched 3-D einsums (batch dim = B).  The per-head output
    projection is accumulated through aligned row-slices of wo, avoiding a
    lane-concatenate of head outputs.
    """
    d = qf.shape[-1]
    hd = d // n_heads
    scale = hd ** -0.5
    out = None
    for h in range(n_heads):                       # static python loop (n_heads=4)
        sl = slice(h * hd, (h + 1) * hd)
        qh = qf[:, sl].reshape(batch, n_q, hd)     # (B, Nq, hd)
        kh = kf[:, sl].reshape(batch, n_k, hd)     # (B, Nk, hd)
        vh = vf[:, sl].reshape(batch, n_k, hd)     # (B, Nk, hd)
        s = jnp.einsum("bqd,bkd->bqk", qh, kh,
                       preferred_element_type=jnp.float32) * scale
        s = s - jnp.max(s, axis=-1, keepdims=True)
        p = jnp.exp(s)
        p = p * pl.reciprocal(jnp.sum(p, axis=-1, keepdims=True), approx=True)
        oh = jnp.einsum("bqk,bkd->bqd", p, vh,
                        preferred_element_type=jnp.float32)
        oh = oh.reshape(batch * n_q, hd)
        contrib = jnp.dot(oh, wo[sl, :], preferred_element_type=jnp.float32)
        out = contrib if out is None else out + contrib
    return out + bo


# ---------------- the Pallas kernel: full layer, whole batch, one invocation ----------------
def memory_attention_layer_kernel(
        tgt_ref, mem_ref, qpos_ref, pos_ref,
        vec_ref, sa_qkv_w_ref, attn_w_ref, ff_w1_ref, ff_w2_ref,
        out_ref, *, batch, n_q, n_k, n_heads):
    d = tgt_ref.shape[-1]
    d_ff = ff_w1_ref.shape[-1]

    tgt = tgt_ref[...]        # (B*Nq, D)
    mem = mem_ref[...]        # (B*Nk, D)
    pos = pos_ref[...]        # (B*Nk, D)
    qpos = (qpos_ref[...]
            if (POS_ENC_AT_ATTN or POS_ENC_AT_CA_QUERIES) else None)

    # -------- unpack the packed 1-D parameters (one VMEM operand) --------
    vec = vec_ref[...]        # (14, 3*D)
    n1w, n2w, n3w = vec[0:1, :d], vec[1:2, :d], vec[2:3, :d]
    n1b, n2b, n3b = vec[3:4, :d], vec[4:5, :d], vec[5:6, :d]
    sa_qkv_b = vec[6:7, :3 * d]                       # (1, 3D)
    sa_bo = vec[7:8, :d]
    ca_bq, ca_bk = vec[8:9, :d], vec[9:10, :d]
    ca_bv, ca_bo = vec[10:11, :d], vec[11:12, :d]
    b1 = vec[12:13, :d_ff]
    b2 = vec[13:14, :d]

    sa_wo = attn_w_ref[0]
    ca_wq = attn_w_ref[1]
    ca_wk = attn_w_ref[2]
    ca_wv = attn_w_ref[3]
    ca_wo = attn_w_ref[4]
    sa_qkv_w = sa_qkv_w_ref[...]                      # (D, 3D) = [Wq | Wk | Wv]

    # -------- self-attention block --------
    tgt2 = _layernorm(tgt, n1w, n1b)
    if POS_ENC_AT_ATTN:
        # q/k input differs from v input -> cannot fuse the three projections.
        qk_in = tgt2 + qpos
        qf = jnp.dot(qk_in, sa_qkv_w[:, 0:d],
                     preferred_element_type=jnp.float32) + sa_qkv_b[:, 0:d]
        kf = jnp.dot(qk_in, sa_qkv_w[:, d:2 * d],
                     preferred_element_type=jnp.float32) + sa_qkv_b[:, d:2 * d]
        vf = jnp.dot(tgt2, sa_qkv_w[:, 2 * d:3 * d],
                     preferred_element_type=jnp.float32) + sa_qkv_b[:, 2 * d:3 * d]
    else:
        qkv = jnp.dot(tgt2, sa_qkv_w,
                      preferred_element_type=jnp.float32) + sa_qkv_b
        qf, kf, vf = qkv[:, 0:d], qkv[:, d:2 * d], qkv[:, 2 * d:3 * d]
    sa = _multihead_attention(qf, kf, vf, sa_wo, sa_bo,
                              batch=batch, n_q=n_q, n_k=n_q, n_heads=n_heads)
    tgt = tgt + sa            # dropout1 == identity (eval)

    # -------- cross-attention block --------
    tgt2 = _layernorm(tgt, n2w, n2b)
    q_in = tgt2 + qpos if POS_ENC_AT_CA_QUERIES else tgt2
    k_in = mem + pos if POS_ENC_AT_CA_KEYS else mem
    qf = jnp.dot(q_in, ca_wq, preferred_element_type=jnp.float32) + ca_bq
    kf = jnp.dot(k_in, ca_wk, preferred_element_type=jnp.float32) + ca_bk
    vf = jnp.dot(mem, ca_wv, preferred_element_type=jnp.float32) + ca_bv
    ca = _multihead_attention(qf, kf, vf, ca_wo, ca_bo,
                              batch=batch, n_q=n_q, n_k=n_k, n_heads=n_heads)
    tgt = tgt + ca            # dropout2 == identity

    # -------- feed-forward block --------
    tgt2 = _layernorm(tgt, n3w, n3b)
    h = jnp.maximum(jnp.dot(tgt2, ff_w1_ref[...],
                            preferred_element_type=jnp.float32) + b1, 0.0)  # relu
    ff = jnp.dot(h, ff_w2_ref[...], preferred_element_type=jnp.float32) + b2
    out_ref[...] = tgt + ff   # dropout3 == identity


# ---------------- wrapper ----------------
def memory_attention_layer(tgt, memory, query_pos, pos, params):
    B, Nq, D = tgt.shape
    Nk = memory.shape[1]
    F = params["w1"].shape[1]
    width = max(3 * D, F)

    # Layout plumbing in the wrapper: flatten batch into rows (free reshapes).
    tgt2d = tgt.reshape(B * Nq, D)
    mem2d = memory.reshape(B * Nk, D)
    qpos2d = query_pos.reshape(B * Nq, D)
    pos2d = pos.reshape(B * Nk, D)

    def row(v):
        v = v.reshape(-1).astype(jnp.float32)
        return jnp.pad(v, (0, width - v.shape[0]))

    # Pack all vector parameters (LN scales/offsets + every bias) into ONE operand.
    vec_pack = jnp.stack([
        row(params["n1w"]), row(params["n2w"]), row(params["n3w"]),
        row(params["n1b"]), row(params["n2b"]), row(params["n3b"]),
        row(jnp.concatenate([params["sa_bq"], params["sa_bk"], params["sa_bv"]])),
        row(params["sa_bo"]),
        row(params["ca_bq"]), row(params["ca_bk"]),
        row(params["ca_bv"]), row(params["ca_bo"]),
        row(params["b1"]), row(params["b2"]),
    ])                                                                  # (14, 3D)
    sa_qkv_w = jnp.concatenate(
        [params["sa_wq"], params["sa_wk"], params["sa_wv"]], axis=1)    # (D, 3D)
    attn_w = jnp.stack([params["sa_wo"], params["ca_wq"], params["ca_wk"],
                        params["ca_wv"], params["ca_wo"]])              # (5, D, D)

    kernel = functools.partial(memory_attention_layer_kernel,
                               batch=B, n_q=Nq, n_k=Nk, n_heads=N_HEADS)
    out2d = pl.pallas_call(
        kernel,
        out_shape=jax.ShapeDtypeStruct((B * Nq, D), jnp.float32),
    )(tgt2d, mem2d, qpos2d, pos2d, vec_pack, sa_qkv_w, attn_w,
      params["w1"], params["w2"])
    return out2d.reshape(B, Nq, D)


# ---------------- pure-JAX reference (same module semantics, no Pallas) ----------------
def reference_forward(tgt, memory, query_pos, pos, p):
    def ln(x, g, b):
        m = jnp.mean(x, axis=-1, keepdims=True)
        v = jnp.mean((x - m) ** 2, axis=-1, keepdims=True)
        return (x - m) * jax.lax.rsqrt(v + LN_EPS) * g + b

    def mha(q, k, v, wq, bq, wk, bk, wv, bv, wo, bo):
        qf = q @ wq + bq
        kf = k @ wk + bk
        vf = v @ wv + bv
        scale = HEAD_DIM ** -0.5
        outs = []
        for h in range(N_HEADS):
            sl = slice(h * HEAD_DIM, (h + 1) * HEAD_DIM)
            s = (qf[:, sl] @ kf[:, sl].T) * scale
            s = s - jnp.max(s, axis=-1, keepdims=True)
            e = jnp.exp(s)
            a = e / jnp.sum(e, axis=-1, keepdims=True)
            outs.append(a @ vf[:, sl])
        return jnp.concatenate(outs, axis=-1) @ wo + bo

    def per_batch(t, m, qp, po):
        t2 = ln(t, p["n1w"], p["n1b"])
        qk = t2 + qp if POS_ENC_AT_ATTN else t2
        t = t + mha(qk, qk, t2, p["sa_wq"], p["sa_bq"], p["sa_wk"], p["sa_bk"],
                    p["sa_wv"], p["sa_bv"], p["sa_wo"], p["sa_bo"])
        t2 = ln(t, p["n2w"], p["n2b"])
        q = t2 + qp if POS_ENC_AT_CA_QUERIES else t2
        k = m + po if POS_ENC_AT_CA_KEYS else m
        t = t + mha(q, k, m, p["ca_wq"], p["ca_bq"], p["ca_wk"], p["ca_bk"],
                    p["ca_wv"], p["ca_bv"], p["ca_wo"], p["ca_bo"])
        t2 = ln(t, p["n3w"], p["n3b"])
        hdn = jnp.maximum(t2 @ p["w1"] + p["b1"], 0.0)
        return t + hdn @ p["w2"] + p["b2"]

    return jax.vmap(per_batch)(tgt, memory, query_pos, pos)


# ---------------- deterministic parameter init ----------------
def init_params(key):
    keys = jax.random.split(key, 26)

    def w(k, shape, scale=0.05):
        return (scale * jax.random.normal(k, shape)).astype(jnp.float32)

    D, F = D_MODEL, D_FF
    return {
        # layernorms (slightly perturbed so gamma/beta are actually exercised)
        "n1w": 1.0 + w(keys[20], (D,)), "n1b": w(keys[21], (D,), 0.02),
        "n2w": 1.0 + w(keys[22], (D,)), "n2b": w(keys[23], (D,), 0.02),
        "n3w": 1.0 + w(keys[24], (D,)), "n3b": w(keys[25], (D,), 0.02),
        # self-attention projections, stored (in, out): kernel does x @ W + b
        "sa_wq": w(keys[0], (D, D)), "sa_bq": w(keys[1], (D,), 0.02),
        "sa_wk": w(keys[2], (D, D)), "sa_bk": w(keys[3], (D,), 0.02),
        "sa_wv": w(keys[4], (D, D)), "sa_bv": w(keys[5], (D,), 0.02),
        "sa_wo": w(keys[6], (D, D)), "sa_bo": w(keys[7], (D,), 0.02),
        # cross-attention projections
        "ca_wq": w(keys[8], (D, D)), "ca_bq": w(keys[9], (D,), 0.02),
        "ca_wk": w(keys[10], (D, D)), "ca_bk": w(keys[11], (D,), 0.02),
        "ca_wv": w(keys[12], (D, D)), "ca_bv": w(keys[13], (D,), 0.02),
        "ca_wo": w(keys[14], (D, D)), "ca_bo": w(keys[15], (D,), 0.02),
        # feed-forward
        "w1": w(keys[16], (D, F)), "b1": w(keys[17], (F,), 0.02),
        "w2": w(keys[18], (F, D)), "b2": w(keys[19], (D,), 0.02),
    }


if __name__ == "__main__":
    key = jax.random.PRNGKey(0)
    k_tgt, k_mem, k_qpos, k_pos, k_par = jax.random.split(key, 5)

    tgt = jax.random.normal(k_tgt, (BATCH, N_Q, D_MODEL), jnp.float32)
    memory = jax.random.normal(k_mem, (BATCH, N_K, D_MODEL), jnp.float32)
    query_pos = jax.random.normal(k_qpos, (BATCH, N_Q, D_MODEL), jnp.float32)
    pos = jax.random.normal(k_pos, (BATCH, N_K, D_MODEL), jnp.float32)
    params = init_params(k_par)

    out = memory_attention_layer(tgt, memory, query_pos, pos, params)
    out = jax.block_until_ready(out)

    ref = reference_forward(tgt, memory, query_pos, pos, params)
    assert out.shape == (BATCH, N_Q, D_MODEL)
    max_err = float(jnp.max(jnp.abs(out - ref)))
    assert jnp.allclose(out, ref, atol=2e-3, rtol=2e-3), f"max abs err = {max_err}"

    print("KERNEL_OK")
</pallas_src>

<mosaic_0001>
module attributes {stable_mosaic.version = 11 : i64} {
  func.func @memory_attention_layer_kernel(%arg0: memref<16x32xf32, #tpu.memory_space<vmem>>, %arg1: memref<32x32xf32, #tpu.memory_space<vmem>>, %arg2: memref<16x32xf32, #tpu.memory_space<vmem>>, %arg3: memref<32x32xf32, #tpu.memory_space<vmem>>, %arg4: memref<14x96xf32, #tpu.memory_space<vmem>>, %arg5: memref<32x96xf32, #tpu.memory_space<vmem>>, %arg6: memref<5x32x32xf32, #tpu.memory_space<vmem>>, %arg7: memref<32x64xf32, #tpu.memory_space<vmem>>, %arg8: memref<64x32xf32, #tpu.memory_space<vmem>>, %arg9: memref<16x32xf32, #tpu.memory_space<vmem>>) attributes {dimension_semantics = [], scalar_prefetch = 0 : i64, scratch_operands = 0 : i64, tpu.core_type = #tpu.core_type<tc>} {
    %c0 = arith.constant 0 : index
    %c0_0 = arith.constant 0 : index
    %0 = vector.load %arg0[%c0, %c0_0] : memref<16x32xf32, #tpu.memory_space<vmem>>, vector<16x32xf32>
    %c0_1 = arith.constant 0 : index
    %c0_2 = arith.constant 0 : index
    %1 = vector.load %arg1[%c0_1, %c0_2] : memref<32x32xf32, #tpu.memory_space<vmem>>, vector<32x32xf32>
    %c0_3 = arith.constant 0 : index
    %c0_4 = arith.constant 0 : index
    %2 = vector.load %arg3[%c0_3, %c0_4] : memref<32x32xf32, #tpu.memory_space<vmem>>, vector<32x32xf32>
    %c0_5 = arith.constant 0 : index
    %c0_6 = arith.constant 0 : index
    %3 = vector.load %arg4[%c0_5, %c0_6] : memref<14x96xf32, #tpu.memory_space<vmem>>, vector<14x96xf32>
    %4 = vector.extract_strided_slice %3 {offsets = [0, 0], sizes = [1, 32], strides = [1, 1]} : vector<14x96xf32> to vector<1x32xf32>
    %5 = vector.extract_strided_slice %3 {offsets = [1, 0], sizes = [1, 32], strides = [1, 1]} : vector<14x96xf32> to vector<1x32xf32>
    %6 = vector.extract_strided_slice %3 {offsets = [2, 0], sizes = [1, 32], strides = [1, 1]} : vector<14x96xf32> to vector<1x32xf32>
    %7 = vector.extract_strided_slice %3 {offsets = [3, 0], sizes = [1, 32], strides = [1, 1]} : vector<14x96xf32> to vector<1x32xf32>
    %8 = vector.extract_strided_slice %3 {offsets = [4, 0], sizes = [1, 32], strides = [1, 1]} : vector<14x96xf32> to vector<1x32xf32>
    %9 = vector.extract_strided_slice %3 {offsets = [5, 0], sizes = [1, 32], strides = [1, 1]} : vector<14x96xf32> to vector<1x32xf32>
    %10 = vector.extract_strided_slice %3 {offsets = [6, 0], sizes = [1, 96], strides = [1, 1]} : vector<14x96xf32> to vector<1x96xf32>
    %11 = vector.extract_strided_slice %3 {offsets = [7, 0], sizes = [1, 32], strides = [1, 1]} : vector<14x96xf32> to vector<1x32xf32>
    %12 = vector.extract_strided_slice %3 {offsets = [8, 0], sizes = [1, 32], strides = [1, 1]} : vector<14x96xf32> to vector<1x32xf32>
    %13 = vector.extract_strided_slice %3 {offsets = [9, 0], sizes = [1, 32], strides = [1, 1]} : vector<14x96xf32> to vector<1x32xf32>
    %14 = vector.extract_strided_slice %3 {offsets = [10, 0], sizes = [1, 32], strides = [1, 1]} : vector<14x96xf32> to vector<1x32xf32>
    %15 = vector.extract_strided_slice %3 {offsets = [11, 0], sizes = [1, 32], strides = [1, 1]} : vector<14x96xf32> to vector<1x32xf32>
    %16 = vector.extract_strided_slice %3 {offsets = [12, 0], sizes = [1, 64], strides = [1, 1]} : vector<14x96xf32> to vector<1x64xf32>
    %17 = vector.extract_strided_slice %3 {offsets = [13, 0], sizes = [1, 32], strides = [1, 1]} : vector<14x96xf32> to vector<1x32xf32>
    %c0_7 = arith.constant 0 : index
    %c0_8 = arith.constant 0 : index
    %c0_9 = arith.constant 0 : index
    %18 = vector.load %arg6[%c0_7, %c0_8, %c0_9] : memref<5x32x32xf32, #tpu.memory_space<vmem>>, vector<1x32x32xf32>
    %19 = vector.shape_cast %18 : vector<1x32x32xf32> to vector<32x32xf32>
    %c1 = arith.constant 1 : index
    %c0_10 = arith.constant 0 : index
    %c0_11 = arith.constant 0 : index
    %20 = vector.load %arg6[%c1, %c0_10, %c0_11] : memref<5x32x32xf32, #tpu.memory_space<vmem>>, vector<1x32x32xf32>
    %21 = vector.shape_cast %20 : vector<1x32x32xf32> to vector<32x32xf32>
    %c2 = arith.constant 2 : index
    %c0_12 = arith.constant 0 : index
    %c0_13 = arith.constant 0 : index
    %22 = vector.load %arg6[%c2, %c0_12, %c0_13] : memref<5x32x32xf32, #tpu.memory_space<vmem>>, vector<1x32x32xf32>
    %23 = vector.shape_cast %22 : vector<1x32x32xf32> to vector<32x32xf32>
    %c3 = arith.constant 3 : index
    %c0_14 = arith.constant 0 : index
    %c0_15 = arith.constant 0 : index
    %24 = vector.load %arg6[%c3, %c0_14, %c0_15] : memref<5x32x32xf32, #tpu.memory_space<vmem>>, vector<1x32x32xf32>
    %25 = vector.shape_cast %24 : vector<1x32x32xf32> to vector<32x32xf32>
    %c4 = arith.constant 4 : index
    %c0_16 = arith.constant 0 : index
    %c0_17 = arith.constant 0 : index
    %26 = vector.load %arg6[%c4, %c0_16, %c0_17] : memref<5x32x32xf32, #tpu.memory_space<vmem>>, vector<1x32x32xf32>
    %27 = vector.shape_cast %26 : vector<1x32x32xf32> to vector<32x32xf32>
    %c0_18 = arith.constant 0 : index
    %c0_19 = arith.constant 0 : index
    %28 = vector.load %arg5[%c0_18, %c0_19] : memref<32x96xf32, #tpu.memory_space<vmem>>, vector<32x96xf32>
    %cst = arith.constant dense<0.000000e+00> : vector<16xf32>
    %29 = vector.multi_reduction <add>, %0, %cst [1] : vector<16x32xf32> to vector<16xf32>
    %30 = vector.shape_cast %29 : vector<16xf32> to vector<16x1xf32>
    %cst_20 = arith.constant 3.200000e+01 : f32
    %31 = vector.broadcast %cst_20 : f32 to vector<16x1xf32>
    %32 = arith.divf %30, %31 : vector<16x1xf32>
    %33 = vector.broadcast %32 : vector<16x1xf32> to vector<16x32xf32>
    %34 = arith.subf %0, %33 : vector<16x32xf32>
    %35 = arith.mulf %34, %34 : vector<16x32xf32>
    %cst_21 = arith.constant dense<0.000000e+00> : vector<16xf32>
    %36 = vector.multi_reduction <add>, %35, %cst_21 [1] : vector<16x32xf32> to vector<16xf32>
    %37 = vector.shape_cast %36 : vector<16xf32> to vector<16x1xf32>
    %cst_22 = arith.constant 3.200000e+01 : f32
    %38 = vector.broadcast %cst_22 : f32 to vector<16x1xf32>
    %39 = arith.divf %37, %38 : vector<16x1xf32>
    %40 = vector.broadcast %32 : vector<16x1xf32> to vector<16x32xf32>
    %41 = arith.subf %0, %40 : vector<16x32xf32>
    %cst_23 = arith.constant 9.99999974E-6 : f32
    %42 = vector.broadcast %cst_23 : f32 to vector<16x1xf32>
    %43 = arith.addf %39, %42 : vector<16x1xf32>
    %44 = math.rsqrt %43 : vector<16x1xf32>
    %45 = vector.broadcast %44 : vector<16x1xf32> to vector<16x32xf32>
    %46 = arith.mulf %41, %45 : vector<16x32xf32>
    %47 = vector.broadcast %4 : vector<1x32xf32> to vector<16x32xf32>
    %48 = arith.mulf %46, %47 : vector<16x32xf32>
    %49 = vector.broadcast %7 : vector<1x32xf32> to vector<16x32xf32>
    %50 = arith.addf %48, %49 : vector<16x32xf32>
    %cst_24 = arith.constant dense<0.000000e+00> : vector<16x96xf32>
    %51 = tpu.matmul %50, %28, %cst_24 {dimension_numbers = #tpu.dot_dimension_numbers<[1], [0], [0], [1], [0, 0, 1, 1], [], []>, precision = #tpu.contract_precision<fp32>} : vector<16x32xf32>, vector<32x96xf32>, vector<16x96xf32> -> vector<16x96xf32>
    %52 = vector.broadcast %10 : vector<1x96xf32> to vector<16x96xf32>
    %53 = arith.addf %51, %52 : vector<16x96xf32>
    %54 = vector.extract_strided_slice %53 {offsets = [0, 0], sizes = [16, 32], strides = [1, 1]} : vector<16x96xf32> to vector<16x32xf32>
    %55 = vector.extract_strided_slice %53 {offsets = [0, 32], sizes = [16, 32], strides = [1, 1]} : vector<16x96xf32> to vector<16x32xf32>
    %56 = vector.extract_strided_slice %53 {offsets = [0, 64], sizes = [16, 32], strides = [1, 1]} : vector<16x96xf32> to vector<16x32xf32>
    %57 = vector.extract_strided_slice %54 {offsets = [0, 0], sizes = [16, 8], strides = [1, 1]} : vector<16x32xf32> to vector<16x8xf32>
    %58 = vector.shape_cast %57 : vector<16x8xf32> to vector<2x8x8xf32>
    %59 = vector.extract_strided_slice %55 {offsets = [0, 0], sizes = [16, 8], strides = [1, 1]} : vector<16x32xf32> to vector<16x8xf32>
    %60 = vector.shape_cast %59 : vector<16x8xf32> to vector<2x8x8xf32>
    %61 = vector.extract_strided_slice %56 {offsets = [0, 0], sizes = [16, 8], strides = [1, 1]} : vector<16x32xf32> to vector<16x8xf32>
    %62 = vector.shape_cast %61 : vector<16x8xf32> to vector<2x8x8xf32>
    "tpu.trace_start"() <{level = 10 : i32, message = "bqd,bkd->bqk"}> : () -> ()
    %cst_25 = arith.constant dense<0.000000e+00> : vector<2x8x8xf32>
    %63 = tpu.matmul %58, %60, %cst_25 {dimension_numbers = #tpu.dot_dimension_numbers<[2], [2], [1], [1], [0, 0, 0, 1, 1, 1], [0], [0]>, precision = #tpu.contract_precision<fp32>} : vector<2x8x8xf32>, vector<2x8x8xf32>, vector<2x8x8xf32> -> vector<2x8x8xf32>
    "tpu.trace_stop"() : () -> ()
    %cst_26 = arith.constant 0.353553385 : f32
    %64 = vector.broadcast %cst_26 : f32 to vector<2x8x8xf32>
    %65 = arith.mulf %63, %64 : vector<2x8x8xf32>
    %cst_27 = arith.constant dense<0xFF800000> : vector<2x8xf32>
    %66 = vector.multi_reduction <maximumf>, %65, %cst_27 [2] : vector<2x8x8xf32> to vector<2x8xf32>
    %67 = vector.shape_cast %66 : vector<2x8xf32> to vector<2x8x1xf32>
    %68 = vector.broadcast %67 : vector<2x8x1xf32> to vector<2x8x8xf32>
    %69 = arith.subf %65, %68 : vector<2x8x8xf32>
    %70 = math.exp %69 : vector<2x8x8xf32>
    %cst_28 = arith.constant dense<0.000000e+00> : vector<2x8xf32>
    %71 = vector.multi_reduction <add>, %70, %cst_28 [2] : vector<2x8x8xf32> to vector<2x8xf32>
    %72 = vector.shape_cast %71 : vector<2x8xf32> to vector<2x8x1xf32>
    %73 = tpu.reciprocal %72 {approx = true} : vector<2x8x1xf32> -> vector<2x8x1xf32>
    %74 = vector.broadcast %73 : vector<2x8x1xf32> to vector<2x8x8xf32>
    %75 = arith.mulf %70, %74 : vector<2x8x8xf32>
    "tpu.trace_start"() <{level = 10 : i32, message = "bqk,bkd->bqd"}> : () -> ()
    %cst_29 = arith.constant dense<0.000000e+00> : vector<2x8x8xf32>
    %76 = tpu.matmul %75, %62, %cst_29 {dimension_numbers = #tpu.dot_dimension_numbers<[2], [1], [1], [2], [0, 0, 0, 1, 1, 2], [0], [0]>, precision = #tpu.contract_precision<fp32>} : vector<2x8x8xf32>, vector<2x8x8xf32>, vector<2x8x8xf32> -> vector<2x8x8xf32>
    "tpu.trace_stop"() : () -> ()
    %77 = vector.shape_cast %76 : vector<2x8x8xf32> to vector<16x8xf32>
    %78 = vector.extract_strided_slice %19 {offsets = [0, 0], sizes = [8, 32], strides = [1, 1]} : vector<32x32xf32> to vector<8x32xf32>
    %cst_30 = arith.constant dense<0.000000e+00> : vector<16x32xf32>
    %79 = tpu.matmul %77, %78, %cst_30 {dimension_numbers = #tpu.dot_dimension_numbers<[1], [0], [0], [1], [0, 0, 1, 1], [], []>, precision = #tpu.contract_precision<fp32>} : vector<16x8xf32>, vector<8x32xf32>, vector<16x32xf32> -> vector<16x32xf32>
    %80 = vector.extract_strided_slice %54 {offsets = [0, 8], sizes = [16, 8], strides = [1, 1]} : vector<16x32xf32> to vector<16x8xf32>
    %81 = vector.shape_cast %80 : vector<16x8xf32> to vector<2x8x8xf32>
    %82 = vector.extract_strided_slice %55 {offsets = [0, 8], sizes = [16, 8], strides = [1, 1]} : vector<16x32xf32> to vector<16x8xf32>
    %83 = vector.shape_cast %82 : vector<16x8xf32> to vector<2x8x8xf32>
    %84 = vector.extract_strided_slice %56 {offsets = [0, 8], sizes = [16, 8], strides = [1, 1]} : vector<16x32xf32> to vector<16x8xf32>
    %85 = vector.shape_cast %84 : vector<16x8xf32> to vector<2x8x8xf32>
    "tpu.trace_start"() <{level = 10 : i32, message = "bqd,bkd->bqk"}> : () -> ()
    %cst_31 = arith.constant dense<0.000000e+00> : vector<2x8x8xf32>
    %86 = tpu.matmul %81, %83, %cst_31 {dimension_numbers = #tpu.dot_dimension_numbers<[2], [2], [1], [1], [0, 0, 0, 1, 1, 1], [0], [0]>, precision = #tpu.contract_precision<fp32>} : vector<2x8x8xf32>, vector<2x8x8xf32>, vector<2x8x8xf32> -> vector<2x8x8xf32>
    "tpu.trace_stop"() : () -> ()
    %cst_32 = arith.constant 0.353553385 : f32
    %87 = vector.broadcast %cst_32 : f32 to vector<2x8x8xf32>
    %88 = arith.mulf %86, %87 : vector<2x8x8xf32>
    %cst_33 = arith.constant dense<0xFF800000> : vector<2x8xf32>
    %89 = vector.multi_reduction <maximumf>, %88, %cst_33 [2] : vector<2x8x8xf32> to vector<2x8xf32>
    %90 = vector.shape_cast %89 : vector<2x8xf32> to vector<2x8x1xf32>
    %91 = vector.broadcast %90 : vector<2x8x1xf32> to vector<2x8x8xf32>
    %92 = arith.subf %88, %91 : vector<2x8x8xf32>
    %93 = math.exp %92 : vector<2x8x8xf32>
    %cst_34 = arith.constant dense<0.000000e+00> : vector<2x8xf32>
    %94 = vector.multi_reduction <add>, %93, %cst_34 [2] : vector<2x8x8xf32> to vector<2x8xf32>
    %95 = vector.shape_cast %94 : vector<2x8xf32> to vector<2x8x1xf32>
    %96 = tpu.reciprocal %95 {approx = true} : vector<2x8x1xf32> -> vector<2x8x1xf32>
    %97 = vector.broadcast %96 : vector<2x8x1xf32> to vector<2x8x8xf32>
    %98 = arith.mulf %93, %97 : vector<2x8x8xf32>
    "tpu.trace_start"() <{level = 10 : i32, message = "bqk,bkd->bqd"}> : () -> ()
    %cst_35 = arith.constant dense<0.000000e+00> : vector<2x8x8xf32>
    %99 = tpu.matmul %98, %85, %cst_35 {dimension_numbers = #tpu.dot_dimension_numbers<[2], [1], [1], [2], [0, 0, 0, 1, 1, 2], [0], [0]>, precision = #tpu.contract_precision<fp32>} : vector<2x8x8xf32>, vector<2x8x8xf32>, vector<2x8x8xf32> -> vector<2x8x8xf32>
    "tpu.trace_stop"() : () -> ()
    %100 = vector.shape_cast %99 : vector<2x8x8xf32> to vector<16x8xf32>
    %101 = vector.extract_strided_slice %19 {offsets = [8, 0], sizes = [8, 32], strides = [1, 1]} : vector<32x32xf32> to vector<8x32xf32>
    %cst_36 = arith.constant dense<0.000000e+00> : vector<16x32xf32>
    %102 = tpu.matmul %100, %101, %cst_36 {dimension_numbers = #tpu.dot_dimension_numbers<[1], [0], [0], [1], [0, 0, 1, 1], [], []>, precision = #tpu.contract_precision<fp32>} : vector<16x8xf32>, vector<8x32xf32>, vector<16x32xf32> -> vector<16x32xf32>
    %103 = arith.addf %79, %102 : vector<16x32xf32>
    %104 = vector.extract_strided_slice %54 {offsets = [0, 16], sizes = [16, 8], strides = [1, 1]} : vector<16x32xf32> to vector<16x8xf32>
    %105 = vector.shape_cast %104 : vector<16x8xf32> to vector<2x8x8xf32>
    %106 = vector.extract_strided_slice %55 {offsets = [0, 16], sizes = [16, 8], strides = [1, 1]} : vector<16x32xf32> to vector<16x8xf32>
    %107 = vector.shape_cast %106 : vector<16x8xf32> to vector<2x8x8xf32>
    %108 = vector.extract_strided_slice %56 {offsets = [0, 16], sizes = [16, 8], strides = [1, 1]} : vector<16x32xf32> to vector<16x8xf32>
    %109 = vector.shape_cast %108 : vector<16x8xf32> to vector<2x8x8xf32>
    "tpu.trace_start"() <{level = 10 : i32, message = "bqd,bkd->bqk"}> : () -> ()
    %cst_37 = arith.constant dense<0.000000e+00> : vector<2x8x8xf32>
    %110 = tpu.matmul %105, %107, %cst_37 {dimension_numbers = #tpu.dot_dimension_numbers<[2], [2], [1], [1], [0, 0, 0, 1, 1, 1], [0], [0]>, precision = #tpu.contract_precision<fp32>} : vector<2x8x8xf32>, vector<2x8x8xf32>, vector<2x8x8xf32> -> vector<2x8x8xf32>
    "tpu.trace_stop"() : () -> ()
    %cst_38 = arith.constant 0.353553385 : f32
    %111 = vector.broadcast %cst_38 : f32 to vector<2x8x8xf32>
    %112 = arith.mulf %110, %111 : vector<2x8x8xf32>
    %cst_39 = arith.constant dense<0xFF800000> : vector<2x8xf32>
    %113 = vector.multi_reduction <maximumf>, %112, %cst_39 [2] : vector<2x8x8xf32> to vector<2x8xf32>
    %114 = vector.shape_cast %113 : vector<2x8xf32> to vector<2x8x1xf32>
    %115 = vector.broadcast %114 : vector<2x8x1xf32> to vector<2x8x8xf32>
    %116 = arith.subf %112, %115 : vector<2x8x8xf32>
    %117 = math.exp %116 : vector<2x8x8xf32>
    %cst_40 = arith.constant dense<0.000000e+00> : vector<2x8xf32>
    %118 = vector.multi_reduction <add>, %117, %cst_40 [2] : vector<2x8x8xf32> to vector<2x8xf32>
    %119 = vector.shape_cast %118 : vector<2x8xf32> to vector<2x8x1xf32>
    %120 = tpu.reciprocal %119 {approx = true} : vector<2x8x1xf32> -> vector<2x8x1xf32>
    %121 = vector.broadcast %120 : vector<2x8x1xf32> to vector<2x8x8xf32>
    %122 = arith.mulf %117, %121 : vector<2x8x8xf32>
    "tpu.trace_start"() <{level = 10 : i32, message = "bqk,bkd->bqd"}> : () -> ()
    %cst_41 = arith.constant dense<0.000000e+00> : vector<2x8x8xf32>
    %123 = tpu.matmul %122, %109, %cst_41 {dimension_numbers = #tpu.dot_dimension_numbers<[2], [1], [1], [2], [0, 0, 0, 1, 1, 2], [0], [0]>, precision = #tpu.contract_precision<fp32>} : vector<2x8x8xf32>, vector<2x8x8xf32>, vector<2x8x8xf32> -> vector<2x8x8xf32>
    "tpu.trace_stop"() : () -> ()
    %124 = vector.shape_cast %123 : vector<2x8x8xf32> to vector<16x8xf32>
    %125 = vector.extract_strided_slice %19 {offsets = [16, 0], sizes = [8, 32], strides = [1, 1]} : vector<32x32xf32> to vector<8x32xf32>
    %cst_42 = arith.constant dense<0.000000e+00> : vector<16x32xf32>
    %126 = tpu.matmul %124, %125, %cst_42 {dimension_numbers = #tpu.dot_dimension_numbers<[1], [0], [0], [1], [0, 0, 1, 1], [], []>, precision = #tpu.contract_precision<fp32>} : vector<16x8xf32>, vector<8x32xf32>, vector<16x32xf32> -> vector<16x32xf32>
    %127 = arith.addf %103, %126 : vector<16x32xf32>
    %128 = vector.extract_strided_slice %54 {offsets = [0, 24], sizes = [16, 8], strides = [1, 1]} : vector<16x32xf32> to vector<16x8xf32>
    %129 = vector.shape_cast %128 : vector<16x8xf32> to vector<2x8x8xf32>
    %130 = vector.extract_strided_slice %55 {offsets = [0, 24], sizes = [16, 8], strides = [1, 1]} : vector<16x32xf32> to vector<16x8xf32>
    %131 = vector.shape_cast %130 : vector<16x8xf32> to vector<2x8x8xf32>
    %132 = vector.extract_strided_slice %56 {offsets = [0, 24], sizes = [16, 8], strides = [1, 1]} : vector<16x32xf32> to vector<16x8xf32>
    %133 = vector.shape_cast %132 : vector<16x8xf32> to vector<2x8x8xf32>
    "tpu.trace_start"() <{level = 10 : i32, message = "bqd,bkd->bqk"}> : () -> ()
    %cst_43 = arith.constant dense<0.000000e+00> : vector<2x8x8xf32>
    %134 = tpu.matmul %129, %131, %cst_43 {dimension_numbers = #tpu.dot_dimension_numbers<[2], [2], [1], [1], [0, 0, 0, 1, 1, 1], [0], [0]>, precision = #tpu.contract_precision<fp32>} : vector<2x8x8xf32>, vector<2x8x8xf32>, vector<2x8x8xf32> -> vector<2x8x8xf32>
    "tpu.trace_stop"() : () -> ()
    %cst_44 = arith.constant 0.353553385 : f32
    %135 = vector.broadcast %cst_44 : f32 to vector<2x8x8xf32>
    %136 = arith.mulf %134, %135 : vector<2x8x8xf32>
    %cst_45 = arith.constant dense<0xFF800000> : vector<2x8xf32>
    %137 = vector.multi_reduction <maximumf>, %136, %cst_45 [2] : vector<2x8x8xf32> to vector<2x8xf32>
    %138 = vector.shape_cast %137 : vector<2x8xf32> to vector<2x8x1xf32>
    %139 = vector.broadcast %138 : vector<2x8x1xf32> to vector<2x8x8xf32>
    %140 = arith.subf %136, %139 : vector<2x8x8xf32>
    %141 = math.exp %140 : vector<2x8x8xf32>
    %cst_46 = arith.constant dense<0.000000e+00> : vector<2x8xf32>
    %142 = vector.multi_reduction <add>, %141, %cst_46 [2] : vector<2x8x8xf32> to vector<2x8xf32>
    %143 = vector.shape_cast %142 : vector<2x8xf32> to vector<2x8x1xf32>
    %144 = tpu.reciprocal %143 {approx = true} : vector<2x8x1xf32> -> vector<2x8x1xf32>
    %145 = vector.broadcast %144 : vector<2x8x1xf32> to vector<2x8x8xf32>
    %146 = arith.mulf %141, %145 : vector<2x8x8xf32>
    "tpu.trace_start"() <{level = 10 : i32, message = "bqk,bkd->bqd"}> : () -> ()
    %cst_47 = arith.constant dense<0.000000e+00> : vector<2x8x8xf32>
    %147 = tpu.matmul %146, %133, %cst_47 {dimension_numbers = #tpu.dot_dimension_numbers<[2], [1], [1], [2], [0, 0, 0, 1, 1, 2], [0], [0]>, precision = #tpu.contract_precision<fp32>} : vector<2x8x8xf32>, vector<2x8x8xf32>, vector<2x8x8xf32> -> vector<2x8x8xf32>
    "tpu.trace_stop"() : () -> ()
    %148 = vector.shape_cast %147 : vector<2x8x8xf32> to vector<16x8xf32>
    %149 = vector.extract_strided_slice %19 {offsets = [24, 0], sizes = [8, 32], strides = [1, 1]} : vector<32x32xf32> to vector<8x32xf32>
    %cst_48 = arith.constant dense<0.000000e+00> : vector<16x32xf32>
    %150 = tpu.matmul %148, %149, %cst_48 {dimension_numbers = #tpu.dot_dimension_numbers<[1], [0], [0], [1], [0, 0, 1, 1], [], []>, precision = #tpu.contract_precision<fp32>} : vector<16x8xf32>, vector<8x32xf32>, vector<16x32xf32> -> vector<16x32xf32>
    %151 = arith.addf %127, %150 : vector<16x32xf32>
    %152 = vector.broadcast %11 : vector<1x32xf32> to vector<16x32xf32>
    %153 = arith.addf %151, %152 : vector<16x32xf32>
    %154 = arith.addf %0, %153 : vector<16x32xf32>
    %cst_49 = arith.constant dense<0.000000e+00> : vector<16xf32>
    %155 = vector.multi_reduction <add>, %154, %cst_49 [1] : vector<16x32xf32> to vector<16xf32>
    %156 = vector.shape_cast %155 : vector<16xf32> to vector<16x1xf32>
    %cst_50 = arith.constant 3.200000e+01 : f32
    %157 = vector.broadcast %cst_50 : f32 to vector<16x1xf32>
    %158 = arith.divf %156, %157 : vector<16x1xf32>
    %159 = vector.broadcast %158 : vector<16x1xf32> to vector<16x32xf32>
    %160 = arith.subf %154, %159 : vector<16x32xf32>
    %161 = arith.mulf %160, %160 : vector<16x32xf32>
    %cst_51 = arith.constant dense<0.000000e+00> : vector<16xf32>
    %162 = vector.multi_reduction <add>, %161, %cst_51 [1] : vector<16x32xf32> to vector<16xf32>
    %163 = vector.shape_cast %162 : vector<16xf32> to vector<16x1xf32>
    %cst_52 = arith.constant 3.200000e+01 : f32
    %164 = vector.broadcast %cst_52 : f32 to vector<16x1xf32>
    %165 = arith.divf %163, %164 : vector<16x1xf32>
    %166 = vector.broadcast %158 : vector<16x1xf32> to vector<16x32xf32>
    %167 = arith.subf %154, %166 : vector<16x32xf32>
    %cst_53 = arith.constant 9.99999974E-6 : f32
    %168 = vector.broadcast %cst_53 : f32 to vector<16x1xf32>
    %169 = arith.addf %165, %168 : vector<16x1xf32>
    %170 = math.rsqrt %169 : vector<16x1xf32>
    %171 = vector.broadcast %170 : vector<16x1xf32> to vector<16x32xf32>
    %172 = arith.mulf %167, %171 : vector<16x32xf32>
    %173 = vector.broadcast %5 : vector<1x32xf32> to vector<16x32xf32>
    %174 = arith.mulf %172, %173 : vector<16x32xf32>
    %175 = vector.broadcast %8 : vector<1x32xf32> to vector<16x32xf32>
    %176 = arith.addf %174, %175 : vector<16x32xf32>
    %177 = arith.addf %1, %2 : vector<32x32xf32>
    %cst_54 = arith.constant dense<0.000000e+00> : vector<16x32xf32>
    %178 = tpu.matmul %176, %21, %cst_54 {dimension_numbers = #tpu.dot_dimension_numbers<[1], [0], [0], [1], [0, 0, 1, 1], [], []>, precision = #tpu.contract_precision<fp32>} : vector<16x32xf32>, vector<32x32xf32>, vector<16x32xf32> -> vector<16x32xf32>
    %179 = vector.broadcast %12 : vector<1x32xf32> to vector<16x32xf32>
    %180 = arith.addf %178, %179 : vector<16x32xf32>
    %cst_55 = arith.constant dense<0.000000e+00> : vector<32x32xf32>
    %181 = tpu.matmul %177, %23, %cst_55 {dimension_numbers = #tpu.dot_dimension_numbers<[1], [0], [0], [1], [0, 0, 1, 1], [], []>, precision = #tpu.contract_precision<fp32>} : vector<32x32xf32>, vector<32x32xf32>, vector<32x32xf32> -> vector<32x32xf32>
    %182 = vector.broadcast %13 : vector<1x32xf32> to vector<32x32xf32>
    %183 = arith.addf %181, %182 : vector<32x32xf32>
    %cst_56 = arith.constant dense<0.000000e+00> : vector<32x32xf32>
    %184 = tpu.matmul %1, %25, %cst_56 {dimension_numbers = #tpu.dot_dimension_numbers<[1], [0], [0], [1], [0, 0, 1, 1], [], []>, precision = #tpu.contract_precision<fp32>} : vector<32x32xf32>, vector<32x32xf32>, vector<32x32xf32> -> vector<32x32xf32>
    %185 = vector.broadcast %14 : vector<1x32xf32> to vector<32x32xf32>
    %186 = arith.addf %184, %185 : vector<32x32xf32>
    %187 = vector.extract_strided_slice %180 {offsets = [0, 0], sizes = [16, 8], strides = [1, 1]} : vector<16x32xf32> to vector<16x8xf32>
    %188 = vector.shape_cast %187 : vector<16x8xf32> to vector<2x8x8xf32>
    %189 = vector.extract_strided_slice %183 {offsets = [0, 0], sizes = [32, 8], strides = [1, 1]} : vector<32x32xf32> to vector<32x8xf32>
    %190 = vector.shape_cast %189 : vector<32x8xf32> to vector<2x16x8xf32>
    %191 = vector.extract_strided_slice %186 {offsets = [0, 0], sizes = [32, 8], strides = [1, 1]} : vector<32x32xf32> to vector<32x8xf32>
    %192 = vector.shape_cast %191 : vector<32x8xf32> to vector<2x16x8xf32>
    "tpu.trace_start"() <{level = 10 : i32, message = "bqd,bkd->bqk"}> : () -> ()
    %cst_57 = arith.constant dense<0.000000e+00> : vector<2x8x16xf32>
    %193 = tpu.matmul %188, %190, %cst_57 {dimension_numbers = #tpu.dot_dimension_numbers<[2], [2], [1], [1], [0, 0, 0, 1, 1, 1], [0], [0]>, precision = #tpu.contract_precision<fp32>} : vector<2x8x8xf32>, vector<2x16x8xf32>, vector<2x8x16xf32> -> vector<2x8x16xf32>
    "tpu.trace_stop"() : () -> ()
    %cst_58 = arith.constant 0.353553385 : f32
    %194 = vector.broadcast %cst_58 : f32 to vector<2x8x16xf32>
    %195 = arith.mulf %193, %194 : vector<2x8x16xf32>
    %cst_59 = arith.constant dense<0xFF800000> : vector<2x8xf32>
    %196 = vector.multi_reduction <maximumf>, %195, %cst_59 [2] : vector<2x8x16xf32> to vector<2x8xf32>
    %197 = vector.shape_cast %196 : vector<2x8xf32> to vector<2x8x1xf32>
    %198 = vector.broadcast %197 : vector<2x8x1xf32> to vector<2x8x16xf32>
    %199 = arith.subf %195, %198 : vector<2x8x16xf32>
    %200 = math.exp %199 : vector<2x8x16xf32>
    %cst_60 = arith.constant dense<0.000000e+00> : vector<2x8xf32>
    %201 = vector.multi_reduction <add>, %200, %cst_60 [2] : vector<2x8x16xf32> to vector<2x8xf32>
    %202 = vector.shape_cast %201 : vector<2x8xf32> to vector<2x8x1xf32>
    %203 = tpu.reciprocal %202 {approx = true} : vector<2x8x1xf32> -> vector<2x8x1xf32>
    %204 = vector.broadcast %203 : vector<2x8x1xf32> to vector<2x8x16xf32>
    %205 = arith.mulf %200, %204 : vector<2x8x16xf32>
    "tpu.trace_start"() <{level = 10 : i32, message = "bqk,bkd->bqd"}> : () -> ()
    %cst_61 = arith.constant dense<0.000000e+00> : vector<2x8x8xf32>
    %206 = tpu.matmul %205, %192, %cst_61 {dimension_numbers = #tpu.dot_dimension_numbers<[2], [1], [1], [2], [0, 0, 0, 1, 1, 2], [0], [0]>, precision = #tpu.contract_precision<fp32>} : vector<2x8x16xf32>, vector<2x16x8xf32>, vector<2x8x8xf32> -> vector<2x8x8xf32>
    "tpu.trace_stop"() : () -> ()
    %207 = vector.shape_cast %206 : vector<2x8x8xf32> to vector<16x8xf32>
    %208 = vector.extract_strided_slice %27 {offsets = [0, 0], sizes = [8, 32], strides = [1, 1]} : vector<32x32xf32> to vector<8x32xf32>
    %cst_62 = arith.constant dense<0.000000e+00> : vector<16x32xf32>
    %209 = tpu.matmul %207, %208, %cst_62 {dimension_numbers = #tpu.dot_dimension_numbers<[1], [0], [0], [1], [0, 0, 1, 1], [], []>, precision = #tpu.contract_precision<fp32>} : vector<16x8xf32>, vector<8x32xf32>, vector<16x32xf32> -> vector<16x32xf32>
    %210 = vector.extract_strided_slice %180 {offsets = [0, 8], sizes = [16, 8], strides = [1, 1]} : vector<16x32xf32> to vector<16x8xf32>
    %211 = vector.shape_cast %210 : vector<16x8xf32> to vector<2x8x8xf32>
    %212 = vector.extract_strided_slice %183 {offsets = [0, 8], sizes = [32, 8], strides = [1, 1]} : vector<32x32xf32> to vector<32x8xf32>
    %213 = vector.shape_cast %212 : vector<32x8xf32> to vector<2x16x8xf32>
    %214 = vector.extract_strided_slice %186 {offsets = [0, 8], sizes = [32, 8], strides = [1, 1]} : vector<32x32xf32> to vector<32x8xf32>
    %215 = vector.shape_cast %214 : vector<32x8xf32> to vector<2x16x8xf32>
    "tpu.trace_start"() <{level = 10 : i32, message = "bqd,bkd->bqk"}> : () -> ()
    %cst_63 = arith.constant dense<0.000000e+00> : vector<2x8x16xf32>
    %216 = tpu.matmul %211, %213, %cst_63 {dimension_numbers = #tpu.dot_dimension_numbers<[2], [2], [1], [1], [0, 0, 0, 1, 1, 1], [0], [0]>, precision = #tpu.contract_precision<fp32>} : vector<2x8x8xf32>, vector<2x16x8xf32>, vector<2x8x16xf32> -> vector<2x8x16xf32>
    "tpu.trace_stop"() : () -> ()
    %cst_64 = arith.constant 0.353553385 : f32
    %217 = vector.broadcast %cst_64 : f32 to vector<2x8x16xf32>
    %218 = arith.mulf %216, %217 : vector<2x8x16xf32>
    %cst_65 = arith.constant dense<0xFF800000> : vector<2x8xf32>
    %219 = vector.multi_reduction <maximumf>, %218, %cst_65 [2] : vector<2x8x16xf32> to vector<2x8xf32>
    %220 = vector.shape_cast %219 : vector<2x8xf32> to vector<2x8x1xf32>
    %221 = vector.broadcast %220 : vector<2x8x1xf32> to vector<2x8x16xf32>
    %222 = arith.subf %218, %221 : vector<2x8x16xf32>
    %223 = math.exp %222 : vector<2x8x16xf32>
    %cst_66 = arith.constant dense<0.000000e+00> : vector<2x8xf32>
    %224 = vector.multi_reduction <add>, %223, %cst_66 [2] : vector<2x8x16xf32> to vector<2x8xf32>
    %225 = vector.shape_cast %224 : vector<2x8xf32> to vector<2x8x1xf32>
    %226 = tpu.reciprocal %225 {approx = true} : vector<2x8x1xf32> -> vector<2x8x1xf32>
    %227 = vector.broadcast %226 : vector<2x8x1xf32> to vector<2x8x16xf32>
    %228 = arith.mulf %223, %227 : vector<2x8x16xf32>
    "tpu.trace_start"() <{level = 10 : i32, message = "bqk,bkd->bqd"}> : () -> ()
    %cst_67 = arith.constant dense<0.000000e+00> : vector<2x8x8xf32>
    %229 = tpu.matmul %228, %215, %cst_67 {dimension_numbers = #tpu.dot_dimension_numbers<[2], [1], [1], [2], [0, 0, 0, 1, 1, 2], [0], [0]>, precision = #tpu.contract_precision<fp32>} : vector<2x8x16xf32>, vector<2x16x8xf32>, vector<2x8x8xf32> -> vector<2x8x8xf32>
    "tpu.trace_stop"() : () -> ()
    %230 = vector.shape_cast %229 : vector<2x8x8xf32> to vector<16x8xf32>
    %231 = vector.extract_strided_slice %27 {offsets = [8, 0], sizes = [8, 32], strides = [1, 1]} : vector<32x32xf32> to vector<8x32xf32>
    %cst_68 = arith.constant dense<0.000000e+00> : vector<16x32xf32>
    %232 = tpu.matmul %230, %231, %cst_68 {dimension_numbers = #tpu.dot_dimension_numbers<[1], [0], [0], [1], [0, 0, 1, 1], [], []>, precision = #tpu.contract_precision<fp32>} : vector<16x8xf32>, vector<8x32xf32>, vector<16x32xf32> -> vector<16x32xf32>
    %233 = arith.addf %209, %232 : vector<16x32xf32>
    %234 = vector.extract_strided_slice %180 {offsets = [0, 16], sizes = [16, 8], strides = [1, 1]} : vector<16x32xf32> to vector<16x8xf32>
    %235 = vector.shape_cast %234 : vector<16x8xf32> to vector<2x8x8xf32>
    %236 = vector.extract_strided_slice %183 {offsets = [0, 16], sizes = [32, 8], strides = [1, 1]} : vector<32x32xf32> to vector<32x8xf32>
    %237 = vector.shape_cast %236 : vector<32x8xf32> to vector<2x16x8xf32>
    %238 = vector.extract_strided_slice %186 {offsets = [0, 16], sizes = [32, 8], strides = [1, 1]} : vector<32x32xf32> to vector<32x8xf32>
    %239 = vector.shape_cast %238 : vector<32x8xf32> to vector<2x16x8xf32>
    "tpu.trace_start"() <{level = 10 : i32, message = "bqd,bkd->bqk"}> : () -> ()
    %cst_69 = arith.constant dense<0.000000e+00> : vector<2x8x16xf32>
    %240 = tpu.matmul %235, %237, %cst_69 {dimension_numbers = #tpu.dot_dimension_numbers<[2], [2], [1], [1], [0, 0, 0, 1, 1, 1], [0], [0]>, precision = #tpu.contract_precision<fp32>} : vector<2x8x8xf32>, vector<2x16x8xf32>, vector<2x8x16xf32> -> vector<2x8x16xf32>
    "tpu.trace_stop"() : () -> ()
    %cst_70 = arith.constant 0.353553385 : f32
    %241 = vector.broadcast %cst_70 : f32 to vector<2x8x16xf32>
    %242 = arith.mulf %240, %241 : vector<2x8x16xf32>
    %cst_71 = arith.constant dense<0xFF800000> : vector<2x8xf32>
    %243 = vector.multi_reduction <maximumf>, %242, %cst_71 [2] : vector<2x8x16xf32> to vector<2x8xf32>
    %244 = vector.shape_cast %243 : vector<2x8xf32> to vector<2x8x1xf32>
    %245 = vector.broadcast %244 : vector<2x8x1xf32> to vector<2x8x16xf32>
    %246 = arith.subf %242, %245 : vector<2x8x16xf32>
    %247 = math.exp %246 : vector<2x8x16xf32>
    %cst_72 = arith.constant dense<0.000000e+00> : vector<2x8xf32>
    %248 = vector.multi_reduction <add>, %247, %cst_72 [2] : vector<2x8x16xf32> to vector<2x8xf32>
    %249 = vector.shape_cast %248 : vector<2x8xf32> to vector<2x8x1xf32>
    %250 = tpu.reciprocal %249 {approx = true} : vector<2x8x1xf32> -> vector<2x8x1xf32>
    %251 = vector.broadcast %250 : vector<2x8x1xf32> to vector<2x8x16xf32>
    %252 = arith.mulf %247, %251 : vector<2x8x16xf32>
    "tpu.trace_start"() <{level = 10 : i32, message = "bqk,bkd->bqd"}> : () -> ()
    %cst_73 = arith.constant dense<0.000000e+00> : vector<2x8x8xf32>
    %253 = tpu.matmul %252, %239, %cst_73 {dimension_numbers = #tpu.dot_dimension_numbers<[2], [1], [1], [2], [0, 0, 0, 1, 1, 2], [0], [0]>, precision = #tpu.contract_precision<fp32>} : vector<2x8x16xf32>, vector<2x16x8xf32>, vector<2x8x8xf32> -> vector<2x8x8xf32>
    "tpu.trace_stop"() : () -> ()
    %254 = vector.shape_cast %253 : vector<2x8x8xf32> to vector<16x8xf32>
    %255 = vector.extract_strided_slice %27 {offsets = [16, 0], sizes = [8, 32], strides = [1, 1]} : vector<32x32xf32> to vector<8x32xf32>
    %cst_74 = arith.constant dense<0.000000e+00> : vector<16x32xf32>
    %256 = tpu.matmul %254, %255, %cst_74 {dimension_numbers = #tpu.dot_dimension_numbers<[1], [0], [0], [1], [0, 0, 1, 1], [], []>, precision = #tpu.contract_precision<fp32>} : vector<16x8xf32>, vector<8x32xf32>, vector<16x32xf32> -> vector<16x32xf32>
    %257 = arith.addf %233, %256 : vector<16x32xf32>
    %258 = vector.extract_strided_slice %180 {offsets = [0, 24], sizes = [16, 8], strides = [1, 1]} : vector<16x32xf32> to vector<16x8xf32>
    %259 = vector.shape_cast %258 : vector<16x8xf32> to vector<2x8x8xf32>
    %260 = vector.extract_strided_slice %183 {offsets = [0, 24], sizes = [32, 8], strides = [1, 1]} : vector<32x32xf32> to vector<32x8xf32>
    %261 = vector.shape_cast %260 : vector<32x8xf32> to vector<2x16x8xf32>
    %262 = vector.extract_strided_slice %186 {offsets = [0, 24], sizes = [32, 8], strides = [1, 1]} : vector<32x32xf32> to vector<32x8xf32>
    %263 = vector.shape_cast %262 : vector<32x8xf32> to vector<2x16x8xf32>
    "tpu.trace_start"() <{level = 10 : i32, message = "bqd,bkd->bqk"}> : () -> ()
    %cst_75 = arith.constant dense<0.000000e+00> : vector<2x8x16xf32>
    %264 = tpu.matmul %259, %261, %cst_75 {dimension_numbers = #tpu.dot_dimension_numbers<[2], [2], [1], [1], [0, 0, 0, 1, 1, 1], [0], [0]>, precision = #tpu.contract_precision<fp32>} : vector<2x8x8xf32>, vector<2x16x8xf32>, vector<2x8x16xf32> -> vector<2x8x16xf32>
    "tpu.trace_stop"() : () -> ()
    %cst_76 = arith.constant 0.353553385 : f32
    %265 = vector.broadcast %cst_76 : f32 to vector<2x8x16xf32>
    %266 = arith.mulf %264, %265 : vector<2x8x16xf32>
    %cst_77 = arith.constant dense<0xFF800000> : vector<2x8xf32>
    %267 = vector.multi_reduction <maximumf>, %266, %cst_77 [2] : vector<2x8x16xf32> to vector<2x8xf32>
    %268 = vector.shape_cast %267 : vector<2x8xf32> to vector<2x8x1xf32>
    %269 = vector.broadcast %268 : vector<2x8x1xf32> to vector<2x8x16xf32>
    %270 = arith.subf %266, %269 : vector<2x8x16xf32>
    %271 = math.exp %270 : vector<2x8x16xf32>
    %cst_78 = arith.constant dense<0.000000e+00> : vector<2x8xf32>
    %272 = vector.multi_reduction <add>, %271, %cst_78 [2] : vector<2x8x16xf32> to vector<2x8xf32>
    %273 = vector.shape_cast %272 : vector<2x8xf32> to vector<2x8x1xf32>
    %274 = tpu.reciprocal %273 {approx = true} : vector<2x8x1xf32> -> vector<2x8x1xf32>
    %275 = vector.broadcast %274 : vector<2x8x1xf32> to vector<2x8x16xf32>
    %276 = arith.mulf %271, %275 : vector<2x8x16xf32>
    "tpu.trace_start"() <{level = 10 : i32, message = "bqk,bkd->bqd"}> : () -> ()
    %cst_79 = arith.constant dense<0.000000e+00> : vector<2x8x8xf32>
    %277 = tpu.matmul %276, %263, %cst_79 {dimension_numbers = #tpu.dot_dimension_numbers<[2], [1], [1], [2], [0, 0, 0, 1, 1, 2], [0], [0]>, precision = #tpu.contract_precision<fp32>} : vector<2x8x16xf32>, vector<2x16x8xf32>, vector<2x8x8xf32> -> vector<2x8x8xf32>
    "tpu.trace_stop"() : () -> ()
    %278 = vector.shape_cast %277 : vector<2x8x8xf32> to vector<16x8xf32>
    %279 = vector.extract_strided_slice %27 {offsets = [24, 0], sizes = [8, 32], strides = [1, 1]} : vector<32x32xf32> to vector<8x32xf32>
    %cst_80 = arith.constant dense<0.000000e+00> : vector<16x32xf32>
    %280 = tpu.matmul %278, %279, %cst_80 {dimension_numbers = #tpu.dot_dimension_numbers<[1], [0], [0], [1], [0, 0, 1, 1], [], []>, precision = #tpu.contract_precision<fp32>} : vector<16x8xf32>, vector<8x32xf32>, vector<16x32xf32> -> vector<16x32xf32>
    %281 = arith.addf %257, %280 : vector<16x32xf32>
    %282 = vector.broadcast %15 : vector<1x32xf32> to vector<16x32xf32>
    %283 = arith.addf %281, %282 : vector<16x32xf32>
    %284 = arith.addf %154, %283 : vector<16x32xf32>
    %cst_81 = arith.constant dense<0.000000e+00> : vector<16xf32>
    %285 = vector.multi_reduction <add>, %284, %cst_81 [1] : vector<16x32xf32> to vector<16xf32>
    %286 = vector.shape_cast %285 : vector<16xf32> to vector<16x1xf32>
    %cst_82 = arith.constant 3.200000e+01 : f32
    %287 = vector.broadcast %cst_82 : f32 to vector<16x1xf32>
    %288 = arith.divf %286, %287 : vector<16x1xf32>
    %289 = vector.broadcast %288 : vector<16x1xf32> to vector<16x32xf32>
    %290 = arith.subf %284, %289 : vector<16x32xf32>
    %291 = arith.mulf %290, %290 : vector<16x32xf32>
    %cst_83 = arith.constant dense<0.000000e+00> : vector<16xf32>
    %292 = vector.multi_reduction <add>, %291, %cst_83 [1] : vector<16x32xf32> to vector<16xf32>
    %293 = vector.shape_cast %292 : vector<16xf32> to vector<16x1xf32>
    %cst_84 = arith.constant 3.200000e+01 : f32
    %294 = vector.broadcast %cst_84 : f32 to vector<16x1xf32>
    %295 = arith.divf %293, %294 : vector<16x1xf32>
    %296 = vector.broadcast %288 : vector<16x1xf32> to vector<16x32xf32>
    %297 = arith.subf %284, %296 : vector<16x32xf32>
    %cst_85 = arith.constant 9.99999974E-6 : f32
    %298 = vector.broadcast %cst_85 : f32 to vector<16x1xf32>
    %299 = arith.addf %295, %298 : vector<16x1xf32>
    %300 = math.rsqrt %299 : vector<16x1xf32>
    %301 = vector.broadcast %300 : vector<16x1xf32> to vector<16x32xf32>
    %302 = arith.mulf %297, %301 : vector<16x32xf32>
    %303 = vector.broadcast %6 : vector<1x32xf32> to vector<16x32xf32>
    %304 = arith.mulf %302, %303 : vector<16x32xf32>
    %305 = vector.broadcast %9 : vector<1x32xf32> to vector<16x32xf32>
    %306 = arith.addf %304, %305 : vector<16x32xf32>
    %c0_86 = arith.constant 0 : index
    %c0_87 = arith.constant 0 : index
    %307 = vector.load %arg7[%c0_86, %c0_87] : memref<32x64xf32, #tpu.memory_space<vmem>>, vector<32x64xf32>
    %cst_88 = arith.constant dense<0.000000e+00> : vector<16x64xf32>
    %308 = tpu.matmul %306, %307, %cst_88 {dimension_numbers = #tpu.dot_dimension_numbers<[1], [0], [0], [1], [0, 0, 1, 1], [], []>, precision = #tpu.contract_precision<fp32>} : vector<16x32xf32>, vector<32x64xf32>, vector<16x64xf32> -> vector<16x64xf32>
    %309 = vector.broadcast %16 : vector<1x64xf32> to vector<16x64xf32>
    %310 = arith.addf %308, %309 : vector<16x64xf32>
    %cst_89 = arith.constant 0.000000e+00 : f32
    %311 = vector.broadcast %cst_89 : f32 to vector<16x64xf32>
    %312 = arith.maximumf %310, %311 : vector<16x64xf32>
    %c0_90 = arith.constant 0 : index
    %c0_91 = arith.constant 0 : index
    %313 = vector.load %arg8[%c0_90, %c0_91] : memref<64x32xf32, #tpu.memory_space<vmem>>, vector<64x32xf32>
    %cst_92 = arith.constant dense<0.000000e+00> : vector<16x32xf32>
    %314 = tpu.matmul %312, %313, %cst_92 {dimension_numbers = #tpu.dot_dimension_numbers<[1], [0], [0], [1], [0, 0, 1, 1], [], []>, precision = #tpu.contract_precision<fp32>} : vector<16x64xf32>, vector<64x32xf32>, vector<16x32xf32> -> vector<16x32xf32>
    %315 = vector.broadcast %17 : vector<1x32xf32> to vector<16x32xf32>
    %316 = arith.addf %314, %315 : vector<16x32xf32>
    %317 = arith.addf %284, %316 : vector<16x32xf32>
    %c0_93 = arith.constant 0 : index
    %c0_94 = arith.constant 0 : index
    %318 = vector.load %arg9[%c0_93, %c0_94] : memref<16x32xf32, #tpu.memory_space<vmem>>, vector<16x32xf32>
    tpu.vector_store %arg9[%c0_93, %c0_94], %317 {strides = array<i32>} : memref<16x32xf32, #tpu.memory_space<vmem>>, vector<16x32xf32>,
    return
  }
}

</mosaic_0001>

<bundles_post_ra>
// kernel: tpu_custom_call.1
= control target key start
LH: loop header
LB: loop body
LE: loop exit
PB: predicated region body
PF: predicated region fallthrough
CT: control target
= control target key end

     0   :  { %14 = vsyncpa [#allocation3], 0  ;;  %s28536_s0 = inlined_call_operand.hbm [shape: f32[16,32], index: 0, kind: input, shape index: {}]   ;;  %s28537_s1 = inlined_call_operand.vmem [shape: f32[32,32], index: 1, kind: input, shape index: {}]   ;;  %s28538_s2 = inlined_call_operand.hbm [shape: f32[16,32], index: 2, kind: input, shape index: {}]   ;;  %s28539_s3 = inlined_call_operand.vmem [shape: f32[32,32], index: 3, kind: input, shape index: {}]   ;;  %s28540_s4 = inlined_call_operand.hbm [shape: f32[14,96], index: 4, kind: input, shape index: {}]   ;;  %s28541_s5 = inlined_call_operand.vmem [shape: f32[32,96], index: 5, kind: input, shape index: {}]   ;;  %s28542_s6 = inlined_call_operand.hbm [shape: f32[5,32,32], index: 6, kind: input, shape index: {}]   ;;  %s28543_s7 = inlined_call_operand.hbm [shape: f32[32,64], index: 7, kind: input, shape index: {}]   ;;  %s28544_s8 = inlined_call_operand.vmem [shape: f32[64,32], index: 8, kind: input, shape index: {}]   ;;  %s28545_s9 = inlined_call_operand.hbm [shape: f32[16,32], index: 9, kind: output, shape index: {}]  }
   0x1   :  { %15 = vsyncpa [#allocation6], 0 }
   0x2   :  { %16 = vsyncpa [#allocation9], 0 }
   0x3   :  { %17 = vsyncpa [#allocation4], 0  ;;  %s26820_s30 = smov [#allocation5]   ;;  %s26821_s11 = smov [#allocation8]  }
   0x4   :  { %s37_s10 = sshll.u32 %s26820_s30, 4  ;;  %s65_s12 = sshll.u32 %s26821_s11, 4  ;;  %s38_s10 = int_to_ptr.vmem [resolvable:$true] %s37_s10  ;;  %s26892_s12 = int_to_ptr.vmem [resolvable:$true] %s65_s12 }
   0x5   :  { %s26680_s15 = scalar_lea.hbm %s28538_s2, 256 }
   0x6   :  { %p26681_p0 = scmp.ne.s32.totalorder %s28538_s2, %s26680_s15  ;;  %p26684_p1 = scmp.lt.u32.totalorder %s26680_s15, %s28538_s2 }
   0x8   :  { %p26686_p2 = pnand %p26684_p1, %p26681_p0 }
   0xa   :  { %26689 = shalt.err (!%p26686_p2)
}
   0xb   :  { %s26690_s20 = scalar_lea.vmem %s38_s10, 256  ;;  %p26695_p4 = scmp.lt.s32.totalorder %s38_s10, %s38_s10 }
   0xc   :  { %p26691_p3 = scmp.ne.s32.totalorder %s38_s10, %s26690_s20  ;;  %p26696_p5 = scmp.lt.s32.totalorder %s26690_s20, %s26690_s20 }
   0xe   :  { %p26697_p6 = por %p26696_p5, %p26695_p4 }
  0x10   :  { %p26698_p7 = pnand %p26697_p6, %p26691_p3 }
  0x12   :  { %26701 = shalt.err (!%p26698_p7)
}
  0x13   :  { %s26822_s21 = smov 128   ;;  %s26823_s22 = smov 8  }
  0x14   :  { %43 = dma.hbm_to_vmem [thread:$0]  %s28538_s2, 256, %s38_s10, [#allocation6], %s26822_s21, %s26822_s21, %s26823_s22  }
  0x15   :  { %s26702_s27 = scalar_lea.hbm %s28542_s6, 2560 }
  0x16   :  { %p26703_p8 = scmp.ne.s32.totalorder %s28542_s6, %s26702_s27  ;;  %p26706_p9 = scmp.lt.u32.totalorder %s26702_s27, %s28542_s6 }
  0x18   :  { %p26708_p10 = pnand %p26706_p9, %p26703_p8 }
  0x1a   :  { %26711 = shalt.err (!%p26708_p10)
}
  0x1b   :  { %s26712_s13 = scalar_lea.vmem %s26892_s12, 2560  ;;  %p26717_p12 = scmp.lt.s32.totalorder %s26892_s12, %s26892_s12 }
  0x1c   :  { %p26713_p11 = scmp.ne.s32.totalorder %s26892_s12, %s26712_s13  ;;  %p26718_p13 = scmp.lt.s32.totalorder %s26712_s13, %s26712_s13 }
  0x1e   :  { %p26719_p0 = por %p26718_p13, %p26717_p12 }
  0x20   :  { %p26720_p1 = pnand %p26719_p0, %p26713_p11 }
  0x22   :  { %26723 = shalt.err (!%p26720_p1)
}
  0x23   :  { %71 = dma.hbm_to_vmem [thread:$0]  %s28542_s6, 2560, %s26892_s12, [#allocation9], %s26822_s21, %s26822_s21, %s26823_s22  }
  0x24   :  { %s26824_s14 = smov [#allocation2]   ;;  %s26825_s16 = smov [#allocation7]  }
  0x25   :  { %s23_s15 = sshll.u32 %s26824_s14, 4  ;;  %s51_s17 = sshll.u32 %s26825_s16, 4  ;;  %s24_s15 = int_to_ptr.vmem [resolvable:$true] %s23_s15  ;;  %s26929_s17 = int_to_ptr.vmem [resolvable:$true] %s51_s17 }
  0x26   :  { %s26724_s20 = scalar_lea.hbm %s28536_s0, 256 }
  0x27   :  { %p26725_p2 = scmp.ne.s32.totalorder %s28536_s0, %s26724_s20  ;;  %p26728_p3 = scmp.lt.u32.totalorder %s26724_s20, %s28536_s0 }
  0x29   :  { %p26730_p4 = pnand %p26728_p3, %p26725_p2 }
  0x2b   :  { %26733 = shalt.err (!%p26730_p4)
}
  0x2c   :  { %s26734_s6 = scalar_lea.vmem %s24_s15, 256  ;;  %p26739_p6 = scmp.lt.s32.totalorder %s24_s15, %s24_s15 }
  0x2d   :  { %p26735_p5 = scmp.ne.s32.totalorder %s24_s15, %s26734_s6  ;;  %p26740_p7 = scmp.lt.s32.totalorder %s26734_s6, %s26734_s6 }
  0x2f   :  { %p26741_p8 = por %p26740_p7, %p26739_p6 }
  0x31   :  { %p26742_p9 = pnand %p26741_p8, %p26735_p5 }
  0x33   :  { %26745 = shalt.err (!%p26742_p9)
}
  0x34   :  { %29 = dma.hbm_to_vmem [thread:$0]  %s28536_s0, 256, %s24_s15, [#allocation3], %s26822_s21, %s26822_s21, %s26823_s22  }
  0x35   :  { %s26746_s30 = scalar_lea.hbm %s28540_s4, 256 }
  0x36   :  { %p26747_p10 = scmp.ne.s32.totalorder %s28540_s4, %s26746_s30  ;;  %p26750_p11 = scmp.lt.u32.totalorder %s26746_s30, %s28540_s4 }
  0x38   :  { %p26752_p12 = pnand %p26750_p11, %p26747_p10 }
  0x3a   :  { %26755 = shalt.err (!%p26752_p12)
}
  0x3b   :  { %s26756_s14 = scalar_lea.vmem %s26929_s17, 256  ;;  %p26761_p0 = scmp.lt.s32.totalorder %s26929_s17, %s26929_s17 }
  0x3c   :  { %p26757_p13 = scmp.ne.s32.totalorder %s26929_s17, %s26756_s14  ;;  %p26762_p1 = scmp.lt.s32.totalorder %s26756_s14, %s26756_s14 }
  0x3e   :  { %p26763_p2 = por %p26762_p1, %p26761_p0 }
  0x40   :  { %p26764_p3 = pnand %p26763_p2, %p26757_p13 }
  0x42   :  { %26767 = shalt.err (!%p26764_p3)
}
  0x43   :  { %57 = dma.hbm_to_vmem [thread:$0]  %s28540_s4, 256, %s26929_s17, [#allocation6], %s26822_s21, %s26822_s21, %s26823_s22  }
  0x44   :  { %s26826_s16 = smov [#allocation10]   ;;  %s26768_s23 = scalar_lea.hbm %s28543_s7, 512 }
  0x45   :  { %s77_s18 = sshll.u32 %s26826_s16, 4  ;;  %p26769_p4 = scmp.ne.s32.totalorder %s28543_s7, %s26768_s23  ;;  %s78_s18 = int_to_ptr.vmem [resolvable:$true] %s77_s18 }
  0x46   :  { %p26772_p5 = scmp.lt.u32.totalorder %s26768_s23, %s28543_s7 }
  0x48   :  { %p26774_p6 = pnand %p26772_p5, %p26769_p4 }
  0x4a   :  { %26777 = shalt.err (!%p26774_p6)
}
  0x4b   :  { %s26778_s12 = scalar_lea.vmem %s78_s18, 512  ;;  %p26783_p8 = scmp.lt.s32.totalorder %s78_s18, %s78_s18 }
  0x4c   :  { %p26779_p7 = scmp.ne.s32.totalorder %s78_s18, %s26778_s12  ;;  %p26784_p9 = scmp.lt.s32.totalorder %s26778_s12, %s26778_s12 }
  0x4e   :  { %p26785_p10 = por %p26784_p9, %p26783_p8 }
  0x50   :  { %p26786_p11 = pnand %p26785_p10, %p26779_p7 }
  0x52   :  { %26789 = shalt.err (!%p26786_p11)
}
  0x53   :  { %83 = dma.hbm_to_vmem [thread:$0]  %s28543_s7, 512, %s78_s18, [#allocation9], %s26822_s21, %s26822_s21, %s26823_s22  }
  0x54   :  { %26812 = dma.done.wait [#allocation3], 256  }
  0x55   :  { %26813 = vsyncadd [#allocation3], 4294967040 }
  0x56   :  { %26814 = dma.done.wait [#allocation6], 512  }
  0x57   :  { %26815 = vsyncadd [#allocation6], 4294966784 }
  0x58   :  { %26816 = dma.done.wait [#allocation9], 3072  }
  0x59   :  { %26817 = vsyncadd [#allocation9], 4294964224  ;;  %vm141_vm0 = vcmask 261120   ;;  %v101_v0 = vld [vmem:[#allocation2] sm:$0xff]  ;;  %v102_v1 = vld [vmem:[#allocation2 + $0x8] sm:$0xff]  ;;  %v169_v48 = vlaneseq  ;;  %vm26828_vm1 = vmmov 0  }
  0x5a   :  { %v142_v2 = vsel %vm141_vm0, %v101_v0, 0.0  ;;  %v145_v3 = vsel %vm141_vm0, %v102_v1, 0.0  ;;  %v137_v14 = vld [vmem:[%s28541_s5] sm:$0xff]  ;;  %v138_v15 = vld [vmem:[%s28541_s5 + $0x8] sm:$0xff]  ;;  %v139_v16 = vld [vmem:[%s28541_s5 + $0x10] sm:$0xff]  ;;  %vm722_vm2 = vcmask 64512  }
  0x5b   :  { %143 = vadd.xlane.f32.xlu0 %v142_v2  ;;  %v192_v17 = vand.u32 4294901760, %v137_v14  ;;  %v195_v18 = vand.u32 4294901760, %v138_v15  ;;  %v140_v19 = vld [vmem:[%s28541_s5 + $0x18] sm:$0xff]  ;;  %v198_v20 = vand.u32 4294901760, %v139_v16  ;;  %v27005_v52 = vshrl.u32 %v169_v48, 7  ;;  %v111_v55 = vld [vmem:[#allocation7] sm:$0xff] }
  0x5c   :  { %v201_v21 = vand.u32 4294901760, %v140_v19  ;;  %s26829_s5 = smov 96   ;;  %s26830_s10 = smov 120   ;;  %vm12832_vm3 = vcmask 130048   ;;  %vm22075_vm4 = vcmask 523264  }
  0x5d   :  { %v26997_v22 = vpack.c.bf16 %v195_v18, %v192_v17  ;;  %v282_v24 = vsub.f32 %v137_v14, %v192_v17  ;;  %v289_v25 = vsub.f32 %v138_v15, %v195_v18  ;;  %v296_v30 = vsub.f32 %v139_v16, %v198_v20  ;;  %s26831_s14 = smov 88   ;;  %s26832_s0 = smov 64  }
  0x5e   :  { %v26999_v23 = vpack.c.bf16 %v201_v21, %v198_v20  ;;  %v303_v31 = vsub.f32 %v140_v19, %v201_v21  ;;  %v171_v54 = vsub.s32 0, %v27005_v52  ;;  %v177_v56 = vsub.s32 3, %v27005_v52  ;;  %s26833_s15 = smov 56   ;;  %s26834_s16 = smov 80  }
  0x5f   :  { %146 = vadd.xlane.f32.xlu0 %v145_v3  ;;  %25446 = vmatprep.subr.bf16.mxu0 %v26997_v22  ;;  %v283_v26 = vand.u32 4294901760, %v282_v24  ;;  %v290_v27 = vand.u32 4294901760, %v289_v25  ;;  %v297_v34 = vand.u32 4294901760, %v296_v30  ;;  %v25461_v42 = vpack.c.bf16 %v289_v25, %v282_v24  ;;  %s26835_s18 = smov 112   ;;  %s26836_s19 = smov 48  }
  0x60   :  { %25448 = vmatpush3.bf16.msra.mxu0 %v26997_v22  ;;  %v304_v35 = vand.u32 4294901760, %v303_v31  ;;  %v25465_v43 = vpack.c.bf16 %v303_v31, %v296_v30  ;;  %v172_v57 = vrot.slane %v111_v55, %v171_v54  ;;  %v178_v60 = vrot.slane %v111_v55, %v177_v56  ;;  %s26837_s20 = smov 104   ;;  %s26838_s23 = smov 72  }
  0x61   :  { %25450 = vmatprep.subr.bf16.mxu0 %v26999_v23  ;;  %v284_v28 = vsub.f32 %v282_v24, %v283_v26  ;;  %v291_v29 = vsub.f32 %v289_v25, %v290_v27  ;;  %v298_v37 = vsub.f32 %v296_v30, %v297_v34  ;;  %v25477_v44 = vpack.c.bf16 %v290_v27, %v283_v26  ;;  %s26839_s24 = smov 40  }
  0x62   :  { %v305_v38 = vsub.f32 %v303_v31, %v304_v35  ;;  %v25481_v45 = vpack.c.bf16 %v304_v35, %v297_v34  ;;  %v26827_v16 = vmov 0.0  }
  0x63   :  { %v285_v32 = vand.u32 4294901760, %v284_v28  ;;  %v292_v33 = vand.u32 4294901760, %v291_v29  ;;  %v299_v39 = vand.u32 4294901760, %v298_v37  ;;  %23639 = vmatprep.subr.mxu1 %v26827_v16  ;;  %23641 = vmatprep.mubr.msk.f32.mxu1 %vm26828_vm1, %v26827_v16 }
  0x64   :  { %25452 = vmatpush3.bf16.msra.mxu0 %v26999_v23  ;;  %v306_v40 = vand.u32 4294901760, %v305_v38 }
  0x65   :  { %v25453_v36 = vpack.c.bf16 %v292_v33, %v285_v32 }
  0x66   :  { %v25457_v41 = vpack.c.bf16 %v306_v40, %v299_v39 }
  0x67   :  { %25454 = vmatprep.subr.bf16.mxu0 %v25453_v36 }
  0xe8   :  { %v144_v4 = vpop.xlane.xlu0 %143 }
  0xe9   :  { %v149_v5 = vmul.f32 0.03125, %v144_v4 }
  0xeb   :  { %v151_v6 = vsub.f32 %v101_v0, %v149_v5 }
  0xec   :  { %v147_v7 = vpop.xlane.xlu0 %146 }
  0xed   :  { %v150_v8 = vmul.f32 0.03125, %v147_v7  ;;  %v153_v9 = vmul.f32 %v151_v6, %v151_v6 }
  0xef   :  { %v152_v10 = vsub.f32 %v102_v1, %v150_v8  ;;  %v155_v11 = vsel %vm141_vm0, %v153_v9, 0.0 }
  0xf0   :  { %156 = vadd.xlane.f32.xlu1 %v155_v11 }
  0xf1   :  { %v154_v12 = vmul.f32 %v152_v10, %v152_v10 }
  0xf3   :  { %v158_v13 = vsel %vm141_vm0, %v154_v12, 0.0 }
  0xf4   :  { %159 = vadd.xlane.f32.xlu1 %v158_v13 }
 0x17d   :  { %v157_v46 = vpop.xlane.xlu1 %156 }
 0x17e   :  { %v161_v47 = vmul.f32 0.03125, %v157_v46 }
 0x180   :  { %v163_v49 = vadd.f32 1e-05, %v161_v47 }
 0x181   :  { %v160_v50 = vpop.xlane.xlu1 %159 }
 0x182   :  { %26599 = vrsqrt.f32 %v163_v49  ;;  %v162_v51 = vmul.f32 0.03125, %v160_v50 }
 0x184   :  { %v164_v53 = vadd.f32 1e-05, %v162_v51 }
 0x186   :  { %26601 = vrsqrt.f32 %v164_v53 }
 0x18c   :  { %v26600_v58 = vpop.eup %26599 }
 0x18d   :  { %v167_v59 = vmul.f32 %v26600_v58, %v151_v6 }
 0x18f   :  { %v173_v61 = vmul.f32 %v172_v57, %v167_v59 }
 0x190   :  { %v26602_v62 = vpop.eup %26601 }
 0x191   :  { %v168_v63 = vmul.f32 %v26602_v62, %v152_v10  ;;  %v179_v0 = vadd.f32 %v178_v60, %v173_v61  ;;  %v183_v10 = vsub.s32 6, %v27005_v52 }
 0x193   :  { %v186_v1 = vsel %vm141_vm0, %v179_v0, 0  ;;  %v174_v2 = vmul.f32 %v172_v57, %v168_v63  ;;  %v184_v17 = vrot.slane %v111_v55, %v183_v10 }
 0x194   :  { %v260_v3 = vand.u32 4294901760, %v186_v1 }
 0x195   :  { %v180_v4 = vadd.f32 %v178_v60, %v174_v2 }
 0x196   :  { %v261_v5 = vsub.f32 %v186_v1, %v260_v3 }
 0x197   :  { %v189_v7 = vsel %vm141_vm0, %v180_v4, 0 }
 0x198   :  { %v262_v8 = vand.u32 4294901760, %v261_v5  ;;  %v270_v9 = vand.u32 4294901760, %v189_v7 }
 0x19a   :  { %v263_v11 = vsub.f32 %v261_v5, %v262_v8  ;;  %v271_v12 = vsub.f32 %v189_v7, %v270_v9 }
 0x19c   :  { %v264_v6 = vand.u32 4294901760, %v263_v11  ;;  %v272_v13 = vand.u32 4294901760, %v271_v12 }
 0x19e   :  { %23581 = vmatprep.mubr.f32.mxu0 %v264_v6  ;;  %v273_v14 = vsub.f32 %v271_v12, %v272_v13 }
 0x1a0   :  { %v274_v15 = vand.u32 4294901760, %v273_v14 }
 0x1a2   :  { %23582 = vmatmul.mubr.f32.vlgmr.msra.gmra.mrb[0].mxu0 %v274_v15 }
 0x1a3   :  { %25456 = vmatpush3.bf16.msra.mxu0 %v25453_v36  ;;  %23592 = vmatprep.mubr.f32.mxu0 %v260_v3 }
 0x1a4   :  { %25458 = vmatprep.subr.bf16.mxu0 %v25457_v41 }
 0x1a7   :  { %25460 = vmatpush3.bf16.msra.mxu0 %v25457_v41 }
 0x1a8   :  { %25462 = vmatprep.subr.bf16.mxu0 %v25461_v42 }
 0x1aa   :  { %23593 = vmatmul.mubr.f32.vlgmr.msra.gmra.mrb[0].mxu0 %v270_v9 }
 0x1ab   :  { %25464 = vmatpush3.bf16.msra.mxu0 %v25461_v42  ;;  %23603 = vmatprep.mubr.f32.mxu0 %v261_v5 }
 0x1ac   :  { %25466 = vmatprep.subr.bf16.mxu0 %v25465_v43 }
 0x1af   :  { %25468 = vmatpush3.bf16.msra.mxu0 %v25465_v43 }
 0x1b0   :  { %25470 = vmatprep.subr.bf16.mxu0 %v26997_v22 }
 0x1b2   :  { %23604 = vmatmul.mubr.f32.vlgmr.msra.gmra.mrb[0].mxu0 %v271_v12 }
 0x1b3   :  { %25472 = vmatpush3.bf16.msra.mxu0 %v26997_v22  ;;  %23614 = vmatprep.mubr.f32.mxu0 %v262_v8 }
 0x1b4   :  { %25474 = vmatprep.subr.bf16.mxu0 %v26999_v23 }
 0x1b7   :  { %25476 = vmatpush3.bf16.msra.mxu0 %v26999_v23 }
 0x1b8   :  { %25478 = vmatprep.subr.bf16.mxu0 %v25477_v44 }
 0x1ba   :  { %23615 = vmatmul.mubr.f32.vlgmr.msra.gmra.mrb[0].mxu0 %v272_v13 }
 0x1bb   :  { %25480 = vmatpush3.bf16.msra.mxu0 %v25477_v44  ;;  %23625 = vmatprep.mubr.f32.mxu0 %v260_v3 }
 0x1bc   :  { %25482 = vmatprep.subr.bf16.mxu0 %v25481_v45 }
 0x1bf   :  { %25484 = vmatpush3.bf16.msra.mxu0 %v25481_v45 }
 0x1c0   :  { %25486 = vmatprep.subr.bf16.mxu0 %v26997_v22 }
 0x1c2   :  { %23626 = vmatmul.mubr.f32.vlgmr.msra.gmra.mrb[0].mxu0 %v270_v9 }
 0x1c3   :  { %25488 = vmatpush3.bf16.msra.mxu0 %v26997_v22  ;;  %23636 = vmatprep.mubr.f32.mxu0 %v260_v3 }
 0x1c4   :  { %25490 = vmatprep.subr.bf16.mxu0 %v26999_v23 }
 0x1c7   :  { %25492 = vmatpush3.bf16.msra.mxu0 %v26999_v23 }
 0x1c8   :  { %23699 = vmatprep.subr.mxu0 %v26827_v16 }
 0x1ca   :  { %23637 = vmatmul.mubr.f32.vlgmr.msra.gmra.mrb[0].mxu0 %v270_v9 }
 0x1cb   :  { %23701 = vmatprep.mubr.msk.f32.mxu0 %vm26828_vm1, %v26827_v16 }
 0x29d   :  { %v23638_v18 = vpop.f32.mrb[0].mxu0 }
 0x29e   :  { %v27030_v19 = vadd.f32 %v23638_v18, %v184_v17  ;;  %v709_v20 = vpop.f32.mrb[1].mxu0 }
 0x29f   :  { %v27032_v21 = vadd.f32 %v709_v20, %v184_v17 }
 0x2a0   :  { %1174 = vrot.lane.b32.xlu1 %v27030_v19, %s26829_s5  ;;  %v1176_v36 = vsel %vm722_vm2, %v27030_v19, 0 }
 0x2a1   :  { %720 = vrot.lane.b32.xlu0 %v27032_v21, %s26829_s5  ;;  %v723_v22 = vsel %vm722_vm2, %v27032_v21, 0  ;;  %v1246_v38 = vand.u32 4294901760, %v1176_v36 }
 0x2a2   :  { %v793_v23 = vand.u32 4294901760, %v723_v22 }
 0x2a3   :  { %v1247_v40 = vsub.f32 %v1176_v36, %v1246_v38 }
 0x2a4   :  { %v794_v24 = vsub.f32 %v723_v22, %v793_v23 }
 0x2a5   :  { %v1248_v42 = vand.u32 4294901760, %v1247_v40 }
 0x2a6   :  { %v795_v25 = vand.u32 4294901760, %v794_v24 }
 0x2a7   :  { %v1249_v44 = vsub.f32 %v1247_v40, %v1248_v42 }
 0x2a8   :  { %v796_v28 = vsub.f32 %v794_v24, %v795_v25 }
 0x2a9   :  { %v1250_v46 = vand.u32 4294901760, %v1249_v44 }
 0x2aa   :  { %v797_v31 = vand.u32 4294901760, %v796_v28 }
 0x312   :  { %v1175_v35 = vpop.permute.xlu1 %1174 }
 0x313   :  { %v721_v26 = vpop.permute.xlu0 %720  ;;  %v1178_v37 = vsel %vm722_vm2, %v1175_v35, 0 }
 0x314   :  { %v725_v27 = vsel %vm722_vm2, %v721_v26, 0  ;;  %v1181_v39 = vand.u32 4294901760, %v1178_v37 }
 0x315   :  { %v728_v29 = vand.u32 4294901760, %v725_v27 }
 0x316   :  { %v1258_v41 = vsub.f32 %v1178_v37, %v1181_v39 }
 0x317   :  { %v805_v30 = vsub.f32 %v725_v27, %v728_v29  ;;  %23640 = vmatpush3.xpose.msra.mxu1 %v728_v29 }
 0x318   :  { %23644 = vmatprep.subr.mxu1 %v26827_v16  ;;  %v1259_v43 = vand.u32 4294901760, %v1258_v41 }
 0x319   :  { %v806_v32 = vand.u32 4294901760, %v805_v30 }
 0x31a   :  { %23642 = vmatmul.mubr.f32.vlgmr.msra.gmra.mrb[0].mxu1 %v797_v31  ;;  %v1260_v45 = vsub.f32 %v1258_v41, %v1259_v43 }
 0x31b   :  { %v807_v33 = vsub.f32 %v805_v30, %v806_v32  ;;  %23646 = vmatprep.mubr.msk.f32.mxu1 %vm26828_vm1, %v26827_v16 }
 0x31c   :  { %v1261_v47 = vand.u32 4294901760, %v1260_v45 }
 0x31d   :  { %v808_v34 = vand.u32 4294901760, %v807_v33 }
 0x31f   :  { %23645 = vmatpush3.xpose.msra.mxu1 %v808_v34 }
 0x320   :  { %23649 = vmatprep.subr.mxu1 %v26827_v16 }
 0x322   :  { %23647 = vmatmul.mubr.f32.vlgmr.msra.gmra.mrb[0].mxu1 %v793_v23 }
 0x323   :  { %23650 = vmatpush3.xpose.msra.mxu1 %v805_v30  ;;  %23651 = vmatprep.mubr.msk.f32.mxu1 %vm26828_vm1, %v26827_v16 }
 0x324   :  { %23654 = vmatprep.subr.mxu1 %v26827_v16 }
 0x32a   :  { %23652 = vmatmul.mubr.f32.vlgmr.msra.gmra.mrb[0].mxu1 %v794_v24 }
 0x32b   :  { %23655 = vmatpush3.xpose.msra.mxu1 %v728_v29  ;;  %23656 = vmatprep.mubr.msk.f32.mxu1 %vm26828_vm1, %v26827_v16 }
 0x32c   :  { %23659 = vmatprep.subr.mxu1 %v26827_v16 }
 0x332   :  { %23657 = vmatmul.mubr.f32.vlgmr.msra.gmra.mrb[0].mxu1 %v795_v25 }
 0x333   :  { %23660 = vmatpush3.xpose.msra.mxu1 %v806_v32  ;;  %23661 = vmatprep.mubr.msk.f32.mxu1 %vm26828_vm1, %v26827_v16 }
 0x334   :  { %23664 = vmatprep.subr.mxu1 %v26827_v16 }
 0x33a   :  { %23662 = vmatmul.mubr.f32.vlgmr.msra.gmra.mrb[0].mxu1 %v793_v23 }
 0x33b   :  { %23665 = vmatpush3.xpose.msra.mxu1 %v728_v29  ;;  %23666 = vmatprep.mubr.msk.f32.mxu1 %vm26828_vm1, %v26827_v16 }
 0x33c   :  { %23669 = vmatprep.subr.mxu1 %v26827_v16 }
 0x342   :  { %23667 = vmatmul.mubr.f32.vlgmr.msra.gmra.mrb[0].mxu1 %v793_v23 }
 0x343   :  { %23670 = vmatpush3.xpose.msra.mxu1 %v1181_v39  ;;  %23671 = vmatprep.mubr.msk.f32.mxu1 %vm26828_vm1, %v26827_v16 }
 0x344   :  { %23674 = vmatprep.subr.mxu1 %v26827_v16 }
 0x346   :  { %23672 = vmatmul.mubr.f32.vlgmr.msra.gmra.mrb[2].mxu1 %v1250_v46 }
 0x347   :  { %23675 = vmatpush3.xpose.msra.mxu1 %v1261_v47  ;;  %23676 = vmatprep.mubr.msk.f32.mxu1 %vm26828_vm1, %v26827_v16 }
 0x348   :  { %23679 = vmatprep.subr.mxu1 %v26827_v16 }
 0x34e   :  { %23677 = vmatmul.mubr.f32.vlgmr.msra.gmra.mrb[2].mxu1 %v1246_v38 }
 0x34f   :  { %23680 = vmatpush3.xpose.msra.mxu1 %v1258_v41  ;;  %23681 = vmatprep.mubr.msk.f32.mxu1 %vm26828_vm1, %v26827_v16 }
 0x350   :  { %23684 = vmatprep.subr.mxu1 %v26827_v16 }
 0x356   :  { %23682 = vmatmul.mubr.f32.vlgmr.msra.gmra.mrb[2].mxu1 %v1247_v40 }
 0x357   :  { %23685 = vmatpush3.xpose.msra.mxu1 %v1181_v39  ;;  %23686 = vmatprep.mubr.msk.f32.mxu1 %vm26828_vm1, %v26827_v16 }
 0x358   :  { %23689 = vmatprep.subr.mxu1 %v26827_v16 }
 0x35e   :  { %23687 = vmatmul.mubr.f32.vlgmr.msra.gmra.mrb[2].mxu1 %v1248_v42 }
 0x35f   :  { %23690 = vmatpush3.xpose.msra.mxu1 %v1259_v43  ;;  %23691 = vmatprep.mubr.msk.f32.mxu1 %vm26828_vm1, %v26827_v16 }
 0x360   :  { %23694 = vmatprep.subr.mxu1 %v26827_v16 }
 0x366   :  { %23692 = vmatmul.mubr.f32.vlgmr.msra.gmra.mrb[2].mxu1 %v1246_v38 }
 0x367   :  { %23695 = vmatpush3.xpose.msra.mxu1 %v1181_v39  ;;  %23696 = vmatprep.mubr.msk.f32.mxu1 %vm26828_vm1, %v26827_v16 }
 0x368   :  { %23729 = vmatprep.subr.mxu1 %v26827_v16 }
 0x36e   :  { %23697 = vmatmul.mubr.f32.vlgmr.msra.gmra.mrb[2].mxu1 %v1246_v38 }
 0x36f   :  { %23731 = vmatprep.mubr.msk.f32.mxu1 %vm26828_vm1, %v26827_v16 }
 0x415   :  { %v1169_v48 = vpop.f32.mrb[0].mxu1 }
 0x416   :  { %v23668_v49 = vpop.f32.mrb[1].mxu1  ;;  %v1626_v57 = vmul.f32 0.35355338, %v1169_v48 }
 0x418   :  { %v1628_v58 = vsel %vm722_vm2, %v1626_v57, -inf }
 0x441   :  { %v1622_v50 = vpop.f32.mrb[2].mxu1 }
 0x442   :  { %v1627_v51 = vmul.f32 0.35355338, %v1622_v50  ;;  %v23698_v53 = vpop.f32.mrb[3].mxu1 }
 0x444   :  { %v1631_v55 = vsel %vm722_vm2, %v1627_v51, -inf }
 0x445   :  { %1632 = vmax.xlane.f32.xlu1 %v1631_v55 }
 0x456   :  { %3008 = vrot.lane.b32.xlu1 %v27030_v19, %s26830_s10 }
 0x45a   :  { %3010 = vrot.lane.b32.xlu1 %v27030_v19, %s26831_s14 }
 0x47e   :  { %1629 = vmax.xlane.f32.xlu1 %v1628_v58 }
 0x48f   :  { %2554 = vrot.lane.b32.xlu1 %v27032_v21, %s26830_s10 }
 0x493   :  { %2556 = vrot.lane.b32.xlu1 %v27032_v21, %s26831_s14 }
 0x4d2   :  { %v1633_v59 = vpop.xlane.xlu1 %1632 }
 0x4d3   :  { %v1635_v60 = vsub.f32 %v1627_v51, %v1633_v59 }
 0x4d5   :  { %v1638_v61 = vmul.f32 1.442695, %v1635_v60 }
 0x4d6   :  { %v3009_v0 = vpop.permute.xlu1 %3008 }
 0x4d7   :  { %26603 = vpow2.f32 %v1638_v61  ;;  %v3012_v25 = vsel %vm722_vm2, %v3009_v0, 0 }
 0x4d8   :  { %v27108_v27 = vand.u32 4294901760, %v3012_v25 }
 0x4da   :  { %v3011_v1 = vpop.permute.xlu1 %3010  ;;  %v3083_v29 = vsub.f32 %v3012_v25, %v27108_v27 }
 0x4db   :  { %v3014_v26 = vsel %vm722_vm2, %v3011_v1, 0 }
 0x4dc   :  { %v27111_v28 = vand.u32 4294901760, %v3014_v26  ;;  %v3084_v32 = vand.u32 4294901760, %v3083_v29 }
 0x4de   :  { %v3094_v30 = vsub.f32 %v3014_v26, %v27111_v28  ;;  %v3085_v36 = vsub.f32 %v3083_v29, %v3084_v32 }
 0x4e0   :  { %v3095_v33 = vand.u32 4294901760, %v3094_v30  ;;  %v3086_v38 = vand.u32 4294901760, %v3085_v36 }
 0x4e1   :  { %v26604_v62 = vpop.eup %26603 }
 0x4e2   :  { %v1643_v63 = vsel %vm722_vm2, %v26604_v62, 0.0  ;;  %v3096_v37 = vsub.f32 %v3094_v30, %v3095_v33 }
 0x4e3   :  { %1644 = vadd.xlane.f32.xlu0 %v1643_v63 }
 0x4e4   :  { %v3097_v40 = vand.u32 4294901760, %v3096_v37 }
 0x4f9   :  { %2102 = vrot.lane.b32.xlu0 %v27030_v19, %s26832_s0 }
 0x50b   :  { %v1630_v2 = vpop.xlane.xlu1 %1629 }
 0x50c   :  { %v1634_v3 = vsub.f32 %v1626_v57, %v1630_v2 }
 0x50e   :  { %v1636_v4 = vmul.f32 1.442695, %v1634_v3 }
 0x50f   :  { %v2555_v53 = vpop.permute.xlu1 %2554 }
 0x510   :  { %26605 = vpow2.f32 %v1636_v4  ;;  %v2558_v57 = vsel %vm722_vm2, %v2555_v53, 0 }
 0x511   :  { %v2628_v59 = vand.u32 4294901760, %v2558_v57 }
 0x513   :  { %v2557_v55 = vpop.permute.xlu1 %2556  ;;  %v2629_v61 = vsub.f32 %v2558_v57, %v2628_v59 }
 0x514   :  { %v2560_v58 = vsel %vm722_vm2, %v2557_v55, 0 }
 0x515   :  { %v2563_v60 = vand.u32 4294901760, %v2560_v58  ;;  %v2630_v63 = vand.u32 4294901760, %v2629_v61 }
 0x517   :  { %v2631_v1 = vsub.f32 %v2629_v61, %v2630_v63 }
 0x519   :  { %v2632_v3 = vand.u32 4294901760, %v2631_v1 }
 0x51a   :  { %v27088_v5 = vpop.eup %26605 }
 0x51b   :  { %v1640_v7 = vsel %vm722_vm2, %v27088_v5, 0.0 }
 0x51c   :  { %1641 = vadd.xlane.f32.xlu0 %v1640_v7 }
 0x532   :  { %1650 = vrot.lane.b32.xlu0 %v27032_v21, %s26832_s0 }
 0x570   :  { %v1645_v8 = vpop.xlane.xlu0 %1644 }
 0x571   :  { %26607 = vrcp.f32 %v1645_v8 }
 0x574   :  { %v2103_v9 = vpop.permute.xlu0 %2102 }
 0x575   :  { %v2109_v11 = vand.u32 4294901760, %v2103_v9 }
 0x577   :  { %23730 = vmatpush3.msra.mxu1 %v2109_v11  ;;  %v2186_v13 = vsub.f32 %v2103_v9, %v2109_v11 }
 0x578   :  { %23734 = vmatprep.subr.mxu1 %v26827_v16 }
 0x579   :  { %v2187_v10 = vand.u32 4294901760, %v2186_v13 }
 0x57b   :  { %v26608_v12 = vpop.eup %26607  ;;  %v2188_v20 = vsub.f32 %v2186_v13, %v2187_v10 }
 0x57c   :  { %v1649_v6 = vmul.f32 %v26608_v12, %v26604_v62  ;;  %v2640_v62 = vsub.f32 %v2560_v58, %v2563_v60 }
 0x57d   :  { %v2189_v24 = vand.u32 4294901760, %v2188_v20 }
 0x57e   :  { %v2106_v14 = vsel %vm722_vm2, %v1649_v6, 0  ;;  %v2641_v0 = vand.u32 4294901760, %v2640_v62 }
 0x57f   :  { %v2174_v15 = vand.u32 4294901760, %v2106_v14 }
 0x580   :  { %v2642_v2 = vsub.f32 %v2640_v62, %v2641_v0 }
 0x581   :  { %v2175_v17 = vsub.f32 %v2106_v14, %v2174_v15 }
 0x582   :  { %v2643_v4 = vand.u32 4294901760, %v2642_v2 }
 0x583   :  { %v2176_v18 = vand.u32 4294901760, %v2175_v17 }
 0x585   :  { %v2177_v22 = vsub.f32 %v2175_v17, %v2176_v18 }
 0x587   :  { %v2178_v23 = vand.u32 4294901760, %v2177_v22 }
 0x589   :  { %23732 = vmatmul.mubr.f32.vlgmr.msra.gmra.mrb[4].mxu1 %v2178_v23 }
 0x58a   :  { %23735 = vmatpush3.msra.mxu1 %v2189_v24  ;;  %23736 = vmatprep.mubr.msk.f32.mxu1 %vm26828_vm1, %v26827_v16 }
 0x58b   :  { %23739 = vmatprep.subr.mxu1 %v26827_v16 }
 0x591   :  { %23737 = vmatmul.mubr.f32.vlgmr.msra.gmra.mrb[4].mxu1 %v2174_v15 }
 0x592   :  { %23740 = vmatpush3.msra.mxu1 %v2186_v13  ;;  %23741 = vmatprep.mubr.msk.f32.mxu1 %vm26828_vm1, %v26827_v16 }
 0x593   :  { %23744 = vmatprep.subr.mxu1 %v26827_v16 }
 0x599   :  { %23742 = vmatmul.mubr.f32.vlgmr.msra.gmra.mrb[4].mxu1 %v2175_v17 }
 0x59a   :  { %23745 = vmatpush3.msra.mxu1 %v2109_v11  ;;  %23746 = vmatprep.mubr.msk.f32.mxu1 %vm26828_vm1, %v26827_v16 }
 0x59b   :  { %23749 = vmatprep.subr.mxu1 %v26827_v16 }
 0x5a1   :  { %23747 = vmatmul.mubr.f32.vlgmr.msra.gmra.mrb[4].mxu1 %v2176_v18 }
 0x5a2   :  { %23750 = vmatpush3.msra.mxu1 %v2187_v10  ;;  %23751 = vmatprep.mubr.msk.f32.mxu1 %vm26828_vm1, %v26827_v16 }
 0x5a3   :  { %23754 = vmatprep.subr.mxu1 %v26827_v16 }
 0x5a9   :  { %23752 = vmatmul.mubr.f32.vlgmr.msra.gmra.mrb[4].mxu1 %v2174_v15  ;;  %v1642_v31 = vpop.xlane.xlu0 %1641 }
 0x5aa   :  { %23755 = vmatpush3.msra.mxu1 %v2109_v11  ;;  %26609 = vrcp.f32 %v1642_v31  ;;  %23756 = vmatprep.mubr.msk.f32.mxu1 %vm26828_vm1, %v26827_v16 }
 0x5ab   :  { %23789 = vmatprep.subr.mxu1 %v26827_v16 }
 0x5ad   :  { %v1651_v34 = vpop.permute.xlu0 %1650 }
 0x5ae   :  { %v27118_v35 = vand.u32 4294901760, %v1651_v34 }
 0x5b0   :  { %23700 = vmatpush3.msra.mxu0 %v27118_v35  ;;  %v1734_v42 = vsub.f32 %v1651_v34, %v27118_v35 }
 0x5b1   :  { %23757 = vmatmul.mubr.f32.vlgmr.msra.gmra.mrb[4].mxu1 %v2174_v15  ;;  %23704 = vmatprep.subr.mxu0 %v26827_v16 }
 0x5b2   :  { %23790 = vmatpush3.xpose.msra.mxu1 %v27111_v28  ;;  %23791 = vmatprep.mubr.msk.f32.mxu1 %vm26828_vm1, %v26827_v16  ;;  %v1735_v45 = vand.u32 4294901760, %v1734_v42 }
 0x5b3   :  { %23794 = vmatprep.subr.mxu1 %v26827_v16 }
 0x5b4   :  { %v26610_v39 = vpop.eup %26609  ;;  %v1736_v48 = vsub.f32 %v1734_v42, %v1735_v45 }
 0x5b5   :  { %v1648_v41 = vmul.f32 %v26610_v39, %v27088_v5  ;;  %23792 = vmatmul.mubr.f32.vlgmr.msra.gmra.mrb[6].mxu1 %v3086_v38 }
 0x5b6   :  { %23795 = vmatpush3.xpose.msra.mxu1 %v3097_v40  ;;  %23796 = vmatprep.mubr.msk.f32.mxu1 %vm26828_vm1, %v26827_v16  ;;  %v1737_v51 = vand.u32 4294901760, %v1736_v48 }
 0x5b7   :  { %23799 = vmatprep.subr.mxu1 %v26827_v16  ;;  %v1654_v43 = vsel %vm722_vm2, %v1648_v41, 0 }
 0x5b8   :  { %v1722_v44 = vand.u32 4294901760, %v1654_v43 }
 0x5ba   :  { %v1723_v46 = vsub.f32 %v1654_v43, %v1722_v44 }
 0x5bc   :  { %v1724_v47 = vand.u32 4294901760, %v1723_v46 }
 0x5bd   :  { %23797 = vmatmul.mubr.f32.vlgmr.msra.gmra.mrb[6].mxu1 %v27108_v27 }
 0x5be   :  { %23800 = vmatpush3.xpose.msra.mxu1 %v3094_v30  ;;  %v1725_v49 = vsub.f32 %v1723_v46, %v1724_v47  ;;  %23801 = vmatprep.mubr.msk.f32.mxu1 %vm26828_vm1, %v26827_v16 }
 0x5bf   :  { %23804 = vmatprep.subr.mxu1 %v26827_v16 }
 0x5c0   :  { %v1726_v50 = vand.u32 4294901760, %v1725_v49 }
 0x5c2   :  { %23702 = vmatmul.mubr.f32.vlgmr.msra.gmra.mrb[2].mxu0 %v1726_v50 }
 0x5c3   :  { %23705 = vmatpush3.msra.mxu0 %v1737_v51  ;;  %23706 = vmatprep.mubr.msk.f32.mxu0 %vm26828_vm1, %v26827_v16 }
 0x5c4   :  { %23709 = vmatprep.subr.mxu0 %v26827_v16 }
 0x5c5   :  { %23802 = vmatmul.mubr.f32.vlgmr.msra.gmra.mrb[6].mxu1 %v3083_v29 }
 0x5c6   :  { %23805 = vmatpush3.xpose.msra.mxu1 %v27111_v28  ;;  %23806 = vmatprep.mubr.msk.f32.mxu1 %vm26828_vm1, %v26827_v16 }
 0x5c7   :  { %23809 = vmatprep.subr.mxu1 %v26827_v16 }
 0x5ca   :  { %23707 = vmatmul.mubr.f32.vlgmr.msra.gmra.mrb[2].mxu0 %v1722_v44 }
 0x5cb   :  { %23710 = vmatpush3.msra.mxu0 %v1734_v42  ;;  %23711 = vmatprep.mubr.msk.f32.mxu0 %vm26828_vm1, %v26827_v16 }
 0x5cc   :  { %23714 = vmatprep.subr.mxu0 %v26827_v16 }
 0x5cd   :  { %23807 = vmatmul.mubr.f32.vlgmr.msra.gmra.mrb[6].mxu1 %v3084_v32 }
 0x5ce   :  { %23810 = vmatpush3.xpose.msra.mxu1 %v3095_v33  ;;  %23811 = vmatprep.mubr.msk.f32.mxu1 %vm26828_vm1, %v26827_v16 }
 0x5cf   :  { %23814 = vmatprep.subr.mxu1 %v26827_v16 }
 0x5d2   :  { %23712 = vmatmul.mubr.f32.vlgmr.msra.gmra.mrb[2].mxu0 %v1723_v46 }
 0x5d3   :  { %23715 = vmatpush3.msra.mxu0 %v27118_v35  ;;  %23716 = vmatprep.mubr.msk.f32.mxu0 %vm26828_vm1, %v26827_v16 }
 0x5d4   :  { %23719 = vmatprep.subr.mxu0 %v26827_v16 }
 0x5d5   :  { %23812 = vmatmul.mubr.f32.vlgmr.msra.gmra.mrb[6].mxu1 %v27108_v27 }
 0x5d6   :  { %23815 = vmatpush3.xpose.msra.mxu1 %v27111_v28  ;;  %23816 = vmatprep.mubr.msk.f32.mxu1 %vm26828_vm1, %v26827_v16 }
 0x5d7   :  { %23849 = vmatprep.subr.mxu1 %v26827_v16 }
 0x5da   :  { %23717 = vmatmul.mubr.f32.vlgmr.msra.gmra.mrb[2].mxu0 %v1724_v47 }
 0x5db   :  { %23720 = vmatpush3.msra.mxu0 %v1735_v45  ;;  %23721 = vmatprep.mubr.msk.f32.mxu0 %vm26828_vm1, %v26827_v16 }
 0x5dc   :  { %23724 = vmatprep.subr.mxu0 %v26827_v16 }
 0x5dd   :  { %23817 = vmatmul.mubr.f32.vlgmr.msra.gmra.mrb[6].mxu1 %v27108_v27 }
 0x5de   :  { %23851 = vmatprep.mubr.msk.f32.mxu1 %vm26828_vm1, %v26827_v16 }
 0x5e2   :  { %23722 = vmatmul.mubr.f32.vlgmr.msra.gmra.mrb[2].mxu0 %v1722_v44 }
 0x5e3   :  { %23725 = vmatpush3.msra.mxu0 %v27118_v35  ;;  %23726 = vmatprep.mubr.msk.f32.mxu0 %vm26828_vm1, %v26827_v16 }
 0x5e4   :  { %23759 = vmatprep.subr.mxu0 %v26827_v16 }
 0x5ea   :  { %23727 = vmatmul.mubr.f32.vlgmr.msra.gmra.mrb[2].mxu0 %v1722_v44 }
 0x5eb   :  { %23760 = vmatpush3.xpose.msra.mxu0 %v2563_v60  ;;  %23761 = vmatprep.mubr.msk.f32.mxu0 %vm26828_vm1, %v26827_v16 }
 0x5ec   :  { %23764 = vmatprep.subr.mxu0 %v26827_v16 }
 0x5ee   :  { %23762 = vmatmul.mubr.f32.vlgmr.msra.gmra.mrb[4].mxu0 %v2632_v3 }
 0x5ef   :  { %23765 = vmatpush3.xpose.msra.mxu0 %v2643_v4  ;;  %23766 = vmatprep.mubr.msk.f32.mxu0 %vm26828_vm1, %v26827_v16 }
 0x5f0   :  { %23769 = vmatprep.subr.mxu0 %v26827_v16 }
 0x5f6   :  { %23767 = vmatmul.mubr.f32.vlgmr.msra.gmra.mrb[4].mxu0 %v2628_v59 }
 0x5f7   :  { %23770 = vmatpush3.xpose.msra.mxu0 %v2640_v62  ;;  %23771 = vmatprep.mubr.msk.f32.mxu0 %vm26828_vm1, %v26827_v16 }
 0x5f8   :  { %23774 = vmatprep.subr.mxu0 %v26827_v16 }
 0x5fe   :  { %23772 = vmatmul.mubr.f32.vlgmr.msra.gmra.mrb[4].mxu0 %v2629_v61 }
 0x5ff   :  { %23775 = vmatpush3.xpose.msra.mxu0 %v2563_v60  ;;  %23776 = vmatprep.mubr.msk.f32.mxu0 %vm26828_vm1, %v26827_v16 }
 0x600   :  { %23779 = vmatprep.subr.mxu0 %v26827_v16 }
 0x606   :  { %23777 = vmatmul.mubr.f32.vlgmr.msra.gmra.mrb[4].mxu0 %v2630_v63 }
 0x607   :  { %23780 = vmatpush3.xpose.msra.mxu0 %v2641_v0  ;;  %23781 = vmatprep.mubr.msk.f32.mxu0 %vm26828_vm1, %v26827_v16 }
 0x608   :  { %23784 = vmatprep.subr.mxu0 %v26827_v16 }
 0x60e   :  { %23782 = vmatmul.mubr.f32.vlgmr.msra.gmra.mrb[4].mxu0 %v2628_v59 }
 0x60f   :  { %23785 = vmatpush3.xpose.msra.mxu0 %v2563_v60  ;;  %23786 = vmatprep.mubr.msk.f32.mxu0 %vm26828_vm1, %v26827_v16 }
 0x610   :  { %23819 = vmatprep.subr.mxu0 %v26827_v16 }
 0x616   :  { %23787 = vmatmul.mubr.f32.vlgmr.msra.gmra.mrb[4].mxu0 %v2628_v59 }
 0x617   :  { %23821 = vmatprep.mubr.msk.f32.mxu0 %vm26828_vm1, %v26827_v16 }
 0x684   :  { %v27190_v5 = vpop.f32.mrb[4].mxu1 }
 0x685   :  { %v23758_v7 = vpop.f32.mrb[5].mxu1 }
 0x6b0   :  { %v3458_v8 = vpop.f32.mrb[6].mxu1 }
 0x6b1   :  { %v3463_v9 = vmul.f32 0.35355338, %v3458_v8  ;;  %v23818_v11 = vpop.f32.mrb[7].mxu1 }
 0x6b3   :  { %v3467_v12 = vsel %vm722_vm2, %v3463_v9, -inf }
 0x6b4   :  { %3468 = vmax.xlane.f32.xlu0 %v3467_v12 }
 0x6bd   :  { %v27193_v6 = vpop.f32.mrb[2].mxu0 }
 0x6be   :  { %v23728_v13 = vpop.f32.mrb[3].mxu0 }
 0x6ca   :  { %3938 = vrot.lane.b32.xlu0 %v27030_v19, %s26833_s15 }
 0x6ce   :  { %5382 = vrot.lane.b32.xlu0 %v27032_v21, %s26834_s16 }
 0x6d2   :  { %5834 = vrot.lane.b32.xlu0 %v27030_v19, %s26835_s18 }
 0x6d6   :  { %5836 = vrot.lane.b32.xlu0 %v27030_v19, %s26834_s16 }
 0x6e9   :  { %v3004_v14 = vpop.f32.mrb[4].mxu0 }
 0x6ea   :  { %v23788_v15 = vpop.f32.mrb[5].mxu0  ;;  %v3462_v25 = vmul.f32 0.35355338, %v3004_v14 }
 0x6ec   :  { %v3464_v26 = vsel %vm722_vm2, %v3462_v25, -inf }
 0x741   :  { %v3469_v10 = vpop.xlane.xlu0 %3468 }
 0x742   :  { %v3471_v17 = vsub.f32 %v3463_v9, %v3469_v10 }
 0x744   :  { %v3474_v18 = vmul.f32 1.442695, %v3471_v17 }
 0x745   :  { %v3939_v20 = vpop.permute.xlu0 %3938 }
 0x746   :  { %26611 = vpow2.f32 %v3474_v18  ;;  %v27200_v22 = vand.u32 4294901760, %v3939_v20 }
 0x748   :  { %23850 = vmatpush3.msra.mxu1 %v27200_v22  ;;  %v4022_v29 = vsub.f32 %v3939_v20, %v27200_v22 }
 0x749   :  { %23854 = vmatprep.subr.mxu1 %v26827_v16  ;;  %v5383_v41 = vpop.permute.xlu0 %5382 }
 0x74a   :  { %v4023_v33 = vand.u32 4294901760, %v4022_v29  ;;  %v5386_v43 = vsel %vm722_vm2, %v5383_v41, 0  ;;  %v114_v41 = vld [vmem:[#allocation8 + $0x8] sm:$0xff] }
 0x74b   :  { %v5389_v45 = vand.u32 4294901760, %v5386_v43 }
 0x74c   :  { %v4024_v36 = vsub.f32 %v4022_v29, %v4023_v33 }
 0x74d   :  { %v5466_v49 = vsub.f32 %v5386_v43, %v5389_v45  ;;  %v5835_v0 = vpop.permute.xlu0 %5834 }
 0x74e   :  { %v4025_v39 = vand.u32 4294901760, %v4024_v36  ;;  %v5838_v2 = vsel %vm722_vm2, %v5835_v0, 0 }
 0x74f   :  { %v5467_v57 = vand.u32 4294901760, %v5466_v49  ;;  %v5908_v4 = vand.u32 4294901760, %v5838_v2 }
 0x750   :  { %v26612_v23 = vpop.eup %26611 }
 0x751   :  { %v3479_v24 = vsel %vm722_vm2, %v26612_v23, 0.0  ;;  %v5468_v59 = vsub.f32 %v5466_v49, %v5467_v57  ;;  %v5837_v1 = vpop.permute.xlu0 %5836  ;;  %v5909_v8 = vsub.f32 %v5838_v2, %v5908_v4 }
 0x752   :  { %3480 = vadd.xlane.f32.xlu1 %v3479_v24  ;;  %v5840_v3 = vsel %vm722_vm2, %v5837_v1, 0 }
 0x753   :  { %v5469_v62 = vand.u32 4294901760, %v5468_v59  ;;  %v5843_v7 = vand.u32 4294901760, %v5840_v3  ;;  %v5910_v11 = vand.u32 4294901760, %v5909_v8 }
 0x755   :  { %v5920_v9 = vsub.f32 %v5840_v3, %v5843_v7  ;;  %v5911_v13 = vsub.f32 %v5909_v8, %v5910_v11 }
 0x757   :  { %v5921_v12 = vand.u32 4294901760, %v5920_v9  ;;  %v5912_v15 = vand.u32 4294901760, %v5911_v13  ;;  %v4886_v13 = vsel %vm722_vm2, %v27193_v6, 0 }
 0x759   :  { %v5922_v14 = vsub.f32 %v5920_v9, %v5921_v12 }
 0x75b   :  { %v5923_v10 = vand.u32 4294901760, %v5922_v14 }
 0x763   :  { %5380 = vrot.lane.b32.xlu1 %v27032_v21, %s26835_s18 }
 0x787   :  { %3465 = vmax.xlane.f32.xlu1 %v3464_v26 }
 0x798   :  { %3486 = vrot.lane.b32.xlu1 %v27032_v21, %s26833_s15 }
 0x79c   :  { %6312 = vrot.lane.b32.xlu1 %v27032_v21, %s26836_s19 }
 0x7a0   :  { %7713 = vrot.lane.b32.xlu1 %v27032_v21, %s26837_s20 }
 0x7a4   :  { %8167 = vrot.lane.b32.xlu1 %v27030_v19, %s26837_s20 }
 0x7a8   :  { %7715 = vrot.lane.b32.xlu1 %v27032_v21, %s26838_s23 }
 0x7ac   :  { %8169 = vrot.lane.b32.xlu1 %v27030_v19, %s26838_s23 }
 0x7df   :  { %v3481_v27 = vpop.xlane.xlu1 %3480 }
 0x7e0   :  { %26613 = vrcp.f32 %v3481_v27 }
 0x7e3   :  { %v5381_v40 = vpop.permute.xlu1 %5380 }
 0x7e4   :  { %v5384_v42 = vsel %vm722_vm2, %v5381_v40, 0 }
 0x7e5   :  { %v5454_v44 = vand.u32 4294901760, %v5384_v42 }
 0x7e7   :  { %v5455_v48 = vsub.f32 %v5384_v42, %v5454_v44  ;;  %v27310_v42 = vand.u32 4294901760, %v114_v41 }
 0x7e9   :  { %v5456_v55 = vand.u32 4294901760, %v5455_v48 }
 0x7ea   :  { %v26614_v28 = vpop.eup %26613 }
 0x7eb   :  { %v3485_v30 = vmul.f32 %v26614_v28, %v26612_v23  ;;  %v5457_v58 = vsub.f32 %v5455_v48, %v5456_v55 }
 0x7ed   :  { %v3942_v31 = vsel %vm722_vm2, %v3485_v30, 0  ;;  %v5458_v60 = vand.u32 4294901760, %v5457_v58 }
 0x7ee   :  { %v4010_v32 = vand.u32 4294901760, %v3942_v31 }
 0x7f0   :  { %v4011_v34 = vsub.f32 %v3942_v31, %v4010_v32 }
 0x7f2   :  { %v4012_v35 = vand.u32 4294901760, %v4011_v34 }
 0x7f4   :  { %v4013_v37 = vsub.f32 %v4011_v34, %v4012_v35 }
 0x7f6   :  { %v4014_v38 = vand.u32 4294901760, %v4013_v37 }
 0x7f8   :  { %23852 = vmatmul.mubr.f32.vlgmr.msra.gmra.mrb[8].mxu1 %v4014_v38 }
 0x7f9   :  { %23855 = vmatpush3.msra.mxu1 %v4025_v39  ;;  %23856 = vmatprep.mubr.msk.f32.mxu1 %vm26828_vm1, %v26827_v16 }
 0x7fa   :  { %23859 = vmatprep.subr.mxu1 %v26827_v16 }
 0x800   :  { %23857 = vmatmul.mubr.f32.vlgmr.msra.gmra.mrb[8].mxu1 %v4010_v32 }
 0x801   :  { %23860 = vmatpush3.msra.mxu1 %v4022_v29  ;;  %23861 = vmatprep.mubr.msk.f32.mxu1 %vm26828_vm1, %v26827_v16 }
 0x802   :  { %23864 = vmatprep.subr.mxu1 %v26827_v16 }
 0x808   :  { %23862 = vmatmul.mubr.f32.vlgmr.msra.gmra.mrb[8].mxu1 %v4011_v34 }
 0x809   :  { %23865 = vmatpush3.msra.mxu1 %v27200_v22  ;;  %23866 = vmatprep.mubr.msk.f32.mxu1 %vm26828_vm1, %v26827_v16 }
 0x80a   :  { %23869 = vmatprep.subr.mxu1 %v26827_v16 }
 0x810   :  { %23867 = vmatmul.mubr.f32.vlgmr.msra.gmra.mrb[8].mxu1 %v4012_v35 }
 0x811   :  { %23870 = vmatpush3.msra.mxu1 %v4023_v33  ;;  %23871 = vmatprep.mubr.msk.f32.mxu1 %vm26828_vm1, %v26827_v16 }
 0x812   :  { %23874 = vmatprep.subr.mxu1 %v26827_v16 }
 0x814   :  { %v3466_v46 = vpop.xlane.xlu1 %3465 }
 0x815   :  { %v3470_v47 = vsub.f32 %v3462_v25, %v3466_v46 }
 0x817   :  { %v3472_v50 = vmul.f32 1.442695, %v3470_v47 }
 0x818   :  { %v27234_v51 = vpop.permute.xlu1 %3486  ;;  %23872 = vmatmul.mubr.f32.vlgmr.msra.gmra.mrb[8].mxu1 %v4010_v32 }
 0x819   :  { %26615 = vpow2.f32 %v3472_v50  ;;  %v27237_v53 = vand.u32 4294901760, %v27234_v51  ;;  %23875 = vmatpush3.msra.mxu1 %v27200_v22  ;;  %23876 = vmatprep.mubr.msk.f32.mxu1 %vm26828_vm1, %v26827_v16 }
 0x81a   :  { %23939 = vmatprep.subr.mxu1 %v26827_v16 }
 0x81b   :  { %23820 = vmatpush3.msra.mxu0 %v27237_v53  ;;  %v3570_v20 = vsub.f32 %v27234_v51, %v27237_v53 }
 0x81c   :  { %23824 = vmatprep.subr.mxu0 %v26827_v16 }
 0x81d   :  { %v3571_v25 = vand.u32 4294901760, %v3570_v20 }
 0x81f   :  { %v3572_v28 = vsub.f32 %v3570_v20, %v3571_v25 }
 0x820   :  { %23877 = vmatmul.mubr.f32.vlgmr.msra.gmra.mrb[8].mxu1 %v4010_v32 }
 0x821   :  { %23940 = vmatpush3.xpose.msra.mxu1 %v5389_v45  ;;  %23941 = vmatprep.mubr.msk.f32.mxu1 %vm26828_vm1, %v26827_v16  ;;  %v3573_v31 = vand.u32 4294901760, %v3572_v28 }
 0x822   :  { %23944 = vmatprep.subr.mxu1 %v26827_v16 }
 0x823   :  { %v27248_v61 = vpop.eup %26615 }
 0x824   :  { %23942 = vmatmul.mubr.f32.vlgmr.msra.gmra.mrb[10].mxu1 %v5458_v60  ;;  %v3476_v63 = vsel %vm722_vm2, %v27248_v61, 0.0 }
 0x825   :  { %23945 = vmatpush3.xpose.msra.mxu1 %v5469_v62  ;;  %3477 = vadd.xlane.f32.xlu0 %v3476_v63 }
 0x826   :  { %23946 = vmatprep.mubr.msk.f32.mxu1 %vm26828_vm1, %v26827_v16  ;;  %23949 = vmatprep.subr.mxu1 %v26827_v16 }
 0x82c   :  { %23947 = vmatmul.mubr.f32.vlgmr.msra.gmra.mrb[10].mxu1 %v5454_v44 }
 0x82d   :  { %23950 = vmatpush3.xpose.msra.mxu1 %v5466_v49  ;;  %23951 = vmatprep.mubr.msk.f32.mxu1 %vm26828_vm1, %v26827_v16 }
 0x82e   :  { %23954 = vmatprep.subr.mxu1 %v26827_v16 }
 0x834   :  { %23952 = vmatmul.mubr.f32.vlgmr.msra.gmra.mrb[10].mxu1 %v5455_v48 }
 0x835   :  { %23955 = vmatpush3.xpose.msra.mxu1 %v5389_v45  ;;  %23956 = vmatprep.mubr.msk.f32.mxu1 %vm26828_vm1, %v26827_v16 }
 0x836   :  { %23959 = vmatprep.subr.mxu1 %v26827_v16 }
 0x83c   :  { %23957 = vmatmul.mubr.f32.vlgmr.msra.gmra.mrb[10].mxu1 %v5456_v55 }
 0x83d   :  { %23960 = vmatpush3.xpose.msra.mxu1 %v5467_v57  ;;  %23961 = vmatprep.mubr.msk.f32.mxu1 %vm26828_vm1, %v26827_v16 }
 0x83e   :  { %23964 = vmatprep.subr.mxu1 %v26827_v16 }
 0x844   :  { %23962 = vmatmul.mubr.f32.vlgmr.msra.gmra.mrb[10].mxu1 %v5454_v44 }
 0x845   :  { %23965 = vmatpush3.xpose.msra.mxu1 %v5389_v45  ;;  %23966 = vmatprep.mubr.msk.f32.mxu1 %vm26828_vm1, %v26827_v16 }
 0x846   :  { %23969 = vmatprep.subr.mxu1 %v26827_v16 }
 0x84c   :  { %23967 = vmatmul.mubr.f32.vlgmr.msra.gmra.mrb[10].mxu1 %v5454_v44  ;;  %v4484_v44 = vsub.f32 %v114_v41, %v27310_v42 }
 0x84d   :  { %23970 = vmatpush3.xpose.msra.mxu1 %v5843_v7  ;;  %23971 = vmatprep.mubr.msk.f32.mxu1 %vm26828_vm1, %v26827_v16 }
 0x84e   :  { %23974 = vmatprep.subr.mxu1 %v26827_v16  ;;  %v4485_v45 = vand.u32 4294901760, %v4484_v44 }
 0x850   :  { %23972 = vmatmul.mubr.f32.vlgmr.msra.gmra.mrb[12].mxu1 %v5912_v15  ;;  %v4486_v46 = vsub.f32 %v4484_v44, %v4485_v45  ;;  %v4957_v15 = vand.u32 4294901760, %v4886_v13 }
 0x851   :  { %23975 = vmatpush3.xpose.msra.mxu1 %v5923_v10  ;;  %23976 = vmatprep.mubr.msk.f32.mxu1 %vm26828_vm1, %v26827_v16 }
 0x852   :  { %23979 = vmatprep.subr.mxu1 %v26827_v16  ;;  %v4487_v47 = vand.u32 4294901760, %v4486_v46 }
 0x858   :  { %23977 = vmatmul.mubr.f32.vlgmr.msra.gmra.mrb[12].mxu1 %v5908_v4 }
 0x859   :  { %23980 = vmatpush3.xpose.msra.mxu1 %v5920_v9  ;;  %23981 = vmatprep.mubr.msk.f32.mxu1 %vm26828_vm1, %v26827_v16 }
 0x85a   :  { %23984 = vmatprep.subr.mxu1 %v26827_v16 }
 0x860   :  { %23982 = vmatmul.mubr.f32.vlgmr.msra.gmra.mrb[12].mxu1 %v5909_v8 }
 0x861   :  { %23985 = vmatpush3.xpose.msra.mxu1 %v5843_v7  ;;  %23986 = vmatprep.mubr.msk.f32.mxu1 %vm26828_vm1, %v26827_v16 }
 0x862   :  { %23989 = vmatprep.subr.mxu1 %v26827_v16 }
 0x868   :  { %23987 = vmatmul.mubr.f32.vlgmr.msra.gmra.mrb[12].mxu1 %v5910_v11 }
 0x869   :  { %23990 = vmatpush3.xpose.msra.mxu1 %v5921_v12  ;;  %23991 = vmatprep.mubr.msk.f32.mxu1 %vm26828_vm1, %v26827_v16  ;;  %v113_v12 = vld [vmem:[#allocation8] sm:$0xff] }
 0x86a   :  { %23994 = vmatprep.subr.mxu1 %v26827_v16  ;;  %v4892_v14 = vand.u32 4294901760, %v113_v12 }
 0x870   :  { %23992 = vmatmul.mubr.f32.vlgmr.msra.gmra.mrb[12].mxu1 %v5908_v4 }
 0x871   :  { %23995 = vmatpush3.xpose.msra.mxu1 %v5843_v7  ;;  %23996 = vmatprep.mubr.msk.f32.mxu1 %vm26828_vm1, %v26827_v16 }
 0x872   :  { %24029 = vmatprep.subr.mxu1 %v26827_v16 }
 0x878   :  { %23997 = vmatmul.mubr.f32.vlgmr.msra.gmra.mrb[12].mxu1 %v5908_v4 }
 0x879   :  { %24031 = vmatprep.mubr.msk.f32.mxu1 %vm26828_vm1, %v26827_v16 }
 0x8b2   :  { %v3478_v17 = vpop.xlane.xlu0 %3477 }
 0x8b3   :  { %26617 = vrcp.f32 %v3478_v17 }
 0x8bd   :  { %v26618_v18 = vpop.eup %26617 }
 0x8be   :  { %v3484_v22 = vmul.f32 %v26618_v18, %v27248_v61  ;;  %v4979_v18 = vsub.f32 %v113_v12, %v4892_v14 }
 0x8c0   :  { %v3490_v23 = vsel %vm722_vm2, %v3484_v22, 0  ;;  %v4958_v22 = vsub.f32 %v4886_v13, %v4957_v15  ;;  %v4980_v6 = vand.u32 4294901760, %v4979_v18 }
 0x8c1   :  { %v3558_v24 = vand.u32 4294901760, %v3490_v23 }
 0x8c3   :  { %v3559_v26 = vsub.f32 %v3490_v23, %v3558_v24 }
 0x8c5   :  { %v3560_v27 = vand.u32 4294901760, %v3559_v26 }
 0x8c7   :  { %v3561_v29 = vsub.f32 %v3559_v26, %v3560_v27 }
 0x8c9   :  { %v3562_v30 = vand.u32 4294901760, %v3561_v29 }
 0x8cb   :  { %23822 = vmatmul.mubr.f32.vlgmr.msra.gmra.mrb[6].mxu0 %v3562_v30 }
 0x8cc   :  { %23825 = vmatpush3.msra.mxu0 %v3573_v31  ;;  %23826 = vmatprep.mubr.msk.f32.mxu0 %vm26828_vm1, %v26827_v16 }
 0x8cd   :  { %23829 = vmatprep.subr.mxu0 %v26827_v16 }
 0x8d3   :  { %23827 = vmatmul.mubr.f32.vlgmr.msra.gmra.mrb[6].mxu0 %v3558_v24 }
 0x8d4   :  { %23830 = vmatpush3.msra.mxu0 %v3570_v20  ;;  %23831 = vmatprep.mubr.msk.f32.mxu0 %vm26828_vm1, %v26827_v16  ;;  %v4889_v20 = vsel %vm722_vm2, %v27190_v5, 0 }
 0x8d5   :  { %23834 = vmatprep.subr.mxu0 %v26827_v16  ;;  %v4967_v23 = vand.u32 4294901760, %v4889_v20 }
 0x8db   :  { %23832 = vmatmul.mubr.f32.vlgmr.msra.gmra.mrb[6].mxu0 %v3559_v26  ;;  %v4981_v26 = vsub.f32 %v4979_v18, %v4980_v6 }
 0x8dc   :  { %23835 = vmatpush3.msra.mxu0 %v27237_v53  ;;  %23836 = vmatprep.mubr.msk.f32.mxu0 %vm26828_vm1, %v26827_v16 }
 0x8dd   :  { %23839 = vmatprep.subr.mxu0 %v26827_v16  ;;  %v4982_v29 = vand.u32 4294901760, %v4981_v26 }
 0x8e3   :  { %23837 = vmatmul.mubr.f32.vlgmr.msra.gmra.mrb[6].mxu0 %v3560_v27 }
 0x8e4   :  { %23840 = vmatpush3.msra.mxu0 %v3571_v25  ;;  %23841 = vmatprep.mubr.msk.f32.mxu0 %vm26828_vm1, %v26827_v16  ;;  %v4968_v25 = vsub.f32 %v4889_v20, %v4967_v23  ;;  %v115_v20 = vld [vmem:[#allocation8 + $0x10] sm:$0xff] }
 0x8e5   :  { %23844 = vmatprep.subr.mxu0 %v26827_v16 }
 0x8e6   :  { %v4969_v28 = vand.u32 4294901760, %v4968_v25 }
 0x8e8   :  { %v4970_v31 = vsub.f32 %v4968_v25, %v4969_v28 }
 0x8ea   :  { %v4971_v5 = vand.u32 4294901760, %v4970_v31 }
 0x8eb   :  { %23842 = vmatmul.mubr.f32.vlgmr.msra.gmra.mrb[6].mxu0 %v3558_v24 }
 0x8ec   :  { %23845 = vmatpush3.msra.mxu0 %v27237_v53  ;;  %23846 = vmatprep.mubr.msk.f32.mxu0 %vm26828_vm1, %v26827_v16 }
 0x8ed   :  { %23879 = vmatprep.subr.mxu0 %v27310_v42 }
 0x8f3   :  { %23847 = vmatmul.mubr.f32.vlgmr.msra.gmra.mrb[6].mxu0 %v3558_v24  ;;  %v4386_v32 = vpop.f32.mrb[8].mxu1  ;;  %v4959_v24 = vand.u32 4294901760, %v4958_v22 }
 0x8f4   :  { %v23878_v33 = vpop.f32.mrb[9].mxu1  ;;  %23880 = vmatpush3.msra.mxu0 %v27310_v42  ;;  %v4394_v51 = vsel %vm722_vm2, %v4386_v32, 0  ;;  %v6313_v32 = vpop.permute.xlu1 %6312 }
 0x8f5   :  { %23884 = vmatprep.subr.mxu0 %v4487_v47  ;;  %v4472_v57 = vand.u32 4294901760, %v4394_v51  ;;  %v4960_v27 = vsub.f32 %v4958_v22, %v4959_v24  ;;  %v6319_v33 = vand.u32 4294901760, %v6313_v32 }
 0x8f7   :  { %v4473_v58 = vsub.f32 %v4394_v51, %v4472_v57  ;;  %v4961_v30 = vand.u32 4294901760, %v4960_v27 }
 0x8f9   :  { %v4474_v63 = vand.u32 4294901760, %v4473_v58 }
 0x8fb   :  { %v4475_v2 = vsub.f32 %v4473_v58, %v4474_v63 }
 0x8fd   :  { %v4476_v7 = vand.u32 4294901760, %v4475_v2 }
 0x91f   :  { %v5830_v34 = vpop.f32.mrb[10].mxu1 }
 0x920   :  { %v6288_v35 = vmul.f32 0.35355338, %v5830_v34  ;;  %v23968_v36 = vpop.f32.mrb[11].mxu1 }
 0x921   :  { %v6396_v36 = vsub.f32 %v6313_v32, %v6319_v33 }
 0x922   :  { %v6290_v37 = vsel %vm722_vm2, %v6288_v35, -inf }
 0x923   :  { %6291 = vmax.xlane.f32.xlu0 %v6290_v37 }
 0x94b   :  { %v6284_v38 = vpop.f32.mrb[12].mxu1 }
 0x94c   :  { %v6289_v39 = vmul.f32 0.35355338, %v6284_v38  ;;  %v23998_v40 = vpop.f32.mrb[13].mxu1 }
 0x94d   :  { %v6397_v40 = vand.u32 4294901760, %v6396_v36 }
 0x94e   :  { %v6293_v43 = vsel %vm722_vm2, %v6289_v39, -inf }
 0x94f   :  { %6294 = vmax.xlane.f32.xlu0 %v6293_v43  ;;  %v6398_v43 = vsub.f32 %v6396_v36, %v6397_v40 }
 0x951   :  { %v6399_v46 = vand.u32 4294901760, %v6398_v43 }
 0x9b0   :  { %v6292_v48 = vpop.xlane.xlu0 %6291 }
 0x9b1   :  { %v6296_v49 = vsub.f32 %v6288_v35, %v6292_v48 }
 0x9b3   :  { %v6298_v50 = vmul.f32 1.442695, %v6296_v49 }
 0x9b5   :  { %26619 = vpow2.f32 %v6298_v50 }
 0x9bf   :  { %v27317_v53 = vpop.eup %26619 }
 0x9c0   :  { %v6302_v55 = vsel %vm722_vm2, %v27317_v53, 0.0 }
 0x9c1   :  { %6303 = vadd.xlane.f32.xlu0 %v6302_v55 }
 0x9c6   :  { %v3934_v59 = vpop.f32.mrb[6].mxu0 }
 0x9c7   :  { %v4391_v60 = vsel %vm722_vm2, %v3934_v59, 0  ;;  %v23848_v61 = vpop.f32.mrb[7].mxu0 }
 0x9c8   :  { %v4462_v62 = vand.u32 4294901760, %v4391_v60 }
 0x9ca   :  { %v4463_v0 = vsub.f32 %v4391_v60, %v4462_v62 }
 0x9cc   :  { %v4464_v1 = vand.u32 4294901760, %v4463_v0 }
 0x9ce   :  { %v4465_v3 = vsub.f32 %v4463_v0, %v4464_v1 }
 0x9d0   :  { %v4466_v4 = vand.u32 4294901760, %v4465_v3 }
 0x9d2   :  { %23881 = vmatprep.mubr.f32.mxu0 %v4466_v4 }
 0x9d3   :  { %23882 = vmatmul.mubr.f32.vlgmr.msra.gmra.mrb[8].mxu0 %v4476_v7 }
 0x9d4   :  { %23886 = vmatprep.mubr.f32.mxu0 %v4462_v62  ;;  %23885 = vmatpush3.msra.mxu0 %v4487_v47 }
 0x9d5   :  { %23889 = vmatprep.subr.mxu0 %v4484_v44 }
 0x9db   :  { %23887 = vmatmul.mubr.f32.vlgmr.msra.gmra.mrb[8].mxu0 %v4472_v57 }
 0x9dc   :  { %23891 = vmatprep.mubr.f32.mxu0 %v4463_v0  ;;  %v6295_v8 = vpop.xlane.xlu0 %6294  ;;  %23890 = vmatpush3.msra.mxu0 %v4484_v44 }
 0x9dd   :  { %v6297_v9 = vsub.f32 %v6289_v39, %v6295_v8  ;;  %23894 = vmatprep.subr.mxu0 %v27310_v42 }
 0x9df   :  { %v6300_v11 = vmul.f32 1.442695, %v6297_v9 }
 0x9e1   :  { %26621 = vpow2.f32 %v6300_v11 }
 0x9e3   :  { %23892 = vmatmul.mubr.f32.vlgmr.msra.gmra.mrb[8].mxu0 %v4473_v58 }
 0x9e4   :  { %23896 = vmatprep.mubr.f32.mxu0 %v4464_v1  ;;  %23895 = vmatpush3.msra.mxu0 %v27310_v42  ;;  %v7714_v1 = vpop.permute.xlu1 %7713 }
 0x9e5   :  { %23899 = vmatprep.subr.mxu0 %v4485_v45  ;;  %v7717_v4 = vsel %vm722_vm2, %v7714_v1, 0 }
 0x9e6   :  { %v7787_v8 = vand.u32 4294901760, %v7717_v4 }
 0x9e8   :  { %v27365_v2 = vpop.permute.xlu1 %8167  ;;  %v7788_v11 = vsub.f32 %v7717_v4, %v7787_v8 }
 0x9ea   :  { %v7789_v13 = vand.u32 4294901760, %v7788_v11 }
 0x9eb   :  { %v27326_v10 = vpop.eup %26621  ;;  %23897 = vmatmul.mubr.f32.vlgmr.msra.gmra.mrb[8].mxu0 %v4474_v63 }
 0x9ec   :  { %23901 = vmatprep.mubr.f32.mxu0 %v4462_v62  ;;  %v6305_v17 = vsel %vm722_vm2, %v27326_v10, 0.0  ;;  %23900 = vmatpush3.msra.mxu0 %v4485_v45  ;;  %v7716_v3 = vpop.permute.xlu1 %7715 }
 0x9ed   :  { %6306 = vadd.xlane.f32.xlu0 %v6305_v17  ;;  %23904 = vmatprep.subr.mxu0 %v27310_v42  ;;  %v7719_v7 = vsel %vm722_vm2, %v7716_v3, 0 }
 0x9ee   :  { %v7722_v9 = vand.u32 4294901760, %v7719_v7 }
 0x9f0   :  { %v7799_v12 = vsub.f32 %v7719_v7, %v7722_v9 }
 0x9f3   :  { %23902 = vmatmul.mubr.f32.vlgmr.msra.gmra.mrb[8].mxu0 %v4472_v57 }
 0x9f4   :  { %23906 = vmatprep.mubr.f32.mxu0 %v4462_v62  ;;  %23905 = vmatpush3.msra.mxu0 %v27310_v42 }
 0x9f5   :  { %23909 = vmatprep.subr.mxu0 %v4892_v14 }
 0x9fb   :  { %23907 = vmatmul.mubr.f32.vlgmr.msra.gmra.mrb[8].mxu0 %v4472_v57 }
 0x9fc   :  { %23911 = vmatprep.mubr.f32.mxu0 %v4961_v30  ;;  %23910 = vmatpush3.msra.mxu0 %v4892_v14 }
 0x9fd   :  { %23914 = vmatprep.subr.mxu0 %v4982_v29 }
 0xa03   :  { %23912 = vmatmul.mubr.f32.vlgmr.msra.gmra.mrb[8].mxu0 %v4971_v5  ;;  %6764 = vrot.lane.b32.xlu0 %v27030_v19, %s26836_s19 }
 0xa04   :  { %23916 = vmatprep.mubr.f32.mxu0 %v4957_v15  ;;  %23915 = vmatpush3.msra.mxu0 %v4982_v29 }
 0xa05   :  { %23919 = vmatprep.subr.mxu0 %v4979_v18 }
 0xa0b   :  { %23917 = vmatmul.mubr.f32.vlgmr.msra.gmra.mrb[8].mxu0 %v4967_v23 }
 0xa0c   :  { %23921 = vmatprep.mubr.f32.mxu0 %v4958_v22  ;;  %23920 = vmatpush3.msra.mxu0 %v4979_v18  ;;  %v7223_v22 = vand.u32 4294901760, %v115_v20 }
 0xa0d   :  { %23924 = vmatprep.subr.mxu0 %v4892_v14 }
 0xa13   :  { %23922 = vmatmul.mubr.f32.vlgmr.msra.gmra.mrb[8].mxu0 %v4968_v25 }
 0xa14   :  { %23926 = vmatprep.mubr.f32.mxu0 %v4959_v24  ;;  %23925 = vmatpush3.msra.mxu0 %v4892_v14 }
 0xa15   :  { %23929 = vmatprep.subr.mxu0 %v4980_v6 }
 0xa1b   :  { %23927 = vmatmul.mubr.f32.vlgmr.msra.gmra.mrb[8].mxu0 %v4969_v28 }
 0xa1c   :  { %23931 = vmatprep.mubr.f32.mxu0 %v4957_v15  ;;  %23930 = vmatpush3.msra.mxu0 %v4980_v6 }
 0xa1d   :  { %23934 = vmatprep.subr.mxu0 %v4892_v14 }
 0xa23   :  { %23932 = vmatmul.mubr.f32.vlgmr.msra.gmra.mrb[8].mxu0 %v4967_v23 }
 0xa24   :  { %23936 = vmatprep.mubr.f32.mxu0 %v4957_v15  ;;  %23935 = vmatpush3.msra.mxu0 %v4892_v14  ;;  %v7800_v14 = vand.u32 4294901760, %v7799_v12  ;;  %v7790_v15 = vsub.f32 %v7788_v11, %v7789_v13 }
 0xa25   :  { %23999 = vmatprep.subr.mxu0 %v26827_v16 }
 0xa26   :  { %v7791_v17 = vand.u32 4294901760, %v7790_v15 }
 0xa2b   :  { %23937 = vmatmul.mubr.f32.vlgmr.msra.gmra.mrb[8].mxu0 %v4967_v23  ;;  %v7310_v23 = vsub.f32 %v115_v20, %v7223_v22 }
 0xa2c   :  { %24000 = vmatpush3.msra.mxu0 %v6319_v33  ;;  %24001 = vmatprep.mubr.msk.f32.mxu0 %vm26828_vm1, %v26827_v16 }
 0xa2d   :  { %24004 = vmatprep.subr.mxu0 %v26827_v16  ;;  %v7311_v6 = vand.u32 4294901760, %v7310_v23 }
 0xa2f   :  { %v7312_v24 = vsub.f32 %v7310_v23, %v7311_v6 }
 0xa31   :  { %v7313_v25 = vand.u32 4294901760, %v7312_v24 }
 0xa4e   :  { %v6304_v34 = vpop.xlane.xlu0 %6303 }
 0xa4f   :  { %26623 = vrcp.f32 %v6304_v34 }
 0xa59   :  { %v26624_v35 = vpop.eup %26623 }
 0xa5a   :  { %v6310_v37 = vmul.f32 %v26624_v35, %v27317_v53 }
 0xa5c   :  { %v6316_v38 = vsel %vm722_vm2, %v6310_v37, 0 }
 0xa5d   :  { %v6384_v39 = vand.u32 4294901760, %v6316_v38 }
 0xa5f   :  { %v6385_v41 = vsub.f32 %v6316_v38, %v6384_v39 }
 0xa61   :  { %v6386_v42 = vand.u32 4294901760, %v6385_v41 }
 0xa63   :  { %v6387_v44 = vsub.f32 %v6385_v41, %v6386_v42 }
 0xa65   :  { %v6388_v45 = vand.u32 4294901760, %v6387_v44 }
 0xa67   :  { %24002 = vmatmul.mubr.f32.vlgmr.msra.gmra.mrb[10].mxu0 %v6388_v45 }
 0xa68   :  { %24005 = vmatpush3.msra.mxu0 %v6399_v46  ;;  %24006 = vmatprep.mubr.msk.f32.mxu0 %vm26828_vm1, %v26827_v16 }
 0xa69   :  { %24009 = vmatprep.subr.mxu0 %v26827_v16 }
 0xa6f   :  { %24007 = vmatmul.mubr.f32.vlgmr.msra.gmra.mrb[10].mxu0 %v6384_v39 }
 0xa70   :  { %24010 = vmatpush3.msra.mxu0 %v6396_v36  ;;  %24011 = vmatprep.mubr.msk.f32.mxu0 %vm26828_vm1, %v26827_v16 }
 0xa71   :  { %24014 = vmatprep.subr.mxu0 %v26827_v16 }
 0xa77   :  { %24012 = vmatmul.mubr.f32.vlgmr.msra.gmra.mrb[10].mxu0 %v6385_v41  ;;  %v8170_v41 = vpop.permute.xlu1 %8169 }
 0xa78   :  { %24015 = vmatpush3.msra.mxu0 %v6319_v33  ;;  %24016 = vmatprep.mubr.msk.f32.mxu0 %vm26828_vm1, %v26827_v16  ;;  %v8173_v43 = vsel %vm722_vm2, %v8170_v41, 0 }
 0xa79   :  { %24019 = vmatprep.subr.mxu0 %v26827_v16  ;;  %v8176_v45 = vand.u32 4294901760, %v8173_v43 }
 0xa7a   :  { %v6307_v47 = vpop.xlane.xlu0 %6306 }
 0xa7b   :  { %26625 = vrcp.f32 %v6307_v47  ;;  %v8253_v47 = vsub.f32 %v8173_v43, %v8176_v45 }
 0xa7e   :  { %v6765_v48 = vpop.permute.xlu0 %6764 }
 0xa7f   :  { %v6771_v49 = vand.u32 4294901760, %v6765_v48  ;;  %24017 = vmatmul.mubr.f32.vlgmr.msra.gmra.mrb[10].mxu0 %v6386_v42  ;;  %v8171_v42 = vsel %vm722_vm2, %v27365_v2, 0 }
 0xa80   :  { %24020 = vmatpush3.msra.mxu0 %v6397_v40  ;;  %24021 = vmatprep.mubr.msk.f32.mxu0 %vm26828_vm1, %v26827_v16  ;;  %v8241_v44 = vand.u32 4294901760, %v8171_v42 }
 0xa81   :  { %24030 = vmatpush3.msra.mxu1 %v6771_v49  ;;  %24024 = vmatprep.subr.mxu0 %v26827_v16  ;;  %v6848_v53 = vsub.f32 %v6765_v48, %v6771_v49 }
 0xa82   :  { %24034 = vmatprep.subr.mxu1 %v26827_v16  ;;  %v8242_v46 = vsub.f32 %v8171_v42, %v8241_v44 }
 0xa83   :  { %v6849_v58 = vand.u32 4294901760, %v6848_v53 }
 0xa85   :  { %v26626_v50 = vpop.eup %26625  ;;  %v6850_v61 = vsub.f32 %v6848_v53, %v6849_v58 }
 0xa86   :  { %v6311_v51 = vmul.f32 %v26626_v50, %v27326_v10  ;;  %v7801_v10 = vsub.f32 %v7799_v12, %v7800_v14 }
 0xa87   :  { %24022 = vmatmul.mubr.f32.vlgmr.msra.gmra.mrb[10].mxu0 %v6384_v39  ;;  %v6851_v0 = vand.u32 4294901760, %v6850_v61 }
 0xa88   :  { %24025 = vmatpush3.msra.mxu0 %v6319_v33  ;;  %24026 = vmatprep.mubr.msk.f32.mxu0 %vm26828_vm1, %v26827_v16  ;;  %v6768_v55 = vsel %vm722_vm2, %v6311_v51, 0  ;;  %v7802_v18 = vand.u32 4294901760, %v7801_v10  ;;  %v8243_v51 = vand.u32 4294901760, %v8242_v46 }
 0xa89   :  { %v6836_v57 = vand.u32 4294901760, %v6768_v55  ;;  %24059 = vmatprep.subr.mxu0 %v7223_v22 }
 0xa8b   :  { %v6837_v59 = vsub.f32 %v6768_v55, %v6836_v57 }
 0xa8d   :  { %v6838_v60 = vand.u32 4294901760, %v6837_v59 }
 0xa8f   :  { %24027 = vmatmul.mubr.f32.vlgmr.msra.gmra.mrb[10].mxu0 %v6384_v39  ;;  %v6839_v62 = vsub.f32 %v6837_v59, %v6838_v60 }
 0xa90   :  { %24060 = vmatpush3.msra.mxu0 %v7223_v22 }
 0xa91   :  { %v6840_v63 = vand.u32 4294901760, %v6839_v62  ;;  %24064 = vmatprep.subr.mxu0 %v7313_v25 }
 0xa93   :  { %24032 = vmatmul.mubr.f32.vlgmr.msra.gmra.mrb[14].mxu1 %v6840_v63 }
 0xa94   :  { %24035 = vmatpush3.msra.mxu1 %v6851_v0  ;;  %24036 = vmatprep.mubr.msk.f32.mxu1 %vm26828_vm1, %v26827_v16 }
 0xa95   :  { %24039 = vmatprep.subr.mxu1 %v26827_v16 }
 0xa9b   :  { %24037 = vmatmul.mubr.f32.vlgmr.msra.gmra.mrb[14].mxu1 %v6836_v57 }
 0xa9c   :  { %24040 = vmatpush3.msra.mxu1 %v6848_v53  ;;  %24041 = vmatprep.mubr.msk.f32.mxu1 %vm26828_vm1, %v26827_v16  ;;  %v8254_v53 = vand.u32 4294901760, %v8253_v47 }
 0xa9d   :  { %24044 = vmatprep.subr.mxu1 %v26827_v16 }
 0xaa3   :  { %24042 = vmatmul.mubr.f32.vlgmr.msra.gmra.mrb[14].mxu1 %v6837_v59 }
 0xaa4   :  { %24045 = vmatpush3.msra.mxu1 %v6771_v49  ;;  %24046 = vmatprep.mubr.msk.f32.mxu1 %vm26828_vm1, %v26827_v16 }
 0xaa5   :  { %24049 = vmatprep.subr.mxu1 %v26827_v16 }
 0xaab   :  { %24047 = vmatmul.mubr.f32.vlgmr.msra.gmra.mrb[14].mxu1 %v6838_v60 }
 0xaac   :  { %24050 = vmatpush3.msra.mxu1 %v6849_v58  ;;  %24051 = vmatprep.mubr.msk.f32.mxu1 %vm26828_vm1, %v26827_v16  ;;  %v8255_v58 = vsub.f32 %v8253_v47, %v8254_v53 }
 0xaad   :  { %24054 = vmatprep.subr.mxu1 %v26827_v16 }
 0xaae   :  { %v8256_v60 = vand.u32 4294901760, %v8255_v58 }
 0xab3   :  { %24052 = vmatmul.mubr.f32.vlgmr.msra.gmra.mrb[14].mxu1 %v6836_v57 }
 0xab4   :  { %24055 = vmatpush3.msra.mxu1 %v6771_v49  ;;  %24056 = vmatprep.mubr.msk.f32.mxu1 %vm26828_vm1, %v26827_v16 }
 0xab5   :  { %24089 = vmatprep.subr.mxu1 %v26827_v16 }
 0xabb   :  { %24057 = vmatmul.mubr.f32.vlgmr.msra.gmra.mrb[14].mxu1 %v6836_v57  ;;  %v8244_v57 = vsub.f32 %v8242_v46, %v8243_v51 }
 0xabc   :  { %24090 = vmatpush3.xpose.msra.mxu1 %v7722_v9  ;;  %24091 = vmatprep.mubr.msk.f32.mxu1 %vm26828_vm1, %v26827_v16 }
 0xabd   :  { %24094 = vmatprep.subr.mxu1 %v26827_v16  ;;  %v8245_v59 = vand.u32 4294901760, %v8244_v57 }
 0xabf   :  { %24092 = vmatmul.mubr.f32.vlgmr.msra.gmra.mrb[16].mxu1 %v7791_v17 }
 0xac0   :  { %24095 = vmatpush3.xpose.msra.mxu1 %v7802_v18  ;;  %24096 = vmatprep.mubr.msk.f32.mxu1 %vm26828_vm1, %v26827_v16 }
 0xac1   :  { %24099 = vmatprep.subr.mxu1 %v26827_v16 }
 0xac7   :  { %24097 = vmatmul.mubr.f32.vlgmr.msra.gmra.mrb[16].mxu1 %v7787_v8 }
 0xac8   :  { %24100 = vmatpush3.xpose.msra.mxu1 %v7799_v12  ;;  %24101 = vmatprep.mubr.msk.f32.mxu1 %vm26828_vm1, %v26827_v16 }
 0xac9   :  { %24104 = vmatprep.subr.mxu1 %v26827_v16 }
 0xacf   :  { %24102 = vmatmul.mubr.f32.vlgmr.msra.gmra.mrb[16].mxu1 %v7788_v11 }
 0xad0   :  { %24105 = vmatpush3.xpose.msra.mxu1 %v7722_v9  ;;  %24106 = vmatprep.mubr.msk.f32.mxu1 %vm26828_vm1, %v26827_v16 }
 0xad1   :  { %24109 = vmatprep.subr.mxu1 %v26827_v16 }
 0xad7   :  { %24107 = vmatmul.mubr.f32.vlgmr.msra.gmra.mrb[16].mxu1 %v7789_v13 }
 0xad8   :  { %24110 = vmatpush3.xpose.msra.mxu1 %v7800_v14  ;;  %24111 = vmatprep.mubr.msk.f32.mxu1 %vm26828_vm1, %v26827_v16 }
 0xad9   :  { %24114 = vmatprep.subr.mxu1 %v26827_v16 }
 0xadf   :  { %24112 = vmatmul.mubr.f32.vlgmr.msra.gmra.mrb[16].mxu1 %v7787_v8 }
 0xae0   :  { %24115 = vmatpush3.xpose.msra.mxu1 %v7722_v9  ;;  %24116 = vmatprep.mubr.msk.f32.mxu1 %vm26828_vm1, %v26827_v16 }
 0xae1   :  { %24149 = vmatprep.subr.mxu1 %v26827_v16 }
 0xae7   :  { %24117 = vmatmul.mubr.f32.vlgmr.msra.gmra.mrb[16].mxu1 %v7787_v8 }
 0xae8   :  { %24151 = vmatprep.mubr.msk.f32.mxu1 %vm26828_vm1, %v26827_v16 }
 0xb62   :  { %v6760_v26 = vpop.f32.mrb[10].mxu0 }
 0xb63   :  { %v7217_v27 = vsel %vm722_vm2, %v6760_v26, 0  ;;  %v24028_v28 = vpop.f32.mrb[11].mxu0 }
 0xb64   :  { %v7288_v29 = vand.u32 4294901760, %v7217_v27 }
 0xb66   :  { %v7289_v30 = vsub.f32 %v7217_v27, %v7288_v29 }
 0xb68   :  { %v7290_v31 = vand.u32 4294901760, %v7289_v30 }
 0xb6a   :  { %v7291_v5 = vsub.f32 %v7289_v30, %v7290_v31 }
 0xb6c   :  { %v7292_v32 = vand.u32 4294901760, %v7291_v5 }
 0xb6e   :  { %24061 = vmatprep.mubr.f32.mxu0 %v7292_v32 }
 0xb8e   :  { %v7212_v33 = vpop.f32.mrb[14].mxu1 }
 0xb8f   :  { %v7220_v34 = vsel %vm722_vm2, %v7212_v33, 0  ;;  %v24058_v35 = vpop.f32.mrb[15].mxu1 }
 0xb90   :  { %v7298_v36 = vand.u32 4294901760, %v7220_v34 }
 0xb92   :  { %v7299_v37 = vsub.f32 %v7220_v34, %v7298_v36 }
 0xb94   :  { %v7300_v38 = vand.u32 4294901760, %v7299_v37 }
 0xb96   :  { %v7301_v39 = vsub.f32 %v7299_v37, %v7300_v38 }
 0xb98   :  { %v7302_v40 = vand.u32 4294901760, %v7301_v39 }
 0xb9a   :  { %24062 = vmatmul.mubr.f32.vlgmr.msra.gmra.mrb[8].mxu0 %v7302_v40 }
 0xb9b   :  { %24066 = vmatprep.mubr.f32.mxu0 %v7288_v29  ;;  %24065 = vmatpush3.msra.mxu0 %v7313_v25 }
 0xb9c   :  { %24069 = vmatprep.subr.mxu0 %v7310_v23 }
 0xba2   :  { %24067 = vmatmul.mubr.f32.vlgmr.msra.gmra.mrb[8].mxu0 %v7298_v36 }
 0xba3   :  { %24071 = vmatprep.mubr.f32.mxu0 %v7289_v30  ;;  %24070 = vmatpush3.msra.mxu0 %v7310_v23 }
 0xba4   :  { %24074 = vmatprep.subr.mxu0 %v7223_v22 }
 0xbaa   :  { %24072 = vmatmul.mubr.f32.vlgmr.msra.gmra.mrb[8].mxu0 %v7299_v37 }
 0xbab   :  { %24076 = vmatprep.mubr.f32.mxu0 %v7290_v31  ;;  %24075 = vmatpush3.msra.mxu0 %v7223_v22 }
 0xbac   :  { %24079 = vmatprep.subr.mxu0 %v7311_v6 }
 0xbb2   :  { %24077 = vmatmul.mubr.f32.vlgmr.msra.gmra.mrb[8].mxu0 %v7300_v38 }
 0xbb3   :  { %24081 = vmatprep.mubr.f32.mxu0 %v7288_v29  ;;  %24080 = vmatpush3.msra.mxu0 %v7311_v6 }
 0xbb4   :  { %24084 = vmatprep.subr.mxu0 %v7223_v22 }
 0xbba   :  { %24082 = vmatmul.mubr.f32.vlgmr.msra.gmra.mrb[8].mxu0 %v7298_v36  ;;  %v8163_v48 = vpop.f32.mrb[16].mxu1 }
 0xbbb   :  { %v8621_v49 = vmul.f32 0.35355338, %v8163_v48  ;;  %24085 = vmatpush3.msra.mxu0 %v7223_v22  ;;  %24086 = vmatprep.mubr.f32.mxu0 %v7288_v29  ;;  %v24118_v50 = vpop.f32.mrb[17].mxu1 }
 0xbbc   :  { %24119 = vmatprep.subr.mxu0 %v26827_v16  ;;  %v116_v50 = vld [vmem:[#allocation8 + $0x18] sm:$0xff] }
 0xbbd   :  { %v8623_v55 = vsel %vm722_vm2, %v8621_v49, -inf }
 0xbbe   :  { %8624 = vmax.xlane.f32.xlu1 %v8623_v55 }
 0xbc2   :  { %24087 = vmatmul.mubr.f32.vlgmr.msra.gmra.mrb[8].mxu0 %v7298_v36 }
 0xbc3   :  { %24120 = vmatpush3.xpose.msra.mxu0 %v8176_v45  ;;  %24121 = vmatprep.mubr.msk.f32.mxu0 %vm26828_vm1, %v26827_v16 }
 0xbc4   :  { %24124 = vmatprep.subr.mxu0 %v26827_v16 }
 0xbc6   :  { %24122 = vmatmul.mubr.f32.vlgmr.msra.gmra.mrb[12].mxu0 %v8245_v59 }
 0xbc7   :  { %24125 = vmatpush3.xpose.msra.mxu0 %v8256_v60  ;;  %24126 = vmatprep.mubr.msk.f32.mxu0 %vm26828_vm1, %v26827_v16 }
 0xbc8   :  { %24129 = vmatprep.subr.mxu0 %v26827_v16 }
 0xbce   :  { %24127 = vmatmul.mubr.f32.vlgmr.msra.gmra.mrb[12].mxu0 %v8241_v44 }
 0xbcf   :  { %24130 = vmatpush3.xpose.msra.mxu0 %v8253_v47  ;;  %24131 = vmatprep.mubr.msk.f32.mxu0 %vm26828_vm1, %v26827_v16 }
 0xbd0   :  { %24134 = vmatprep.subr.mxu0 %v26827_v16 }
 0xbd6   :  { %24132 = vmatmul.mubr.f32.vlgmr.msra.gmra.mrb[12].mxu0 %v8242_v46 }
 0xbd7   :  { %24135 = vmatpush3.xpose.msra.mxu0 %v8176_v45  ;;  %24136 = vmatprep.mubr.msk.f32.mxu0 %vm26828_vm1, %v26827_v16 }
 0xbd8   :  { %24139 = vmatprep.subr.mxu0 %v26827_v16 }
 0xbde   :  { %24137 = vmatmul.mubr.f32.vlgmr.msra.gmra.mrb[12].mxu0 %v8243_v51  ;;  %v9556_v51 = vand.u32 4294901760, %v116_v50 }
 0xbdf   :  { %24140 = vmatpush3.xpose.msra.mxu0 %v8254_v53  ;;  %24141 = vmatprep.mubr.msk.f32.mxu0 %vm26828_vm1, %v26827_v16 }
 0xbe0   :  { %24144 = vmatprep.subr.mxu0 %v26827_v16  ;;  %v9643_v53 = vsub.f32 %v116_v50, %v9556_v51 }
 0xbe2   :  { %v9644_v55 = vand.u32 4294901760, %v9643_v53 }
 0xbe4   :  { %v9645_v57 = vsub.f32 %v9643_v53, %v9644_v55 }
 0xbe6   :  { %24142 = vmatmul.mubr.f32.vlgmr.msra.gmra.mrb[12].mxu0 %v8241_v44  ;;  %v9646_v58 = vand.u32 4294901760, %v9645_v57 }
 0xbe7   :  { %24145 = vmatpush3.xpose.msra.mxu0 %v8176_v45  ;;  %24146 = vmatprep.mubr.msk.f32.mxu0 %vm26828_vm1, %v26827_v16 }
 0xbe8   :  { %24179 = vmatprep.subr.mxu0 %v26827_v16 }
 0xbee   :  { %24147 = vmatmul.mubr.f32.vlgmr.msra.gmra.mrb[12].mxu0 %v8241_v44 }
 0xbef   :  { %24181 = vmatprep.mubr.msk.f32.mxu0 %vm26828_vm1, %v26827_v16 }
 0xc4b   :  { %v8625_v61 = vpop.xlane.xlu1 %8624 }
 0xc4c   :  { %v8629_v62 = vsub.f32 %v8621_v49, %v8625_v61 }
 0xc4e   :  { %v8631_v63 = vmul.f32 1.442695, %v8629_v62 }
 0xc50   :  { %26627 = vpow2.f32 %v8631_v63 }
 0xc5a   :  { %v26628_v4 = vpop.eup %26627 }
 0xc5b   :  { %v8635_v7 = vsel %vm722_vm2, %v26628_v4, 0.0 }
 0xcc1   :  { %v8617_v0 = vpop.f32.mrb[12].mxu0 }
 0xcc2   :  { %v8622_v1 = vmul.f32 0.35355338, %v8617_v0  ;;  %v24148_v2 = vpop.f32.mrb[13].mxu0 }
 0xcc4   :  { %v8626_v3 = vsel %vm722_vm2, %v8622_v1, -inf }
 0xcc5   :  { %8627 = vmax.xlane.f32.xlu0 %v8626_v3  ;;  %v10048_v3 = vsub.s32 7, %v27005_v52 }
 0xcc9   :  { %8636 = vadd.xlane.f32.xlu0 %v8635_v7 }
 0xcdf   :  { %8645 = vrot.lane.b32.xlu0 %v27032_v21, %s26839_s24 }
 0xd52   :  { %v8628_v8 = vpop.xlane.xlu0 %8627 }
 0xd53   :  { %v8630_v9 = vsub.f32 %v8622_v1, %v8628_v8 }
 0xd55   :  { %v8633_v11 = vmul.f32 1.442695, %v8630_v9 }
 0xd56   :  { %v8637_v12 = vpop.xlane.xlu0 %8636 }
 0xd57   :  { %26629 = vpow2.f32 %v8633_v11 }
 0xd58   :  { %26631 = vrcp.f32 %v8637_v12 }
 0xd5a   :  { %v8646_v13 = vpop.permute.xlu0 %8645 }
 0xd5b   :  { %v8652_v14 = vand.u32 4294901760, %v8646_v13 }
 0xd5d   :  { %24150 = vmatpush3.msra.mxu1 %v8652_v14  ;;  %v8729_v20 = vsub.f32 %v8646_v13, %v8652_v14  ;;  %v26676_v13 = vld [vmem:[#allocation2 + $0x8] sm:$0xff] }
 0xd5e   :  { %24154 = vmatprep.subr.mxu1 %v26827_v16 }
 0xd5f   :  { %v8730_v23 = vand.u32 4294901760, %v8729_v20 }
 0xd61   :  { %v26630_v15 = vpop.eup %26629  ;;  %v8731_v25 = vsub.f32 %v8729_v20, %v8730_v23 }
 0xd62   :  { %v26632_v10 = vpop.eup %26631  ;;  %v8638_v17 = vsel %vm722_vm2, %v26630_v15, 0.0 }
 0xd63   :  { %v8643_v18 = vmul.f32 %v26632_v10, %v26628_v4  ;;  %8639 = vadd.xlane.f32.xlu1 %v8638_v17  ;;  %v8732_v28 = vand.u32 4294901760, %v8731_v25  ;;  %v27467_v4 = vld [vmem:[#allocation7] sm:$0xff] }
 0xd64   :  { %v10049_v7 = vrot.slane %v27467_v4, %v10048_v3 }
 0xd65   :  { %v8649_v21 = vsel %vm722_vm2, %v8643_v18, 0 }
 0xd66   :  { %v8717_v22 = vand.u32 4294901760, %v8649_v21 }
 0xd68   :  { %v8718_v6 = vsub.f32 %v8649_v21, %v8717_v22  ;;  %v124_v21 = vld [vmem:[#allocation8 + $0x48] sm:$0xff] }
 0xd6a   :  { %v8719_v24 = vand.u32 4294901760, %v8718_v6 }
 0xd6c   :  { %v8720_v26 = vsub.f32 %v8718_v6, %v8719_v24 }
 0xd6e   :  { %v8721_v27 = vand.u32 4294901760, %v8720_v26  ;;  %v27481_v26 = vld [vmem:[%s28537_s1] sm:$0xff] }
 0xd70   :  { %24152 = vmatmul.mubr.f32.vlgmr.msra.gmra.mrb[18].mxu1 %v8721_v27  ;;  %v107_v27 = vld [vmem:[%s28539_s3] sm:$0xff] }
 0xd71   :  { %24155 = vmatpush3.msra.mxu1 %v8732_v28  ;;  %24156 = vmatprep.mubr.msk.f32.mxu1 %vm26828_vm1, %v26827_v16 }
 0xd72   :  { %24159 = vmatprep.subr.mxu1 %v26827_v16 }
 0xd74   :  { %9097 = vrot.lane.b32.xlu1 %v27030_v19, %s26839_s24 }
 0xd78   :  { %24157 = vmatmul.mubr.f32.vlgmr.msra.gmra.mrb[18].mxu1 %v8717_v22 }
 0xd79   :  { %24160 = vmatpush3.msra.mxu1 %v8729_v20  ;;  %24161 = vmatprep.mubr.msk.f32.mxu1 %vm26828_vm1, %v26827_v16  ;;  %v123_v20 = vld [vmem:[#allocation8 + $0x40] sm:$0xff] }
 0xd7a   :  { %24164 = vmatprep.subr.mxu1 %v26827_v16 }
 0xd80   :  { %24162 = vmatmul.mubr.f32.vlgmr.msra.gmra.mrb[18].mxu1 %v8718_v6  ;;  %v10654_v6 = vand.u32 4294901760, %v124_v21 }
 0xd81   :  { %24165 = vmatpush3.msra.mxu1 %v8652_v14  ;;  %24166 = vmatprep.mubr.msk.f32.mxu1 %vm26828_vm1, %v26827_v16 }
 0xd82   :  { %24169 = vmatprep.subr.mxu1 %v26827_v16 }
 0xd88   :  { %24167 = vmatmul.mubr.f32.vlgmr.msra.gmra.mrb[18].mxu1 %v8719_v24  ;;  %v126_v24 = vld [vmem:[#allocation8 + $0x58] sm:$0xff] }
 0xd89   :  { %24170 = vmatpush3.msra.mxu1 %v8730_v23  ;;  %24171 = vmatprep.mubr.msk.f32.mxu1 %vm26828_vm1, %v26827_v16  ;;  %v10651_v23 = vand.u32 4294901760, %v123_v20  ;;  %v10660_v28 = vand.u32 4294901760, %v126_v24 }
 0xd8a   :  { %24174 = vmatprep.subr.mxu1 %v26827_v16 }
 0xd90   :  { %24172 = vmatmul.mubr.f32.vlgmr.msra.gmra.mrb[18].mxu1 %v8717_v22 }
 0xd91   :  { %24175 = vmatpush3.msra.mxu1 %v8652_v14  ;;  %24176 = vmatprep.mubr.msk.f32.mxu1 %vm26828_vm1, %v26827_v16 }
 0xd98   :  { %24177 = vmatmul.mubr.f32.vlgmr.msra.gmra.mrb[18].mxu1 %v8717_v22  ;;  %v125_v22 = vld [vmem:[#allocation8 + $0x50] sm:$0xff] }
 0xd99   :  { %v10657_v25 = vand.u32 4294901760, %v125_v22 }
 0xdf0   :  { %v8640_v19 = vpop.xlane.xlu1 %8639 }
 0xdf1   :  { %26633 = vrcp.f32 %v8640_v19  ;;  %v10092_v19 = vadd.f32 %v107_v27, %v27481_v26 }
 0xdf4   :  { %v9098_v29 = vpop.permute.xlu1 %9097 }
 0xdf5   :  { %v9104_v30 = vand.u32 4294901760, %v9098_v29 }
 0xdf7   :  { %24180 = vmatpush3.msra.mxu0 %v9104_v30  ;;  %v9181_v32 = vsub.f32 %v9098_v29, %v9104_v30  ;;  %v27490_v29 = vld [vmem:[%s28537_s1 + $0x8] sm:$0xff] }
 0xdf8   :  { %24184 = vmatprep.subr.mxu0 %v26827_v16 }
 0xdf9   :  { %v9182_v35 = vand.u32 4294901760, %v9181_v32 }
 0xdfb   :  { %v26634_v31 = vpop.eup %26633  ;;  %v9183_v38 = vsub.f32 %v9181_v32, %v9182_v35 }
 0xdfc   :  { %v8644_v5 = vmul.f32 %v26634_v31, %v26630_v15  ;;  %v26677_v15 = vld [vmem:[#allocation2] sm:$0xff]  ;;  %v27498_v31 = vld [vmem:[%s28537_s1 + $0x10] sm:$0xff] }
 0xdfd   :  { %v9184_v41 = vand.u32 4294901760, %v9183_v38  ;;  %v27518_v38 = vpack.c.bf16 %v10660_v28, %v10657_v25 }
 0xdfe   :  { %v9101_v33 = vsel %vm722_vm2, %v8644_v5, 0  ;;  %v27500_v5 = vpack.c.bf16 %v10654_v6, %v10651_v23 }
 0xdff   :  { %v9169_v34 = vand.u32 4294901760, %v9101_v33 }
 0xe01   :  { %v9170_v36 = vsub.f32 %v9101_v33, %v9169_v34  ;;  %v27503_v33 = vsub.f32 %v123_v20, %v10651_v23 }
 0xe03   :  { %v9171_v37 = vand.u32 4294901760, %v9170_v36 }
 0xe05   :  { %v9172_v39 = vsub.f32 %v9170_v36, %v9171_v37 }
 0xe07   :  { %v9173_v40 = vand.u32 4294901760, %v9172_v39  ;;  %v10639_v39 = vsel %vm141_vm0, %v10092_v19, 0 }
 0xe09   :  { %24182 = vmatmul.mubr.f32.vlgmr.msra.gmra.mrb[14].mxu0 %v9173_v40 }
 0xe0a   :  { %24185 = vmatpush3.msra.mxu0 %v9184_v41  ;;  %24186 = vmatprep.mubr.msk.f32.mxu0 %vm26828_vm1, %v26827_v16 }
 0xe0b   :  { %24189 = vmatprep.subr.mxu0 %v26827_v16 }
 0xe11   :  { %24187 = vmatmul.mubr.f32.vlgmr.msra.gmra.mrb[14].mxu0 %v9169_v34 }
 0xe12   :  { %24190 = vmatpush3.msra.mxu0 %v9181_v32  ;;  %24191 = vmatprep.mubr.msk.f32.mxu0 %vm26828_vm1, %v26827_v16 }
 0xe13   :  { %24194 = vmatprep.subr.mxu0 %v26827_v16 }
 0xe19   :  { %24192 = vmatmul.mubr.f32.vlgmr.msra.gmra.mrb[14].mxu0 %v9170_v36  ;;  %v27513_v36 = vld [vmem:[%s28537_s1 + $0x18] sm:$0xff] }
 0xe1a   :  { %24195 = vmatpush3.msra.mxu0 %v9104_v30  ;;  %24196 = vmatprep.mubr.msk.f32.mxu0 %vm26828_vm1, %v26827_v16 }
 0xe1b   :  { %24199 = vmatprep.subr.mxu0 %v26827_v16 }
 0xe21   :  { %24197 = vmatmul.mubr.f32.vlgmr.msra.gmra.mrb[14].mxu0 %v9171_v37  ;;  %v110_v37 = vld [vmem:[%s28539_s3 + $0x18] sm:$0xff] }
 0xe22   :  { %24200 = vmatpush3.msra.mxu0 %v9182_v35  ;;  %24201 = vmatprep.mubr.msk.f32.mxu0 %vm26828_vm1, %v26827_v16  ;;  %v109_v35 = vld [vmem:[%s28539_s3 + $0x10] sm:$0xff]  ;;  %v10095_v41 = vadd.f32 %v110_v37, %v27513_v36 }
 0xe23   :  { %24204 = vmatprep.subr.mxu0 %v26827_v16  ;;  %v10094_v40 = vadd.f32 %v109_v35, %v27498_v31 }
 0xe29   :  { %24202 = vmatmul.mubr.f32.vlgmr.msra.gmra.mrb[14].mxu0 %v9169_v34 }
 0xe2a   :  { %24205 = vmatpush3.msra.mxu0 %v9104_v30  ;;  %24206 = vmatprep.mubr.msk.f32.mxu0 %vm26828_vm1, %v26827_v16  ;;  %v108_v30 = vld [vmem:[%s28539_s3 + $0x8] sm:$0xff] }
 0xe2b   :  { %24209 = vmatprep.subr.mxu0 %v9556_v51  ;;  %v10093_v32 = vadd.f32 %v108_v30, %v27490_v29 }
 0xe31   :  { %24207 = vmatmul.mubr.f32.vlgmr.msra.gmra.mrb[14].mxu0 %v9169_v34  ;;  %v27505_v34 = vsub.f32 %v124_v21, %v10654_v6 }
 0xe32   :  { %24210 = vmatpush3.msra.mxu0 %v9556_v51 }
 0xe33   :  { %24214 = vmatprep.subr.mxu0 %v9646_v58  ;;  %v25557_v27 = vpack.c.bf16 %v27505_v34, %v27503_v33 }
 0xe6b   :  { %v9093_v42 = vpop.f32.mrb[18].mxu1 }
 0xe6c   :  { %v9550_v43 = vsel %vm722_vm2, %v9093_v42, 0  ;;  %v24178_v44 = vpop.f32.mrb[19].mxu1  ;;  %v27524_v42 = vand.u32 4294901760, %v10639_v39 }
 0xe6d   :  { %v9621_v45 = vand.u32 4294901760, %v9550_v43  ;;  %v10762_v44 = vand.u32 4294901760, %v27503_v33 }
 0xe6e   :  { %v10720_v50 = vsub.f32 %v10639_v39, %v27524_v42 }
 0xe6f   :  { %v9622_v46 = vsub.f32 %v9550_v43, %v9621_v45  ;;  %v10642_v43 = vsel %vm141_vm0, %v10093_v32, 0 }
 0xe71   :  { %v9623_v47 = vand.u32 4294901760, %v9622_v46 }
 0xe73   :  { %v9624_v48 = vsub.f32 %v9622_v46, %v9623_v47 }
 0xe75   :  { %v9625_v49 = vand.u32 4294901760, %v9624_v48  ;;  %v10648_v48 = vsel %vm141_vm0, %v10095_v41, 0 }
 0xe77   :  { %24211 = vmatprep.mubr.f32.mxu0 %v9625_v49  ;;  %v27534_v49 = vsub.f32 %v125_v22, %v10657_v25 }
 0xf04   :  { %v9545_v59 = vpop.f32.mrb[14].mxu0 }
 0xf05   :  { %v9553_v60 = vsel %vm722_vm2, %v9545_v59, 0  ;;  %v24208_v61 = vpop.f32.mrb[15].mxu0  ;;  %v10776_v59 = vand.u32 4294901760, %v27534_v49 }
 0xf06   :  { %v9631_v62 = vand.u32 4294901760, %v9553_v60  ;;  %v10721_v61 = vand.u32 4294901760, %v10720_v50 }
 0xf07   :  { %v10777_v3 = vsub.f32 %v27534_v49, %v10776_v59 }
 0xf08   :  { %v9632_v63 = vsub.f32 %v9553_v60, %v9631_v62  ;;  %v27550_v60 = vsub.f32 %v126_v24, %v10660_v28 }
 0xf0a   :  { %v9633_v0 = vand.u32 4294901760, %v9632_v63  ;;  %v25561_v28 = vpack.c.bf16 %v27550_v60, %v27534_v49 }
 0xf0c   :  { %v9634_v1 = vsub.f32 %v9632_v63, %v9633_v0 }
 0xf0e   :  { %v9635_v2 = vand.u32 4294901760, %v9634_v1 }
 0xf10   :  { %24212 = vmatmul.mubr.f32.vlgmr.msra.gmra.mrb[8].mxu0 %v9635_v2 }
 0xf11   :  { %24216 = vmatprep.mubr.f32.mxu0 %v9621_v45  ;;  %24215 = vmatpush3.msra.mxu0 %v9646_v58  ;;  %v27547_v58 = vand.u32 4294901760, %v10648_v48 }
 0xf12   :  { %24219 = vmatprep.subr.mxu0 %v9643_v53 }
 0xf13   :  { %v10750_v2 = vsub.f32 %v10648_v48, %v27547_v58 }
 0xf18   :  { %24217 = vmatmul.mubr.f32.vlgmr.msra.gmra.mrb[8].mxu0 %v9631_v62 }
 0xf19   :  { %24221 = vmatprep.mubr.f32.mxu0 %v9622_v46  ;;  %24220 = vmatpush3.msra.mxu0 %v9643_v53  ;;  %v27530_v46 = vand.u32 4294901760, %v10642_v43 }
 0xf1a   :  { %24224 = vmatprep.subr.mxu0 %v9556_v51 }
 0xf1b   :  { %v10730_v57 = vsub.f32 %v10642_v43, %v27530_v46 }
 0xf1d   :  { %v10731_v1 = vand.u32 4294901760, %v10730_v57 }
 0xf20   :  { %24222 = vmatmul.mubr.f32.vlgmr.msra.gmra.mrb[8].mxu0 %v9632_v63 }
 0xf21   :  { %24226 = vmatprep.mubr.f32.mxu0 %v9623_v47  ;;  %24225 = vmatpush3.msra.mxu0 %v9556_v51  ;;  %v10645_v47 = vsel %vm141_vm0, %v10094_v40, 0 }
 0xf22   :  { %24229 = vmatprep.subr.mxu0 %v9644_v55 }
 0xf28   :  { %24227 = vmatmul.mubr.f32.vlgmr.msra.gmra.mrb[8].mxu0 %v9633_v0 }
 0xf29   :  { %24231 = vmatprep.mubr.f32.mxu0 %v9621_v45  ;;  %24230 = vmatpush3.msra.mxu0 %v9644_v55  ;;  %v27544_v55 = vand.u32 4294901760, %v10645_v47 }
 0xf2a   :  { %24234 = vmatprep.subr.mxu0 %v9556_v51 }
 0xf2b   :  { %v10740_v0 = vsub.f32 %v10645_v47, %v27544_v55 }
 0xf30   :  { %24232 = vmatmul.mubr.f32.vlgmr.msra.gmra.mrb[8].mxu0 %v9631_v62 }
 0xf31   :  { %24236 = vmatprep.mubr.f32.mxu0 %v9621_v45  ;;  %24235 = vmatpush3.msra.mxu0 %v9556_v51  ;;  %v10769_v45 = vand.u32 4294901760, %v27505_v34  ;;  %v10763_v51 = vsub.f32 %v27503_v33, %v10762_v44 }
 0xf32   :  { %25542 = vmatprep.subr.bf16.mxu0 %v27500_v5 }
 0xf33   :  { %v10770_v53 = vsub.f32 %v27505_v34, %v10769_v45  ;;  %v25573_v48 = vpack.c.bf16 %v10769_v45, %v10762_v44  ;;  %v121_v44 = vld [vmem:[#allocation8 + $0x38] sm:$0xff] }
 0xf34   :  { %v10116_v49 = vand.u32 4294901760, %v121_v44 }
 0xf35   :  { %v10771_v63 = vand.u32 4294901760, %v10770_v53  ;;  %v119_v53 = vld [vmem:[#allocation8 + $0x28] sm:$0xff] }
 0xf36   :  { %v10110_v34 = vand.u32 4294901760, %v119_v53 }
 0xf38   :  { %24237 = vmatmul.mubr.f32.vlgmr.msra.gmra.mrb[8].mxu0 %v9631_v62  ;;  %v10764_v62 = vand.u32 4294901760, %v10763_v51  ;;  %v118_v51 = vld [vmem:[#allocation8 + $0x20] sm:$0xff] }
 0xf39   :  { %25544 = vmatpush3.bf16.msra.mxu0 %v27500_v5  ;;  %v10107_v33 = vand.u32 4294901760, %v118_v51 }
 0xf3a   :  { %25546 = vmatprep.subr.bf16.mxu0 %v27518_v38 }
 0xf3d   :  { %25548 = vmatpush3.bf16.msra.mxu0 %v27518_v38 }
0x100b   :  { %v24238_v8 = vpop.f32.mrb[8].mxu0 }
0x100c   :  { %v10051_v9 = vadd.f32 %v24238_v8, %v10049_v7  ;;  %v10034_v11 = vpop.f32.mrb[9].mxu0  ;;  %v10722_v8 = vsub.f32 %v10720_v50, %v10721_v61 }
0x100d   :  { %v10050_v12 = vadd.f32 %v10049_v7, %v10034_v11  ;;  %v10783_v7 = vand.u32 4294901760, %v27550_v60  ;;  %v10741_v11 = vand.u32 4294901760, %v10740_v0 }
0x100e   :  { %v27470_v14 = vadd.f32 %v26676_v13, %v10051_v9  ;;  %v25549_v9 = vpack.c.bf16 %v10771_v63, %v10764_v62  ;;  %v10751_v13 = vand.u32 4294901760, %v10750_v2 }
0x100f   :  { %v27472_v10 = vadd.f32 %v26677_v15, %v10050_v12  ;;  %v10732_v12 = vsub.f32 %v10730_v57, %v10731_v1  ;;  %v10778_v15 = vand.u32 4294901760, %v10777_v3  ;;  %v10742_v20 = vsub.f32 %v10740_v0, %v10741_v11 }
0x1010   :  { %v10057_v17 = vsel %vm141_vm0, %v27470_v14, 0.0  ;;  %25550 = vmatprep.subr.bf16.mxu0 %v25549_v9  ;;  %v10752_v22 = vsub.f32 %v10750_v2, %v10751_v13 }
0x1011   :  { %10058 = vadd.xlane.f32.xlu0 %v10057_v17  ;;  %v10054_v18 = vsel %vm141_vm0, %v27472_v10, 0.0  ;;  %v10784_v17 = vsub.f32 %v27550_v60, %v10783_v7  ;;  %v10733_v21 = vand.u32 4294901760, %v10732_v12  ;;  %v10743_v6 = vand.u32 4294901760, %v10742_v20 }
0x1012   :  { %10055 = vadd.xlane.f32.xlu1 %v10054_v18  ;;  %v10723_v18 = vand.u32 4294901760, %v10722_v8  ;;  %v10753_v24 = vand.u32 4294901760, %v10752_v22 }
0x1013   :  { %v10785_v23 = vand.u32 4294901760, %v10784_v17 }
0x1014   :  { %24313 = vmatprep.mubr.f32.mxu0 %v10723_v18 }
0x1015   :  { %24314 = vmatmul.mubr.f32.vlgmr.msra.gmra.mrb[16].mxu0 %v10733_v21  ;;  %v25553_v25 = vpack.c.bf16 %v10785_v23, %v10778_v15  ;;  %v26840_v21 = vmov 0.0|0.0  }
0x1016   :  { %25552 = vmatpush3.bf16.msra.mxu0 %v25549_v9  ;;  %24316 = vmatprep.mubr.f32.mxu0 %v10743_v6 }
0x1017   :  { %25554 = vmatprep.subr.bf16.mxu0 %v25553_v25 }
0x1019   :  { %24317 = vmatmul.mubr.f32.gmra.mrb[18].mxu0 %v10753_v24 }
0x101a   :  { %25556 = vmatpush3.bf16.msra.mxu0 %v25553_v25  ;;  %24327 = vmatprep.mubr.f32.mxu0 %v27524_v42 }
0x101b   :  { %25558 = vmatprep.subr.bf16.mxu0 %v25557_v27 }
0x101d   :  { %24328 = vmatmul.mubr.f32.vlgmr.msra.gmra.mrb[16].mxu0 %v27530_v46 }
0x101e   :  { %25560 = vmatpush3.bf16.msra.mxu0 %v25557_v27  ;;  %24330 = vmatprep.mubr.f32.mxu0 %v27544_v55  ;;  %v10082_v27 = vsub.s32 1, %v27005_v52 }
0x101f   :  { %25562 = vmatprep.subr.bf16.mxu0 %v25561_v28 }
0x1021   :  { %24331 = vmatmul.mubr.f32.gmra.mrb[18].mxu0 %v27547_v58 }
0x1022   :  { %25564 = vmatpush3.bf16.msra.mxu0 %v25561_v28  ;;  %24341 = vmatprep.mubr.f32.mxu0 %v10720_v50  ;;  %v25577_v50 = vpack.c.bf16 %v10783_v7, %v10776_v59  ;;  %v27596_v59 = vpack.c.bf16 %v10110_v34, %v10107_v33  ;;  %v10088_v28 = vsub.s32 4, %v27005_v52 }
0x1023   :  { %25566 = vmatprep.subr.bf16.mxu0 %v27500_v5 }
0x1024   :  { %25494 = vmatprep.subr.bf16.mxu1 %v27596_v59 }
0x1025   :  { %24342 = vmatmul.mubr.f32.vlgmr.msra.gmra.mrb[16].mxu0 %v10730_v57  ;;  %v120_v57 = vld [vmem:[#allocation8 + $0x30] sm:$0xff]  ;;  %25496 = vmatpush3.bf16.msra.mxu1 %v27596_v59 }
0x1026   :  { %25568 = vmatpush3.bf16.msra.mxu0 %v27500_v5  ;;  %24344 = vmatprep.mubr.f32.mxu0 %v10740_v0  ;;  %v10113_v45 = vand.u32 4294901760, %v120_v57 }
0x1027   :  { %25570 = vmatprep.subr.bf16.mxu0 %v27518_v38 }
0x1028   :  { %v27599_v60 = vpack.c.bf16 %v10116_v49, %v10113_v45 }
0x1029   :  { %24345 = vmatmul.mubr.f32.gmra.mrb[18].mxu0 %v10750_v2 }
0x102a   :  { %25572 = vmatpush3.bf16.msra.mxu0 %v27518_v38  ;;  %24355 = vmatprep.mubr.f32.mxu0 %v10721_v61  ;;  %v10204_v61 = vsub.f32 %v119_v53, %v10110_v34 }
0x102b   :  { %25574 = vmatprep.subr.bf16.mxu0 %v25573_v48  ;;  %25498 = vmatprep.subr.bf16.mxu1 %v27599_v60 }
0x102c   :  { %25500 = vmatpush3.bf16.msra.mxu1 %v27599_v60  ;;  %v10205_v63 = vand.u32 4294901760, %v10204_v61 }
0x102d   :  { %24356 = vmatmul.mubr.f32.vlgmr.msra.gmra.mrb[16].mxu0 %v10731_v1  ;;  %v10211_v1 = vsub.f32 %v120_v57, %v10113_v45 }
0x102e   :  { %24358 = vmatprep.mubr.f32.mxu0 %v10741_v11  ;;  %25576 = vmatpush3.bf16.msra.mxu0 %v25573_v48  ;;  %v10206_v0 = vsub.f32 %v10204_v61, %v10205_v63 }
0x102f   :  { %25578 = vmatprep.subr.bf16.mxu0 %v25577_v50 }
0x1030   :  { %v10207_v3 = vand.u32 4294901760, %v10206_v0 }
0x1031   :  { %24359 = vmatmul.mubr.f32.gmra.mrb[18].mxu0 %v10751_v13 }
0x1032   :  { %24369 = vmatprep.mubr.f32.mxu0 %v27524_v42  ;;  %25580 = vmatpush3.bf16.msra.mxu0 %v25577_v50 }
0x1033   :  { %25582 = vmatprep.subr.bf16.mxu0 %v27500_v5 }
0x1035   :  { %24370 = vmatmul.mubr.f32.vlgmr.msra.gmra.mrb[16].mxu0 %v27530_v46 }
0x1036   :  { %25584 = vmatpush3.bf16.msra.mxu0 %v27500_v5  ;;  %24372 = vmatprep.mubr.f32.mxu0 %v27544_v55  ;;  %v10197_v5 = vsub.f32 %v118_v51, %v10107_v33 }
0x1037   :  { %25586 = vmatprep.subr.bf16.mxu0 %v27518_v38 }
0x1038   :  { %v10198_v62 = vand.u32 4294901760, %v10197_v5  ;;  %v25509_v15 = vpack.c.bf16 %v10204_v61, %v10197_v5  ;;  %v11269_v61 = vsel %vm141_vm0, %v27481_v26, 0  ;;  %v11272_v26 = vsel %vm141_vm0, %v27490_v29, 0 }
0x1039   :  { %24373 = vmatmul.mubr.f32.gmra.mrb[18].mxu0 %v27547_v58  ;;  %v11278_v29 = vsel %vm141_vm0, %v27513_v36, 0 }
0x103a   :  { %25588 = vmatpush3.bf16.msra.mxu0 %v27518_v38  ;;  %24383 = vmatprep.mubr.f32.mxu0 %v27524_v42  ;;  %v10199_v38 = vsub.f32 %v10197_v5, %v10198_v62  ;;  %v10218_v42 = vsub.f32 %v121_v44, %v10116_v49  ;;  %v27612_v17 = vpack.c.bf16 %v10205_v63, %v10198_v62  ;;  %v128_v62 = vld [vmem:[#allocation8 + $0x60] sm:$0xff]  ;;  %v129_v63 = vld [vmem:[#allocation8 + $0x68] sm:$0xff] }
0x103b   :  { %25637 = vmatprep.subr.bf16.mxu0 %v26840_v21  ;;  %v11281_v0 = vand.u32 4294901760, %v128_v62 }
0x103c   :  { %v10200_v2 = vand.u32 4294901760, %v10199_v38  ;;  %v10219_v7 = vand.u32 4294901760, %v10218_v42  ;;  %v27639_v38 = vand.u32 4294901760, %v11269_v61 }
0x103d   :  { %24384 = vmatmul.mubr.f32.vlgmr.msra.gmra.mrb[16].mxu0 %v27530_v46  ;;  %v10212_v46 = vand.u32 4294901760, %v10211_v1 }
0x103e   :  { %24386 = vmatprep.mubr.f32.mxu0 %v27544_v55  ;;  %v25501_v55 = vpack.c.bf16 %v10207_v3, %v10200_v2  ;;  %v10220_v9 = vsub.f32 %v10218_v42, %v10219_v7  ;;  %v131_v2 = vld [vmem:[#allocation8 + $0x78] sm:$0xff] }
0x103f   :  { %v10213_v8 = vsub.f32 %v10211_v1, %v10212_v46  ;;  %v27614_v18 = vpack.c.bf16 %v10219_v7, %v10212_v46  ;;  %v27644_v46 = vsub.f32 %v11269_v61, %v27639_v38  ;;  %v11290_v7 = vand.u32 4294901760, %v131_v2  ;;  %v27732_v61 = vld [vmem:[#allocation7 + $0x8] sm:$0x3f] }
0x1040   :  { %25502 = vmatprep.subr.bf16.mxu1 %v25501_v55  ;;  %v10221_v12 = vand.u32 4294901760, %v10220_v9  ;;  %v11275_v9 = vsel %vm141_vm0, %v27498_v31, 0 }
0x1041   :  { %24387 = vmatmul.mubr.f32.gmra.mrb[18].mxu0 %v27547_v58  ;;  %v10214_v11 = vand.u32 4294901760, %v10213_v8  ;;  %v25513_v58 = vpack.c.bf16 %v10218_v42, %v10211_v1  ;;  %v11284_v1 = vand.u32 4294901760, %v129_v63  ;;  %v130_v42 = vld [vmem:[#allocation8 + $0x70] sm:$0xff]  ;;  %v27668_v31 = vsub.f32 %v131_v2, %v11290_v7 }
0x1042   :  { %24477 = vmatprep.mubr.msk.f32.mxu0 %vm26828_vm1, %v26827_v16  ;;  %v11287_v3 = vand.u32 4294901760, %v130_v42 }
0x1043   :  { %v25505_v13 = vpack.c.bf16 %v10221_v12, %v10214_v11  ;;  %v27651_v8 = vsub.f32 %v129_v63, %v11284_v1  ;;  %v27655_v11 = vand.u32 4294901760, %v11272_v26  ;;  %v11351_v12 = vand.u32 4294901760, %v27644_v46 }
0x1044   :  { %v27677_v36 = vpack.c.bf16 %v11284_v1, %v11281_v0  ;;  %v10637_v63 = vrot.slane %v27732_v61, %v10082_v27 }
0x109e   :  { %v10059_v19 = vpop.xlane.xlu0 %10058 }
0x109f   :  { %v10061_v30 = vmul.f32 0.03125, %v10059_v19  ;;  %v10056_v32 = vpop.xlane.xlu1 %10055  ;;  %v10083_v19 = vrot.slane %v27467_v4, %v10082_v27 }
0x10a0   :  { %v10060_v35 = vmul.f32 0.03125, %v10056_v32 }
0x10a1   :  { %v27574_v37 = vsub.f32 %v27470_v14, %v10061_v30 }
0x10a2   :  { %v27577_v39 = vsub.f32 %v27472_v10, %v10060_v35 }
0x10a3   :  { %v10065_v40 = vmul.f32 %v27574_v37, %v27574_v37 }
0x10a4   :  { %v10064_v41 = vmul.f32 %v27577_v39, %v27577_v39 }
0x10a5   :  { %v10069_v43 = vsel %vm141_vm0, %v10065_v40, 0.0  ;;  %v10089_v40 = vrot.slane %v27467_v4, %v10088_v28 }
0x10a6   :  { %10070 = vadd.xlane.f32.xlu1 %v10069_v43  ;;  %v10066_v47 = vsel %vm141_vm0, %v10064_v41, 0.0 }
0x10a7   :  { %10067 = vadd.xlane.f32.xlu0 %v10066_v47 }
0x1133   :  { %v10071_v20 = vpop.xlane.xlu1 %10070 }
0x1134   :  { %v10073_v22 = vmul.f32 0.03125, %v10071_v20  ;;  %v10068_v23 = vpop.xlane.xlu0 %10067  ;;  %v27674_v20 = vand.u32 4294901760, %v11278_v29 }
0x1135   :  { %v10072_v6 = vmul.f32 0.03125, %v10068_v23 }
0x1136   :  { %v10075_v24 = vadd.f32 1e-05, %v10073_v22  ;;  %v11352_v22 = vsub.f32 %v27644_v46, %v11351_v12 }
0x1137   :  { %v10074_v25 = vadd.f32 1e-05, %v10072_v6 }
0x1138   :  { %26635 = vrsqrt.f32 %v10075_v24 }
0x1139   :  { %26637 = vrsqrt.f32 %v10074_v25  ;;  %v11413_v25 = vand.u32 4294901760, %v27668_v31 }
0x1142   :  { %v26636_v30 = vpop.eup %26635 }
0x1143   :  { %v26638_v32 = vpop.eup %26637  ;;  %v10079_v35 = vmul.f32 %v26636_v30, %v27574_v37  ;;  %v27696_v30 = vsub.f32 %v11278_v29, %v27674_v20 }
0x1144   :  { %v10078_v41 = vmul.f32 %v26638_v32, %v27577_v39  ;;  %v27699_v32 = vpack.c.bf16 %v11290_v7, %v11287_v3 }
0x1145   :  { %v10085_v43 = vmul.f32 %v10083_v19, %v10079_v35  ;;  %v11353_v35 = vand.u32 4294901760, %v11352_v22 }
0x1146   :  { %v10084_v47 = vmul.f32 %v10083_v19, %v10078_v41 }
0x1147   :  { %v10091_v48 = vadd.f32 %v10089_v40, %v10085_v43 }
0x1148   :  { %v10090_v50 = vadd.f32 %v10089_v40, %v10084_v47 }
0x1149   :  { %v10104_v51 = vsel %vm141_vm0, %v10091_v48, 0  ;;  %v11414_v48 = vsub.f32 %v27668_v31, %v11413_v25 }
0x114a   :  { %v10101_v53 = vsel %vm141_vm0, %v10090_v50, 0  ;;  %v27629_v57 = vand.u32 4294901760, %v10104_v51 }
0x114b   :  { %v10175_v33 = vand.u32 4294901760, %v10101_v53 }
0x114c   :  { %v10186_v34 = vsub.f32 %v10104_v51, %v27629_v57  ;;  %v11381_v51 = vand.u32 4294901760, %v27696_v30 }
0x114d   :  { %v10176_v37 = vsub.f32 %v10101_v53, %v10175_v33 }
0x114e   :  { %v10187_v44 = vand.u32 4294901760, %v10186_v34 }
0x114f   :  { %v10177_v45 = vand.u32 4294901760, %v10176_v37 }
0x1150   :  { %v10188_v49 = vsub.f32 %v10186_v34, %v10187_v44 }
0x1151   :  { %v10178_v4 = vsub.f32 %v10176_v37, %v10177_v45 }
0x1152   :  { %v10189_v39 = vand.u32 4294901760, %v10188_v49 }
0x1153   :  { %v10179_v5 = vand.u32 4294901760, %v10178_v4 }
0x1155   :  { %24247 = vmatprep.mubr.f32.mxu1 %v10179_v5 }
0x1156   :  { %24248 = vmatmul.mubr.f32.vlgmr.msra.gmra.mrb[20].mxu1 %v10189_v39 }
0x1157   :  { %25504 = vmatpush3.bf16.msra.mxu1 %v25501_v55  ;;  %24258 = vmatprep.mubr.f32.mxu1 %v10175_v33  ;;  %v27649_v55 = vsub.f32 %v128_v62, %v11281_v0  ;;  %v24385_v0 = vpop.f32.mrb[16].mxu0 }
0x1158   :  { %25506 = vmatprep.subr.bf16.mxu1 %v25505_v13  ;;  %v27740_v1 = vadd.f32 %v24385_v0, %v10637_v63 }
0x1159   :  { %v25605_v4 = vpack.c.bf16 %v27651_v8, %v27649_v55 }
0x115b   :  { %25508 = vmatpush3.bf16.msra.mxu1 %v25505_v13  ;;  %v27659_v13 = vand.u32 4294901760, %v11275_v9 }
0x115c   :  { %25510 = vmatprep.subr.bf16.mxu1 %v25509_v15 }
0x115d   :  { %v27683_v23 = vsub.f32 %v11275_v9, %v27659_v13 }
0x115e   :  { %24259 = vmatmul.mubr.f32.vlgmr.msra.gmra.mrb[20].mxu1 %v27629_v57 }
0x115f   :  { %25512 = vmatpush3.bf16.msra.mxu1 %v25509_v15  ;;  %24269 = vmatprep.mubr.f32.mxu1 %v10176_v37  ;;  %v11392_v15 = vand.u32 4294901760, %v27649_v55  ;;  %v11371_v40 = vand.u32 4294901760, %v27683_v23 }
0x1160   :  { %25514 = vmatprep.subr.bf16.mxu1 %v25513_v58 }
0x1161   :  { %v11393_v6 = vsub.f32 %v27649_v55, %v11392_v15 }
0x1163   :  { %25516 = vmatpush3.bf16.msra.mxu1 %v25513_v58  ;;  %v11399_v58 = vand.u32 4294901760, %v27651_v8  ;;  %v11394_v41 = vand.u32 4294901760, %v11393_v6 }
0x1164   :  { %25518 = vmatprep.subr.bf16.mxu1 %v27596_v59 }
0x1165   :  { %v25621_v39 = vpack.c.bf16 %v11399_v58, %v11392_v15 }
0x1166   :  { %24270 = vmatmul.mubr.f32.vlgmr.msra.gmra.mrb[20].mxu1 %v10186_v34  ;;  %v11415_v34 = vand.u32 4294901760, %v11414_v48 }
0x1167   :  { %25520 = vmatpush3.bf16.msra.mxu1 %v27596_v59  ;;  %24280 = vmatprep.mubr.f32.mxu1 %v10177_v45 }
0x1168   :  { %25522 = vmatprep.subr.bf16.mxu1 %v27599_v60 }
0x116b   :  { %25524 = vmatpush3.bf16.msra.mxu1 %v27599_v60 }
0x116c   :  { %25526 = vmatprep.subr.bf16.mxu1 %v27612_v17 }
0x116e   :  { %24281 = vmatmul.mubr.f32.vlgmr.msra.gmra.mrb[20].mxu1 %v10187_v44  ;;  %v11382_v44 = vsub.f32 %v27696_v30, %v11381_v51 }
0x116f   :  { %25528 = vmatpush3.bf16.msra.mxu1 %v27612_v17  ;;  %24291 = vmatprep.mubr.f32.mxu1 %v10175_v33  ;;  %v27666_v17 = vsub.f32 %v130_v42, %v11287_v3  ;;  %v11242_v42 = vpop.f32.mrb[17].mxu0  ;;  %v11901_v3 = vsel %vm722_vm2, %v27740_v1, 0 }
0x1170   :  { %25530 = vmatprep.subr.bf16.mxu1 %v27614_v18  ;;  %v11383_v49 = vand.u32 4294901760, %v11382_v44  ;;  %v27742_v2 = vadd.f32 %v11242_v42, %v10637_v63  ;;  %v11266_v42 = vsub.s32 2, %v27005_v52 }
0x1171   :  { %v11406_v24 = vand.u32 4294901760, %v27666_v17  ;;  %v25609_v5 = vpack.c.bf16 %v27668_v31, %v27666_v17 }
0x1172   :  { %v11898_v27 = vsel %vm722_vm2, %v27742_v2, 0 }
0x1173   :  { %25532 = vmatpush3.bf16.msra.mxu1 %v27614_v18  ;;  %v27672_v18 = vsub.f32 %v11272_v26, %v27655_v11  ;;  %v11407_v47 = vsub.f32 %v27666_v17, %v11406_v24  ;;  %v25625_v62 = vpack.c.bf16 %v11413_v25, %v11406_v24  ;;  %v24388_v26 = vpop.f32.mrb[18].mxu0  ;;  %v11904_v7 = vand.u32 4294901760, %v11898_v27 }
0x1174   :  { %25534 = vmatprep.subr.bf16.mxu1 %v27596_v59  ;;  %v27750_v55 = vadd.f32 %v24388_v26, %v10637_v63 }
0x1175   :  { %v11361_v19 = vand.u32 4294901760, %v27672_v18  ;;  %v27757_v29 = vsub.f32 %v11898_v27, %v11904_v7 }
0x1176   :  { %24292 = vmatmul.mubr.f32.vlgmr.msra.gmra.mrb[20].mxu1 %v27629_v57  ;;  %v12369_v15 = vsel %vm722_vm2, %v27750_v55, 0 }
0x1177   :  { %25536 = vmatpush3.bf16.msra.mxu1 %v27596_v59  ;;  %24302 = vmatprep.mubr.f32.mxu1 %v10175_v33  ;;  %v11400_v59 = vsub.f32 %v27651_v8, %v11399_v58  ;;  %v11362_v50 = vsub.f32 %v27672_v18, %v11361_v19  ;;  %v11408_v33 = vand.u32 4294901760, %v11407_v47  ;;  %v11254_v8 = vpop.f32.mrb[19].mxu0  ;;  %v12375_v17 = vand.u32 4294901760, %v12369_v15 }
0x1178   :  { %25538 = vmatprep.subr.bf16.mxu1 %v27599_v60  ;;  %v11983_v22 = vand.u32 4294901760, %v27757_v29 }
0x1179   :  { %v11401_v43 = vand.u32 4294901760, %v11400_v59  ;;  %v11363_v37 = vand.u32 4294901760, %v11362_v50  ;;  %v25601_v45 = vpack.c.bf16 %v11415_v34, %v11408_v33 }
0x117a   :  { %v11984_v59 = vsub.f32 %v27757_v29, %v11983_v22 }
0x117b   :  { %25540 = vmatpush3.bf16.msra.mxu1 %v27599_v60  ;;  %v11372_v60 = vsub.f32 %v27683_v23, %v11371_v40  ;;  %v25597_v53 = vpack.c.bf16 %v11401_v43, %v11394_v41 }
0x117c   :  { %25590 = vmatprep.subr.bf16.mxu1 %v27677_v36 }
0x117e   :  { %24303 = vmatmul.mubr.f32.vlgmr.msra.gmra.mrb[20].mxu1 %v27629_v57  ;;  %v11373_v57 = vand.u32 4294901760, %v11372_v60 }
0x117f   :  { %25592 = vmatpush3.bf16.msra.mxu1 %v27677_v36  ;;  %24397 = vmatprep.mubr.f32.mxu1 %v11353_v35  ;;  %v11985_v35 = vand.u32 4294901760, %v11984_v59 }
0x1180   :  { %25594 = vmatprep.subr.bf16.mxu1 %v27699_v32 }
0x1183   :  { %25596 = vmatpush3.bf16.msra.mxu1 %v27699_v32 }
0x1184   :  { %25598 = vmatprep.subr.bf16.mxu1 %v25597_v53 }
0x1186   :  { %24398 = vmatmul.mubr.f32.vlgmr.msra.gmra.mrb[22].mxu1 %v11363_v37 }
0x1187   :  { %25600 = vmatpush3.bf16.msra.mxu1 %v25597_v53  ;;  %24400 = vmatprep.mubr.f32.mxu1 %v11373_v57 }
0x1188   :  { %25602 = vmatprep.subr.bf16.mxu1 %v25601_v45 }
0x118a   :  { %24401 = vmatmul.mubr.f32.gmra.mrb[24].mxu1 %v11383_v49 }
0x118b   :  { %25604 = vmatpush3.bf16.msra.mxu1 %v25601_v45  ;;  %24411 = vmatprep.mubr.f32.mxu1 %v27639_v38 }
0x118c   :  { %25606 = vmatprep.subr.bf16.mxu1 %v25605_v4 }
0x118e   :  { %24412 = vmatmul.mubr.f32.vlgmr.msra.gmra.mrb[22].mxu1 %v27655_v11 }
0x118f   :  { %25608 = vmatpush3.bf16.msra.mxu1 %v25605_v4  ;;  %24414 = vmatprep.mubr.f32.mxu1 %v27659_v13 }
0x1190   :  { %25610 = vmatprep.subr.bf16.mxu1 %v25609_v5 }
0x1192   :  { %24415 = vmatmul.mubr.f32.gmra.mrb[24].mxu1 %v27674_v20 }
0x1193   :  { %25612 = vmatpush3.bf16.msra.mxu1 %v25609_v5  ;;  %24425 = vmatprep.mubr.f32.mxu1 %v27644_v46  ;;  %v11907_v46 = vand.u32 4294901760, %v11901_v3 }
0x1194   :  { %25614 = vmatprep.subr.bf16.mxu1 %v27677_v36 }
0x1195   :  { %v27752_v9 = vsub.f32 %v11901_v3, %v11907_v46  ;;  %v27763_v58 = vpack.c.bf16 %v11907_v46, %v11904_v7  ;;  %v11267_v3 = vrot.slane %v27732_v61, %v11266_v42 }
0x1196   :  { %24426 = vmatmul.mubr.f32.vlgmr.msra.gmra.mrb[22].mxu1 %v27672_v18 }
0x1197   :  { %25616 = vmatpush3.bf16.msra.mxu1 %v27677_v36  ;;  %24428 = vmatprep.mubr.f32.mxu1 %v27683_v23  ;;  %v12457_v23 = vsub.f32 %v12369_v15, %v12375_v17  ;;  %v25644_v25 = vpack.c.bf16 %v27752_v9, %v27757_v29 }
0x1198   :  { %25618 = vmatprep.subr.bf16.mxu1 %v27699_v32  ;;  %25639 = vmatpush3.bf16.xpose.msra.mxu0 %v27763_v58 }
0x1199   :  { %25640 = vmatprep.subr.bf16.mxu0 %v26840_v21 }
0x119a   :  { %24429 = vmatmul.mubr.f32.gmra.mrb[24].mxu1 %v27696_v30  ;;  %v12458_v30 = vand.u32 4294901760, %v12457_v23 }
0x119b   :  { %25620 = vmatpush3.bf16.msra.mxu1 %v27699_v32  ;;  %24439 = vmatprep.mubr.f32.mxu1 %v11351_v12  ;;  %v27755_v12 = vadd.f32 %v11254_v8, %v10637_v63 }
0x119c   :  { %25622 = vmatprep.subr.bf16.mxu1 %v25621_v39 }
0x119d   :  { %v12366_v31 = vsel %vm722_vm2, %v27755_v12, 0 }
0x119e   :  { %24440 = vmatmul.mubr.f32.vlgmr.msra.gmra.mrb[22].mxu1 %v11361_v19  ;;  %v12372_v18 = vand.u32 4294901760, %v12366_v31 }
0x119f   :  { %25624 = vmatpush3.bf16.msra.mxu1 %v25621_v39  ;;  %24442 = vmatprep.mubr.f32.mxu1 %v11371_v40 }
0x11a0   :  { %25626 = vmatprep.subr.bf16.mxu1 %v25625_v62  ;;  %v12450_v6 = vsub.f32 %v12366_v31, %v12372_v18  ;;  %v25656_v47 = vpack.c.bf16 %v12375_v17, %v12372_v18 }
0x11a2   :  { %24443 = vmatmul.mubr.f32.gmra.mrb[24].mxu1 %v11381_v51  ;;  %v12451_v19 = vand.u32 4294901760, %v12450_v6  ;;  %v25662_v43 = vpack.c.bf16 %v12457_v23, %v12450_v6 }
0x11a3   :  { %25628 = vmatpush3.bf16.msra.mxu1 %v25625_v62  ;;  %24453 = vmatprep.mubr.f32.mxu1 %v27639_v38 }
0x11a4   :  { %25630 = vmatprep.subr.bf16.mxu1 %v27677_v36  ;;  %v25668_v60 = vpack.c.bf16 %v12458_v30, %v12451_v19 }
0x11a6   :  { %24454 = vmatmul.mubr.f32.vlgmr.msra.gmra.mrb[22].mxu1 %v27655_v11 }
0x11a7   :  { %25632 = vmatpush3.bf16.msra.mxu1 %v27677_v36  ;;  %24456 = vmatprep.mubr.f32.mxu1 %v27659_v13  ;;  %v11990_v36 = vand.u32 4294901760, %v27752_v9 }
0x11a8   :  { %25634 = vmatprep.subr.bf16.mxu1 %v27699_v32 }
0x11a9   :  { %v11991_v24 = vsub.f32 %v27752_v9, %v11990_v36  ;;  %v25650_v40 = vpack.c.bf16 %v11990_v36, %v11983_v22 }
0x11aa   :  { %24457 = vmatmul.mubr.f32.gmra.mrb[24].mxu1 %v27674_v20 }
0x11ab   :  { %25636 = vmatpush3.bf16.msra.mxu1 %v27699_v32  ;;  %24467 = vmatprep.mubr.f32.mxu1 %v27639_v38  ;;  %v11992_v41 = vand.u32 4294901760, %v11991_v24  ;;  %v12452_v32 = vsub.f32 %v12450_v6, %v12451_v19  ;;  %v12459_v38 = vsub.f32 %v12457_v23, %v12458_v30 }
0x11ac   :  { %25655 = vmatprep.subr.bf16.mxu1 %v26840_v21 }
0x11ad   :  { %v25641_v48 = vpack.c.bf16 %v11992_v41, %v11985_v35  ;;  %v12453_v50 = vand.u32 4294901760, %v12452_v32  ;;  %v12460_v51 = vand.u32 4294901760, %v12459_v38 }
0x11ae   :  { %24468 = vmatmul.mubr.f32.vlgmr.msra.gmra.mrb[22].mxu1 %v27655_v11  ;;  %v10099_v11 = vrot.slane %v27732_v61, %v171_v54 }
0x11af   :  { %24470 = vmatprep.mubr.f32.mxu1 %v27659_v13  ;;  %v25659_v53 = vpack.c.bf16 %v12460_v51, %v12453_v50 }
0x11b2   :  { %24471 = vmatmul.mubr.f32.gmra.mrb[24].mxu1 %v27674_v20 }
0x11b3   :  { %24519 = vmatprep.mubr.msk.f32.mxu1 %vm26828_vm1, %v26827_v16 }
0x11b4   :  { %25657 = vmatpush3.bf16.xpose.msra.mxu1 %v25656_v47 }
0x11b5   :  { %25658 = vmatprep.subr.bf16.mxu1 %v26840_v21 }
0x1251   :  { %v24304_v13 = vpop.f32.mrb[20].mxu1 }
0x1252   :  { %v27789_v33 = vadd.f32 %v24304_v13, %v10099_v11  ;;  %v10624_v34 = vpop.f32.mrb[21].mxu1 }
0x1253   :  { %v27791_v37 = vadd.f32 %v10624_v34, %v10099_v11 }
0x1254   :  { %v12363_v20 = vsel %vm722_vm2, %v27789_v33, 0 }
0x1255   :  { %v27795_v44 = vand.u32 4294901760, %v12363_v20  ;;  %v11895_v57 = vsel %vm722_vm2, %v27791_v37, 0 }
0x1256   :  { %v27799_v45 = vand.u32 4294901760, %v11895_v57 }
0x1257   :  { %v12439_v49 = vsub.f32 %v12363_v20, %v27795_v44 }
0x1258   :  { %v11971_v54 = vsub.f32 %v11895_v57, %v27799_v45 }
0x1259   :  { %v12440_v4 = vand.u32 4294901760, %v12439_v49 }
0x125a   :  { %v11972_v5 = vand.u32 4294901760, %v11971_v54 }
0x125b   :  { %v12441_v39 = vsub.f32 %v12439_v49, %v12440_v4 }
0x125c   :  { %v11973_v62 = vsub.f32 %v11971_v54, %v11972_v5 }
0x125d   :  { %v12442_v63 = vand.u32 4294901760, %v12441_v39 }
0x125e   :  { %v11974_v0 = vand.u32 4294901760, %v11973_v62 }
0x125f   :  { %24520 = vmatmul.mubr.f32.vlgmr.msra.gmra.mrb[26].mxu1 %v12442_v63 }
0x1260   :  { %25660 = vmatpush3.bf16.xpose.msra.mxu1 %v25659_v53  ;;  %24478 = vmatmul.mubr.f32.vlgmr.msra.gmra.mrb[20].mxu0 %v11974_v0 }
0x1261   :  { %25642 = vmatpush3.bf16.xpose.msra.mxu0 %v25641_v48  ;;  %24526 = vmatprep.mubr.msk.f32.mxu1 %vm26828_vm1, %v26827_v16 }
0x1262   :  { %25661 = vmatprep.subr.bf16.mxu1 %v26840_v21  ;;  %24484 = vmatprep.mubr.msk.f32.mxu0 %vm26828_vm1, %v26827_v16 }
0x1263   :  { %25643 = vmatprep.subr.bf16.mxu0 %v26840_v21 }
0x1267   :  { %24527 = vmatmul.mubr.f32.vlgmr.msra.gmra.mrb[26].mxu1 %v27795_v44 }
0x1268   :  { %25663 = vmatpush3.bf16.xpose.msra.mxu1 %v25662_v43  ;;  %24485 = vmatmul.mubr.f32.vlgmr.msra.gmra.mrb[20].mxu0 %v27799_v45 }
0x1269   :  { %25645 = vmatpush3.bf16.xpose.msra.mxu0 %v25644_v25  ;;  %24533 = vmatprep.mubr.msk.f32.mxu1 %vm26828_vm1, %v26827_v16 }
0x126a   :  { %25664 = vmatprep.subr.bf16.mxu1 %v26840_v21  ;;  %24491 = vmatprep.mubr.msk.f32.mxu0 %vm26828_vm1, %v26827_v16 }
0x126b   :  { %25646 = vmatprep.subr.bf16.mxu0 %v26840_v21 }
0x126f   :  { %24534 = vmatmul.mubr.f32.vlgmr.msra.gmra.mrb[26].mxu1 %v12439_v49 }
0x1270   :  { %25666 = vmatpush3.bf16.xpose.msra.mxu1 %v25656_v47  ;;  %24492 = vmatmul.mubr.f32.vlgmr.msra.gmra.mrb[20].mxu0 %v11971_v54 }
0x1271   :  { %25648 = vmatpush3.bf16.xpose.msra.mxu0 %v27763_v58  ;;  %24540 = vmatprep.mubr.msk.f32.mxu1 %vm26828_vm1, %v26827_v16 }
0x1272   :  { %25667 = vmatprep.subr.bf16.mxu1 %v26840_v21  ;;  %24498 = vmatprep.mubr.msk.f32.mxu0 %vm26828_vm1, %v26827_v16 }
0x1273   :  { %25649 = vmatprep.subr.bf16.mxu0 %v26840_v21 }
0x1277   :  { %24541 = vmatmul.mubr.f32.vlgmr.msra.gmra.mrb[26].mxu1 %v12440_v4 }
0x1278   :  { %25669 = vmatpush3.bf16.xpose.msra.mxu1 %v25668_v60  ;;  %24499 = vmatmul.mubr.f32.vlgmr.msra.gmra.mrb[20].mxu0 %v11972_v5 }
0x1279   :  { %25651 = vmatpush3.bf16.xpose.msra.mxu0 %v25650_v40  ;;  %24547 = vmatprep.mubr.msk.f32.mxu1 %vm26828_vm1, %v26827_v16 }
0x127a   :  { %25670 = vmatprep.subr.bf16.mxu1 %v26840_v21  ;;  %24505 = vmatprep.mubr.msk.f32.mxu0 %vm26828_vm1, %v26827_v16 }
0x127b   :  { %25652 = vmatprep.subr.bf16.mxu0 %v26840_v21 }
0x127f   :  { %24548 = vmatmul.mubr.f32.vlgmr.msra.gmra.mrb[26].mxu1 %v27795_v44 }
0x1280   :  { %25672 = vmatpush3.bf16.xpose.msra.mxu1 %v25656_v47  ;;  %24506 = vmatmul.mubr.f32.vlgmr.msra.gmra.mrb[20].mxu0 %v27799_v45 }
0x1281   :  { %25654 = vmatpush3.bf16.xpose.msra.mxu0 %v27763_v58  ;;  %24554 = vmatprep.mubr.msk.f32.mxu1 %vm26828_vm1, %v26827_v16  ;;  %v24469_v46 = vpop.f32.mrb[22].mxu1 }
0x1282   :  { %24512 = vmatprep.mubr.msk.f32.mxu0 %vm26828_vm1, %v26827_v16  ;;  %v27841_v27 = vadd.f32 %v24469_v46, %v11267_v3  ;;  %v11872_v26 = vpop.f32.mrb[23].mxu1  ;;  %25673 = vmatprep.subr.bf16.mxu0 %v26840_v21 }
0x1283   :  { %v27844_v61 = vadd.f32 %v11872_v26, %v11267_v3  ;;  %25691 = vmatprep.subr.bf16.mxu1 %v26840_v21 }
0x1284   :  { %v12862_v7 = vand.u32 4294901760, %v27841_v27 }
0x1285   :  { %v24472_v8 = vpop.f32.mrb[24].mxu1  ;;  %v12859_v9 = vand.u32 4294901760, %v27844_v61 }
0x1286   :  { %v27849_v29 = vadd.f32 %v24472_v8, %v11267_v3  ;;  %v11884_v15 = vpop.f32.mrb[25].mxu1  ;;  %v27852_v58 = vsub.f32 %v27841_v27, %v12862_v7 }
0x1287   :  { %24555 = vmatmul.mubr.f32.vlgmr.msra.gmra.mrb[26].mxu1 %v27795_v44  ;;  %v27855_v17 = vadd.f32 %v11884_v15, %v11267_v3  ;;  %v27857_v31 = vpack.c.bf16 %v12862_v7, %v12859_v9  ;;  %v27860_v18 = vsub.f32 %v27844_v61, %v12859_v9 }
0x1288   :  { %24513 = vmatmul.mubr.f32.vlgmr.msra.gmra.mrb[20].mxu0 %v27799_v45  ;;  %v13324_v22 = vand.u32 4294901760, %v27849_v29  ;;  %24603 = vmatprep.mubr.msk.f32.mxu1 %vm26828_vm1, %v26827_v16  ;;  %v12945_v36 = vand.u32 4294901760, %v27852_v58 }
0x1289   :  { %25675 = vmatpush3.bf16.msra.mxu0 %v27857_v31  ;;  %v13321_v23 = vand.u32 4294901760, %v27855_v17  ;;  %24561 = vmatprep.mubr.msk.f32.mxu0 %vm26828_vm1, %v26827_v16  ;;  %v12938_v6 = vand.u32 4294901760, %v27860_v18  ;;  %v25680_v59 = vpack.c.bf16 %v27852_v58, %v27860_v18 }
0x128a   :  { %v27875_v24 = vsub.f32 %v27849_v29, %v13324_v22  ;;  %25676 = vmatprep.subr.bf16.mxu0 %v26840_v21  ;;  %v12946_v25 = vsub.f32 %v27852_v58, %v12945_v36 }
0x128b   :  { %v27879_v19 = vpack.c.bf16 %v13324_v22, %v13321_v23  ;;  %v27882_v30 = vsub.f32 %v27855_v17, %v13321_v23  ;;  %v12939_v35 = vsub.f32 %v27860_v18, %v12938_v6  ;;  %v27885_v40 = vpack.c.bf16 %v12945_v36, %v12938_v6 }
0x128c   :  { %v13407_v41 = vand.u32 4294901760, %v27875_v24  ;;  %v12947_v32 = vand.u32 4294901760, %v12946_v25 }
0x128d   :  { %25693 = vmatpush3.bf16.msra.mxu1 %v27879_v19  ;;  %v13400_v38 = vand.u32 4294901760, %v27882_v30  ;;  %v12940_v43 = vand.u32 4294901760, %v12939_v35  ;;  %v25698_v47 = vpack.c.bf16 %v27875_v24, %v27882_v30 }
0x128e   :  { %25694 = vmatprep.subr.bf16.mxu1 %v26840_v21  ;;  %v13408_v48 = vsub.f32 %v27875_v24, %v13407_v41 }
0x128f   :  { %v13401_v50 = vsub.f32 %v27882_v30, %v13400_v38  ;;  %v25677_v51 = vpack.c.bf16 %v12947_v32, %v12940_v43  ;;  %v27895_v60 = vpack.c.bf16 %v13407_v41, %v13400_v38 }
0x1290   :  { %v13409_v53 = vand.u32 4294901760, %v13408_v48 }
0x1291   :  { %v13402_v11 = vand.u32 4294901760, %v13401_v50 }
0x1293   :  { %v25695_v13 = vpack.c.bf16 %v13409_v53, %v13402_v11 }
0x135a   :  { %v12826_v34 = vpop.f32.mrb[26].mxu1 }
0x135b   :  { %v12831_v20 = vmul.f32 0.35355338, %v12826_v34  ;;  %v12358_v44 = vpop.f32.mrb[20].mxu0  ;;  %v24556_v57 = vpop.f32.mrb[27].mxu1 }
0x135c   :  { %v12830_v45 = vmul.f32 0.35355338, %v12358_v44  ;;  %v24514_v49 = vpop.f32.mrb[21].mxu0 }
0x135d   :  { %v12836_v54 = vsel %vm12832_vm3, %v12831_v20, -inf }
0x135e   :  { %12837 = vmax.xlane.f32.xlu1 %v12836_v54  ;;  %v12833_v4 = vsel %vm12832_vm3, %v12830_v45, -inf }
0x135f   :  { %12834 = vmax.xlane.f32.xlu0 %v12833_v4 }
0x13eb   :  { %v12838_v5 = vpop.xlane.xlu1 %12837 }
0x13ec   :  { %v12840_v39 = vsub.f32 %v12831_v20, %v12838_v5  ;;  %v12835_v62 = vpop.xlane.xlu0 %12834 }
0x13ed   :  { %v12839_v63 = vsub.f32 %v12830_v45, %v12835_v62 }
0x13ee   :  { %v12843_v0 = vmul.f32 1.442695, %v12840_v39 }
0x13ef   :  { %v12841_v3 = vmul.f32 1.442695, %v12839_v63 }
0x13f0   :  { %26639 = vpow2.f32 %v12843_v0 }
0x13f1   :  { %26641 = vpow2.f32 %v12841_v3 }
0x13fa   :  { %v26640_v46 = vpop.eup %26639 }
0x13fb   :  { %v26642_v26 = vpop.eup %26641  ;;  %v12848_v7 = vsel %vm12832_vm3, %v26640_v46, 0.0 }
0x13fc   :  { %12849 = vadd.xlane.f32.xlu1 %v12848_v7  ;;  %v12845_v8 = vsel %vm12832_vm3, %v26642_v26, 0.0 }
0x13fd   :  { %12846 = vadd.xlane.f32.xlu0 %v12845_v8 }
0x140d   :  { %13783 = vrot.lane.b32.xlu1 %v27740_v1, %s26830_s10 }
0x1411   :  { %13779 = vrot.lane.b32.xlu1 %v27791_v37, %s26830_s10 }
0x1413   :  { %13781 = vrot.lane.b32.xlu0 %v27742_v2, %s26830_s10 }
0x1415   :  { %14252 = vrot.lane.b32.xlu1 %v27755_v12, %s26830_s10 }
0x1417   :  { %14254 = vrot.lane.b32.xlu0 %v27750_v55, %s26830_s10 }
0x1419   :  { %14250 = vrot.lane.b32.xlu1 %v27789_v33, %s26830_s10 }
0x1489   :  { %v12850_v9 = vpop.xlane.xlu1 %12849 }
0x148a   :  { %26643 = vrcp.f32 %v12850_v9  ;;  %v12847_v15 = vpop.xlane.xlu0 %12846 }
0x148b   :  { %26645 = vrcp.f32 %v12847_v15 }
0x148d   :  { %v13784_v44 = vpop.permute.xlu1 %13783 }
0x148e   :  { %v13782_v24 = vpop.permute.xlu0 %13781 }
0x1492   :  { %v14255_v58 = vpop.permute.xlu0 %14254 }
0x1493   :  { %v14260_v57 = vsel %vm722_vm2, %v14255_v58, 0 }
0x1494   :  { %v26644_v22 = vpop.eup %26643  ;;  %v14266_v5 = vand.u32 4294901760, %v14260_v57 }
0x1495   :  { %v26646_v36 = vpop.eup %26645  ;;  %v12854_v23 = vmul.f32 %v26644_v22, %v26640_v46 }
0x1496   :  { %v12853_v6 = vmul.f32 %v26646_v36, %v26642_v26  ;;  %v27977_v3 = vsub.f32 %v14260_v57, %v14266_v5 }
0x1497   :  { %v13318_v25 = vsel %vm12832_vm3, %v12854_v23, 0 }
0x1498   :  { %v27914_v35 = vand.u32 4294901760, %v13318_v25  ;;  %v12856_v41 = vsel %vm12832_vm3, %v12853_v6, 0  ;;  %v14349_v9 = vand.u32 4294901760, %v27977_v3 }
0x1499   :  { %v27917_v32 = vand.u32 4294901760, %v12856_v41 }
0x149a   :  { %v13388_v38 = vsub.f32 %v13318_v25, %v27914_v35 }
0x149b   :  { %v12926_v48 = vsub.f32 %v12856_v41, %v27917_v32  ;;  %v14350_v41 = vsub.f32 %v27977_v3, %v14349_v9 }
0x149c   :  { %v13389_v43 = vand.u32 4294901760, %v13388_v38 }
0x149d   :  { %v12927_v53 = vand.u32 4294901760, %v12926_v48 }
0x149e   :  { %v13390_v50 = vsub.f32 %v13388_v38, %v13389_v43 }
0x149f   :  { %v12928_v34 = vsub.f32 %v12926_v48, %v12927_v53 }
0x14a0   :  { %v13391_v11 = vand.u32 4294901760, %v13390_v50 }
0x14a1   :  { %v12929_v20 = vand.u32 4294901760, %v12928_v34 }
0x14a2   :  { %24604 = vmatmul.mubr.f32.vlgmr.msra.gmra.mrb[28].mxu1 %v13391_v11 }
0x14a3   :  { %25696 = vmatpush3.bf16.msra.mxu1 %v25695_v13  ;;  %24610 = vmatprep.mubr.msk.f32.mxu1 %vm26828_vm1, %v26827_v16  ;;  %v13787_v13 = vsel %vm722_vm2, %v13782_v24, 0 }
0x14a4   :  { %24562 = vmatmul.mubr.f32.vlgmr.msra.gmra.mrb[22].mxu0 %v12929_v20  ;;  %25697 = vmatprep.subr.bf16.mxu1 %v26840_v21  ;;  %v13792_v54 = vand.u32 4294901760, %v13787_v13 }
0x14a5   :  { %25678 = vmatpush3.bf16.msra.mxu0 %v25677_v51  ;;  %24568 = vmatprep.mubr.msk.f32.mxu0 %vm26828_vm1, %v26827_v16  ;;  %v13780_v51 = vpop.permute.xlu1 %13779 }
0x14a6   :  { %25679 = vmatprep.subr.bf16.mxu0 %v26840_v21  ;;  %v13785_v4 = vsel %vm722_vm2, %v13780_v51, 0  ;;  %v27975_v0 = vsub.f32 %v13787_v13, %v13792_v54 }
0x14a8   :  { %v13871_v8 = vand.u32 4294901760, %v27975_v0 }
0x14a9   :  { %v14253_v30 = vpop.permute.xlu1 %14252 }
0x14aa   :  { %24611 = vmatmul.mubr.f32.vlgmr.msra.gmra.mrb[28].mxu1 %v27914_v35  ;;  %v14258_v18 = vsel %vm722_vm2, %v14253_v30, 0  ;;  %v13872_v25 = vsub.f32 %v27975_v0, %v13871_v8 }
0x14ab   :  { %25699 = vmatpush3.bf16.msra.mxu1 %v25698_v47  ;;  %24617 = vmatprep.mubr.msk.f32.mxu1 %vm26828_vm1, %v26827_v16  ;;  %v13789_v47 = vsel %vm722_vm2, %v13784_v44, 0  ;;  %v14263_v45 = vand.u32 4294901760, %v14258_v18 }
0x14ac   :  { %24569 = vmatmul.mubr.f32.vlgmr.msra.gmra.mrb[22].mxu0 %v27917_v32  ;;  %25700 = vmatprep.subr.bf16.mxu1 %v26840_v21  ;;  %v13795_v49 = vand.u32 4294901760, %v13789_v47  ;;  %v13873_v50 = vand.u32 4294901760, %v13872_v25 }
0x14ad   :  { %25681 = vmatpush3.bf16.msra.mxu0 %v25680_v59  ;;  %24575 = vmatprep.mubr.msk.f32.mxu0 %vm26828_vm1, %v26827_v16  ;;  %v14251_v59 = vpop.permute.xlu1 %14250  ;;  %v27965_v62 = vsub.f32 %v14258_v18, %v14263_v45  ;;  %v25728_v22 = vpack.c.bf16 %v14266_v5, %v14263_v45 }
0x14ae   :  { %25682 = vmatprep.subr.bf16.mxu0 %v26840_v21  ;;  %v27973_v63 = vsub.f32 %v13789_v47, %v13795_v49 }
0x14af   :  { %v25734_v44 = vpack.c.bf16 %v27977_v3, %v27965_v62 }
0x14b0   :  { %v13878_v7 = vand.u32 4294901760, %v27973_v63  ;;  %v25716_v51 = vpack.c.bf16 %v27973_v63, %v27975_v0 }
0x14b2   :  { %24618 = vmatmul.mubr.f32.vlgmr.msra.gmra.mrb[28].mxu1 %v13388_v38  ;;  %v13879_v6 = vsub.f32 %v27973_v63, %v13878_v7  ;;  %v25722_v30 = vpack.c.bf16 %v13878_v7, %v13871_v8 }
0x14b3   :  { %25702 = vmatpush3.bf16.msra.mxu1 %v27879_v19  ;;  %24624 = vmatprep.mubr.msk.f32.mxu1 %vm26828_vm1, %v26827_v16 }
0x14b4   :  { %24576 = vmatmul.mubr.f32.vlgmr.msra.gmra.mrb[22].mxu0 %v12926_v48  ;;  %25703 = vmatprep.subr.bf16.mxu1 %v26840_v21  ;;  %v13880_v48 = vand.u32 4294901760, %v13879_v6 }
0x14b5   :  { %25684 = vmatpush3.bf16.msra.mxu0 %v27857_v31  ;;  %24582 = vmatprep.mubr.msk.f32.mxu0 %vm26828_vm1, %v26827_v16 }
0x14b6   :  { %25685 = vmatprep.subr.bf16.mxu0 %v26840_v21 }
0x14ba   :  { %24625 = vmatmul.mubr.f32.vlgmr.msra.gmra.mrb[28].mxu1 %v13389_v43 }
0x14bb   :  { %25705 = vmatpush3.bf16.msra.mxu1 %v27895_v60  ;;  %24631 = vmatprep.mubr.msk.f32.mxu1 %vm26828_vm1, %v26827_v16  ;;  %v14256_v60 = vsel %vm722_vm2, %v14251_v59, 0 }
0x14bc   :  { %24583 = vmatmul.mubr.f32.vlgmr.msra.gmra.mrb[22].mxu0 %v12927_v53  ;;  %25706 = vmatprep.subr.bf16.mxu1 %v26840_v21  ;;  %v27963_v39 = vand.u32 4294901760, %v14256_v60  ;;  %v14351_v53 = vand.u32 4294901760, %v14350_v41 }
0x14bd   :  { %25687 = vmatpush3.bf16.msra.mxu0 %v27885_v40  ;;  %24589 = vmatprep.mubr.msk.f32.mxu0 %vm26828_vm1, %v26827_v16  ;;  %v27968_v40 = vand.u32 4294901760, %v13785_v4 }
0x14be   :  { %25688 = vmatprep.subr.bf16.mxu0 %v26840_v21  ;;  %v14330_v46 = vsub.f32 %v14256_v60, %v27963_v39 }
0x14bf   :  { %v13859_v26 = vsub.f32 %v13785_v4, %v27968_v40 }
0x14c0   :  { %v14331_v15 = vand.u32 4294901760, %v14330_v46 }
0x14c1   :  { %v13860_v23 = vand.u32 4294901760, %v13859_v26 }
0x14c2   :  { %24632 = vmatmul.mubr.f32.vlgmr.msra.gmra.mrb[28].mxu1 %v27914_v35  ;;  %v14332_v38 = vsub.f32 %v14330_v46, %v14331_v15 }
0x14c3   :  { %25708 = vmatpush3.bf16.msra.mxu1 %v27879_v19  ;;  %24638 = vmatprep.mubr.msk.f32.mxu1 %vm26828_vm1, %v26827_v16  ;;  %v14342_v19 = vand.u32 4294901760, %v27965_v62  ;;  %v13861_v43 = vsub.f32 %v13859_v26, %v13860_v23 }
0x14c4   :  { %24590 = vmatmul.mubr.f32.vlgmr.msra.gmra.mrb[22].mxu0 %v27917_v32  ;;  %25727 = vmatprep.subr.bf16.mxu1 %v26840_v21  ;;  %v14333_v11 = vand.u32 4294901760, %v14332_v38 }
0x14c5   :  { %25690 = vmatpush3.bf16.msra.mxu0 %v27857_v31  ;;  %24596 = vmatprep.mubr.msk.f32.mxu0 %vm26828_vm1, %v26827_v16  ;;  %v14343_v36 = vsub.f32 %v27965_v62, %v14342_v19  ;;  %v25710_v31 = vpack.c.bf16 %v13795_v49, %v13792_v54  ;;  %v13862_v20 = vand.u32 4294901760, %v13861_v43  ;;  %v25740_v24 = vpack.c.bf16 %v14349_v9, %v14342_v19 }
0x14c6   :  { %25709 = vmatprep.subr.bf16.mxu0 %v26840_v21 }
0x14ca   :  { %24639 = vmatmul.mubr.f32.vlgmr.msra.gmra.mrb[28].mxu1 %v27914_v35  ;;  %v14344_v35 = vand.u32 4294901760, %v14343_v36 }
0x14cb   :  { %24687 = vmatprep.mubr.msk.f32.mxu1 %vm26828_vm1, %v26827_v16 }
0x14cc   :  { %24597 = vmatmul.mubr.f32.vlgmr.msra.gmra.mrb[22].mxu0 %v27917_v32  ;;  %25729 = vmatpush3.bf16.xpose.msra.mxu1 %v25728_v22  ;;  %v25731_v34 = vpack.c.bf16 %v14351_v53, %v14344_v35  ;;  %v25713_v32 = vpack.c.bf16 %v13880_v48, %v13873_v50 }
0x14cd   :  { %24645 = vmatprep.mubr.msk.f32.mxu0 %vm26828_vm1, %v26827_v16  ;;  %25730 = vmatprep.subr.bf16.mxu1 %v26840_v21 }
0x14ce   :  { %25711 = vmatpush3.bf16.xpose.msra.mxu0 %v25710_v31 }
0x14cf   :  { %25712 = vmatprep.subr.bf16.mxu0 %v26840_v21 }
0x14d3   :  { %24688 = vmatmul.mubr.f32.vlgmr.msra.gmra.mrb[30].mxu1 %v14333_v11 }
0x14d4   :  { %25732 = vmatpush3.bf16.xpose.msra.mxu1 %v25731_v34  ;;  %24694 = vmatprep.mubr.msk.f32.mxu1 %vm26828_vm1, %v26827_v16 }
0x14d5   :  { %24646 = vmatmul.mubr.f32.vlgmr.msra.gmra.mrb[24].mxu0 %v13862_v20  ;;  %25733 = vmatprep.subr.bf16.mxu1 %v26840_v21 }
0x14d6   :  { %25714 = vmatpush3.bf16.xpose.msra.mxu0 %v25713_v32  ;;  %24652 = vmatprep.mubr.msk.f32.mxu0 %vm26828_vm1, %v26827_v16 }
0x14d7   :  { %25715 = vmatprep.subr.bf16.mxu0 %v26840_v21 }
0x14db   :  { %24695 = vmatmul.mubr.f32.vlgmr.msra.gmra.mrb[30].mxu1 %v27963_v39 }
0x14dc   :  { %25735 = vmatpush3.bf16.xpose.msra.mxu1 %v25734_v44  ;;  %24701 = vmatprep.mubr.msk.f32.mxu1 %vm26828_vm1, %v26827_v16 }
0x14dd   :  { %24653 = vmatmul.mubr.f32.vlgmr.msra.gmra.mrb[24].mxu0 %v27968_v40  ;;  %25736 = vmatprep.subr.bf16.mxu1 %v26840_v21 }
0x14de   :  { %25717 = vmatpush3.bf16.xpose.msra.mxu0 %v25716_v51  ;;  %24659 = vmatprep.mubr.msk.f32.mxu0 %vm26828_vm1, %v26827_v16 }
0x14df   :  { %25718 = vmatprep.subr.bf16.mxu0 %v26840_v21 }
0x14e3   :  { %24702 = vmatmul.mubr.f32.vlgmr.msra.gmra.mrb[30].mxu1 %v14330_v46 }
0x14e4   :  { %25738 = vmatpush3.bf16.xpose.msra.mxu1 %v25728_v22  ;;  %24708 = vmatprep.mubr.msk.f32.mxu1 %vm26828_vm1, %v26827_v16 }
0x14e5   :  { %24660 = vmatmul.mubr.f32.vlgmr.msra.gmra.mrb[24].mxu0 %v13859_v26  ;;  %25739 = vmatprep.subr.bf16.mxu1 %v26840_v21 }
0x14e6   :  { %25720 = vmatpush3.bf16.xpose.msra.mxu0 %v25710_v31  ;;  %24666 = vmatprep.mubr.msk.f32.mxu0 %vm26828_vm1, %v26827_v16 }
0x14e7   :  { %25721 = vmatprep.subr.bf16.mxu0 %v26840_v21 }
0x14eb   :  { %24709 = vmatmul.mubr.f32.vlgmr.msra.gmra.mrb[30].mxu1 %v14331_v15 }
0x14ec   :  { %25741 = vmatpush3.bf16.xpose.msra.mxu1 %v25740_v24  ;;  %24715 = vmatprep.mubr.msk.f32.mxu1 %vm26828_vm1, %v26827_v16 }
0x14ed   :  { %24667 = vmatmul.mubr.f32.vlgmr.msra.gmra.mrb[24].mxu0 %v13860_v23  ;;  %25742 = vmatprep.subr.bf16.mxu1 %v26840_v21 }
0x14ee   :  { %25723 = vmatpush3.bf16.xpose.msra.mxu0 %v25722_v30  ;;  %24673 = vmatprep.mubr.msk.f32.mxu0 %vm26828_vm1, %v26827_v16 }
0x14ef   :  { %25724 = vmatprep.subr.bf16.mxu0 %v26840_v21 }
0x14f3   :  { %24716 = vmatmul.mubr.f32.vlgmr.msra.gmra.mrb[30].mxu1 %v27963_v39 }
0x14f4   :  { %25744 = vmatpush3.bf16.xpose.msra.mxu1 %v25728_v22  ;;  %24722 = vmatprep.mubr.msk.f32.mxu1 %vm26828_vm1, %v26827_v16 }
0x14f5   :  { %24674 = vmatmul.mubr.f32.vlgmr.msra.gmra.mrb[24].mxu0 %v27968_v40  ;;  %25763 = vmatprep.subr.bf16.mxu1 %v26840_v21 }
0x14f6   :  { %25726 = vmatpush3.bf16.xpose.msra.mxu0 %v25710_v31  ;;  %24680 = vmatprep.mubr.msk.f32.mxu0 %vm26828_vm1, %v26827_v16 }
0x14f7   :  { %25745 = vmatprep.subr.bf16.mxu0 %v26840_v21 }
0x14fb   :  { %24723 = vmatmul.mubr.f32.vlgmr.msra.gmra.mrb[30].mxu1 %v27963_v39 }
0x14fc   :  { %24771 = vmatprep.mubr.msk.f32.mxu1 %vm26828_vm1, %v26827_v16 }
0x14fd   :  { %24681 = vmatmul.mubr.f32.vlgmr.msra.gmra.mrb[24].mxu0 %v27968_v40 }
0x14fe   :  { %24729 = vmatprep.mubr.msk.f32.mxu0 %vm26828_vm1, %v26827_v16 }
0x159d   :  { %v28047_v58 = vpop.f32.mrb[28].mxu1 }
0x159e   :  { %v24640_v18 = vpop.f32.mrb[29].mxu1 }
0x159f   :  { %v28049_v59 = vpop.f32.mrb[22].mxu0 }
0x15a0   :  { %v24598_v47 = vpop.f32.mrb[23].mxu0 }
0x15ce   :  { %v14717_v13 = vpop.f32.mrb[30].mxu1 }
0x15cf   :  { %v14722_v57 = vmul.f32 0.35355338, %v14717_v13  ;;  %v24724_v45 = vpop.f32.mrb[31].mxu1 }
0x15d0   :  { %v14246_v60 = vpop.f32.mrb[24].mxu0 }
0x15d1   :  { %v14721_v49 = vmul.f32 0.35355338, %v14246_v60  ;;  %v24682_v54 = vpop.f32.mrb[25].mxu0  ;;  %v14726_v4 = vsel %vm12832_vm3, %v14722_v57, -inf }
0x15d2   :  { %14727 = vmax.xlane.f32.xlu1 %v14726_v4 }
0x15d3   :  { %v14723_v5 = vsel %vm12832_vm3, %v14721_v49, -inf }
0x15d4   :  { %14724 = vmax.xlane.f32.xlu0 %v14723_v5 }
0x15e3   :  { %14749 = vrot.lane.b32.xlu1 %v27841_v27, %s26830_s10 }
0x15e7   :  { %15217 = vrot.lane.b32.xlu1 %v27855_v17, %s26830_s10 }
0x15eb   :  { %15219 = vrot.lane.b32.xlu1 %v27849_v29, %s26830_s10 }
0x15ef   :  { %16679 = vrot.lane.b32.xlu1 %v27740_v1, %s26835_s18 }
0x15f3   :  { %17148 = vrot.lane.b32.xlu1 %v27755_v12, %s26835_s18 }
0x15f7   :  { %17146 = vrot.lane.b32.xlu1 %v27789_v33, %s26835_s18 }
0x165f   :  { %v14728_v39 = vpop.xlane.xlu1 %14727 }
0x1660   :  { %v14730_v62 = vsub.f32 %v14722_v57, %v14728_v39 }
0x1661   :  { %v14725_v40 = vpop.xlane.xlu0 %14724 }
0x1662   :  { %v14733_v63 = vmul.f32 1.442695, %v14730_v62  ;;  %v14729_v0 = vsub.f32 %v14721_v49, %v14725_v40 }
0x1663   :  { %v14750_v3 = vpop.permute.xlu1 %14749 }
0x1664   :  { %26647 = vpow2.f32 %v14733_v63  ;;  %v14731_v46 = vmul.f32 1.442695, %v14729_v0  ;;  %v14760_v44 = vand.u32 4294901760, %v14750_v3 }
0x1666   :  { %26649 = vpow2.f32 %v14731_v46  ;;  %v14842_v13 = vsub.f32 %v14750_v3, %v14760_v44 }
0x1667   :  { %v15218_v19 = vpop.permute.xlu1 %15217 }
0x1668   :  { %v15227_v26 = vand.u32 4294901760, %v15218_v19  ;;  %v14843_v5 = vand.u32 4294901760, %v14842_v13 }
0x166a   :  { %v28065_v7 = vsub.f32 %v15218_v19, %v15227_v26  ;;  %v14844_v46 = vsub.f32 %v14842_v13, %v14843_v5 }
0x166b   :  { %v15220_v8 = vpop.permute.xlu1 %15219 }
0x166c   :  { %v15306_v9 = vand.u32 4294901760, %v28065_v7  ;;  %v15230_v15 = vand.u32 4294901760, %v15220_v8 }
0x166e   :  { %v26648_v22 = vpop.eup %26647  ;;  %v28068_v36 = vpack.c.bf16 %v15230_v15, %v15227_v26  ;;  %v28070_v31 = vsub.f32 %v15220_v8, %v15230_v15  ;;  %v15307_v25 = vsub.f32 %v28065_v7, %v15306_v9 }
0x166f   :  { %v14738_v23 = vsel %vm12832_vm3, %v26648_v22, 0.0 }
0x1670   :  { %v26650_v6 = vpop.eup %26649  ;;  %v15313_v41 = vand.u32 4294901760, %v28070_v31  ;;  %v25770_v38 = vpack.c.bf16 %v28070_v31, %v28065_v7  ;;  %25765 = vmatpush3.bf16.msra.mxu1 %v28068_v36  ;;  %14739 = vadd.xlane.f32.xlu0 %v14738_v23  ;;  %v15308_v50 = vand.u32 4294901760, %v15307_v25 }
0x1671   :  { %25766 = vmatprep.subr.bf16.mxu1 %v26840_v21  ;;  %v14735_v48 = vsel %vm12832_vm3, %v26650_v6, 0.0 }
0x1672   :  { %v15314_v35 = vsub.f32 %v28070_v31, %v15313_v41  ;;  %v28080_v43 = vpack.c.bf16 %v15313_v41, %v15306_v9  ;;  %v14845_v9 = vand.u32 4294901760, %v14844_v46 }
0x1674   :  { %v15315_v53 = vand.u32 4294901760, %v15314_v35  ;;  %14736 = vadd.xlane.f32.xlu0 %v14735_v48 }
0x1676   :  { %v25767_v11 = vpack.c.bf16 %v15315_v53, %v15308_v50 }
0x168a   :  { %14747 = vrot.lane.b32.xlu0 %v27844_v61, %s26830_s10 }
0x168e   :  { %16677 = vrot.lane.b32.xlu0 %v27742_v2, %s26835_s18 }
0x1692   :  { %16675 = vrot.lane.b32.xlu0 %v27791_v37, %s26835_s18 }
0x1696   :  { %17150 = vrot.lane.b32.xlu0 %v27750_v55, %s26835_s18 }
0x16fd   :  { %v14740_v34 = vpop.xlane.xlu0 %14739 }
0x16fe   :  { %26651 = vrcp.f32 %v14740_v34 }
0x1701   :  { %v14737_v20 = vpop.xlane.xlu0 %14736 }
0x1702   :  { %26653 = vrcp.f32 %v14737_v20 }
0x1705   :  { %v14748_v32 = vpop.permute.xlu0 %14747 }
0x1706   :  { %v14757_v51 = vand.u32 4294901760, %v14748_v32 }
0x1708   :  { %v26652_v24 = vpop.eup %26651  ;;  %v28091_v30 = vpack.c.bf16 %v14760_v44, %v14757_v51  ;;  %v14835_v47 = vsub.f32 %v14748_v32, %v14757_v51 }
0x1709   :  { %v14744_v18 = vmul.f32 %v26652_v24, %v26648_v22  ;;  %v16678_v23 = vpop.permute.xlu0 %16677 }
0x170a   :  { %25747 = vmatpush3.bf16.msra.mxu0 %v28091_v30  ;;  %v14836_v54 = vand.u32 4294901760, %v14835_v47  ;;  %v25752_v31 = vpack.c.bf16 %v14842_v13, %v14835_v47  ;;  %v16683_v25 = vsel %vm722_vm2, %v16678_v23, 0 }
0x170b   :  { %v15224_v57 = vsel %vm12832_vm3, %v14744_v18, 0  ;;  %25748 = vmatprep.subr.bf16.mxu0 %v26840_v21  ;;  %v16688_v48 = vand.u32 4294901760, %v16683_v25 }
0x170c   :  { %v26654_v45 = vpop.eup %26653  ;;  %v28096_v60 = vand.u32 4294901760, %v15224_v57  ;;  %v14837_v63 = vsub.f32 %v14835_v47, %v14836_v54  ;;  %v25758_v35 = vpack.c.bf16 %v14843_v5, %v14836_v54  ;;  %v134_v54 = vld [vmem:[#allocation8 + $0x88] sm:$0xff] }
0x170d   :  { %v14743_v49 = vmul.f32 %v26654_v45, %v26650_v6  ;;  %v16680_v6 = vpop.permute.xlu1 %16679  ;;  %v16676_v41 = vpop.permute.xlu0 %16675 }
0x170e   :  { %v15294_v4 = vsub.f32 %v15224_v57, %v28096_v60  ;;  %v14838_v7 = vand.u32 4294901760, %v14837_v63  ;;  %v16681_v50 = vsel %vm722_vm2, %v16676_v41, 0 }
0x170f   :  { %v14754_v39 = vsel %vm12832_vm3, %v14743_v49, 0 }
0x1710   :  { %v15295_v62 = vand.u32 4294901760, %v15294_v4  ;;  %v28100_v40 = vand.u32 4294901760, %v14754_v39  ;;  %v25749_v22 = vpack.c.bf16 %v14845_v9, %v14838_v7 }
0x1712   :  { %v15296_v0 = vsub.f32 %v15294_v4, %v15295_v62  ;;  %v14824_v3 = vsub.f32 %v14754_v39, %v28100_v40 }
0x1714   :  { %v15297_v19 = vand.u32 4294901760, %v15296_v0  ;;  %v14825_v26 = vand.u32 4294901760, %v14824_v3 }
0x1716   :  { %24772 = vmatmul.mubr.f32.vlgmr.msra.gmra.mrb[32].mxu1 %v15297_v19  ;;  %v14826_v8 = vsub.f32 %v14824_v3, %v14825_v26 }
0x1717   :  { %25768 = vmatpush3.bf16.msra.mxu1 %v25767_v11  ;;  %24778 = vmatprep.mubr.msk.f32.mxu1 %vm26828_vm1, %v26827_v16  ;;  %v16766_v11 = vsub.f32 %v16683_v25, %v16688_v48 }
0x1718   :  { %v14827_v15 = vand.u32 4294901760, %v14826_v8  ;;  %25769 = vmatprep.subr.bf16.mxu1 %v26840_v21 }
0x1719   :  { %v16767_v32 = vand.u32 4294901760, %v16766_v11 }
0x171a   :  { %24730 = vmatmul.mubr.f32.vlgmr.msra.gmra.mrb[26].mxu0 %v14827_v15 }
0x171b   :  { %25750 = vmatpush3.bf16.msra.mxu0 %v25749_v22  ;;  %24736 = vmatprep.mubr.msk.f32.mxu0 %vm26828_vm1, %v26827_v16  ;;  %v16768_v18 = vsub.f32 %v16766_v11, %v16767_v32 }
0x171c   :  { %25751 = vmatprep.subr.bf16.mxu0 %v26840_v21 }
0x171d   :  { %v16769_v13 = vand.u32 4294901760, %v16768_v18 }
0x171e   :  { %24779 = vmatmul.mubr.f32.vlgmr.msra.gmra.mrb[32].mxu1 %v28096_v60 }
0x171f   :  { %25771 = vmatpush3.bf16.msra.mxu1 %v25770_v38  ;;  %24785 = vmatprep.mubr.msk.f32.mxu1 %vm26828_vm1, %v26827_v16  ;;  %v16685_v38 = vsel %vm722_vm2, %v16680_v6, 0 }
0x1720   :  { %25772 = vmatprep.subr.bf16.mxu1 %v26840_v21  ;;  %v16691_v53 = vand.u32 4294901760, %v16685_v38 }
0x1722   :  { %24737 = vmatmul.mubr.f32.vlgmr.msra.gmra.mrb[26].mxu0 %v28100_v40  ;;  %v16773_v34 = vsub.f32 %v16685_v38, %v16691_v53  ;;  %v25782_v24 = vpack.c.bf16 %v16691_v53, %v16688_v48  ;;  %v133_v38 = vld [vmem:[#allocation8 + $0x80] sm:$0xff] }
0x1723   :  { %25753 = vmatpush3.bf16.msra.mxu0 %v25752_v31  ;;  %24743 = vmatprep.mubr.msk.f32.mxu0 %vm26828_vm1, %v26827_v16  ;;  %v16187_v48 = vand.u32 4294901760, %v133_v38 }
0x1724   :  { %25754 = vmatprep.subr.bf16.mxu0 %v26840_v21  ;;  %v16774_v44 = vand.u32 4294901760, %v16773_v34 }
0x1725   :  { %v16274_v53 = vsub.f32 %v133_v38, %v16187_v48 }
0x1726   :  { %24786 = vmatmul.mubr.f32.vlgmr.msra.gmra.mrb[32].mxu1 %v15294_v4  ;;  %v25794_v49 = vpack.c.bf16 %v16774_v44, %v16767_v32  ;;  %v15692_v4 = vand.u32 4294901760, %v134_v54 }
0x1727   :  { %25774 = vmatpush3.bf16.msra.mxu1 %v28068_v36  ;;  %24792 = vmatprep.mubr.msk.f32.mxu1 %vm26828_vm1, %v26827_v16 }
0x1728   :  { %25775 = vmatprep.subr.bf16.mxu1 %v26840_v21  ;;  %v15779_v5 = vsub.f32 %v134_v54, %v15692_v4 }
0x172a   :  { %24744 = vmatmul.mubr.f32.vlgmr.msra.gmra.mrb[26].mxu0 %v14824_v3  ;;  %v15780_v39 = vand.u32 4294901760, %v15779_v5 }
0x172b   :  { %25756 = vmatpush3.bf16.msra.mxu0 %v28091_v30  ;;  %24750 = vmatprep.mubr.msk.f32.mxu0 %vm26828_vm1, %v26827_v16 }
0x172c   :  { %25757 = vmatprep.subr.bf16.mxu0 %v26840_v21 }
0x172e   :  { %24793 = vmatmul.mubr.f32.vlgmr.msra.gmra.mrb[32].mxu1 %v15295_v62  ;;  %v15781_v62 = vsub.f32 %v15779_v5, %v15780_v39 }
0x172f   :  { %25777 = vmatpush3.bf16.msra.mxu1 %v28080_v43  ;;  %24799 = vmatprep.mubr.msk.f32.mxu1 %vm26828_vm1, %v26827_v16  ;;  %v16754_v43 = vand.u32 4294901760, %v16681_v50 }
0x1730   :  { %25778 = vmatprep.subr.bf16.mxu1 %v26840_v21 }
0x1731   :  { %v16755_v20 = vsub.f32 %v16681_v50, %v16754_v43 }
0x1732   :  { %24751 = vmatmul.mubr.f32.vlgmr.msra.gmra.mrb[26].mxu0 %v14825_v26 }
0x1733   :  { %25759 = vmatpush3.bf16.msra.mxu0 %v25758_v35  ;;  %24757 = vmatprep.mubr.msk.f32.mxu0 %vm26828_vm1, %v26827_v16  ;;  %v16756_v51 = vand.u32 4294901760, %v16755_v20  ;;  %v16181_v35 = vsel %vm722_vm2, %v28049_v59, 0 }
0x1734   :  { %25760 = vmatprep.subr.bf16.mxu0 %v26840_v21  ;;  %v16252_v50 = vand.u32 4294901760, %v16181_v35 }
0x1735   :  { %v16757_v47 = vsub.f32 %v16755_v20, %v16756_v51 }
0x1736   :  { %24800 = vmatmul.mubr.f32.vlgmr.msra.gmra.mrb[32].mxu1 %v28096_v60 }
0x1737   :  { %25780 = vmatpush3.bf16.msra.mxu1 %v28068_v36  ;;  %24806 = vmatprep.mubr.msk.f32.mxu1 %vm26828_vm1, %v26827_v16  ;;  %v16775_v36 = vsub.f32 %v16773_v34, %v16774_v44  ;;  %v16758_v57 = vand.u32 4294901760, %v16757_v47 }
0x1738   :  { %25781 = vmatprep.subr.bf16.mxu1 %v26840_v21 }
0x173a   :  { %24758 = vmatmul.mubr.f32.vlgmr.msra.gmra.mrb[26].mxu0 %v28100_v40 }
0x173b   :  { %25762 = vmatpush3.bf16.msra.mxu0 %v28091_v30  ;;  %24764 = vmatprep.mubr.msk.f32.mxu0 %vm26828_vm1, %v26827_v16  ;;  %v16776_v30 = vand.u32 4294901760, %v16775_v36 }
0x173c   :  { %24809 = vmatprep.subr.mxu0 %v15692_v4 }
0x173d   :  { %v25785_v45 = vpack.c.bf16 %v16776_v30, %v16769_v13 }
0x173e   :  { %24807 = vmatmul.mubr.f32.vlgmr.msra.gmra.mrb[32].mxu1 %v28096_v60  ;;  %v25788_v60 = vpack.c.bf16 %v16773_v34, %v16766_v11  ;;  %v16253_v11 = vsub.f32 %v16181_v35, %v16252_v50 }
0x173f   :  { %24873 = vmatprep.mubr.msk.f32.mxu1 %vm26828_vm1, %v26827_v16 }
0x1740   :  { %25783 = vmatpush3.bf16.xpose.msra.mxu1 %v25782_v24  ;;  %v16254_v32 = vand.u32 4294901760, %v16253_v11 }
0x1741   :  { %25784 = vmatprep.subr.bf16.mxu1 %v26840_v21 }
0x1742   :  { %24765 = vmatmul.mubr.f32.vlgmr.msra.gmra.mrb[26].mxu0 %v28100_v40  ;;  %v15782_v40 = vand.u32 4294901760, %v15781_v62  ;;  %v16255_v47 = vsub.f32 %v16253_v11, %v16254_v32 }
0x1743   :  { %24810 = vmatpush3.msra.mxu0 %v15692_v4 }
0x1744   :  { %24814 = vmatprep.subr.mxu0 %v15782_v40  ;;  %v16256_v30 = vand.u32 4294901760, %v16255_v47 }
0x1747   :  { %24874 = vmatmul.mubr.f32.vlgmr.msra.gmra.mrb[34].mxu1 %v16758_v57 }
0x1748   :  { %25786 = vmatpush3.bf16.xpose.msra.mxu1 %v25785_v45  ;;  %24880 = vmatprep.mubr.msk.f32.mxu1 %vm26828_vm1, %v26827_v16 }
0x1749   :  { %25787 = vmatprep.subr.bf16.mxu1 %v26840_v21 }
0x174f   :  { %24881 = vmatmul.mubr.f32.vlgmr.msra.gmra.mrb[34].mxu1 %v16754_v43 }
0x1750   :  { %25789 = vmatpush3.bf16.xpose.msra.mxu1 %v25788_v60  ;;  %24887 = vmatprep.mubr.msk.f32.mxu1 %vm26828_vm1, %v26827_v16  ;;  %v17149_v60 = vpop.permute.xlu1 %17148 }
0x1751   :  { %25790 = vmatprep.subr.bf16.mxu1 %v26840_v21 }
0x1754   :  { %v17147_v54 = vpop.permute.xlu1 %17146 }
0x1757   :  { %24888 = vmatmul.mubr.f32.vlgmr.msra.gmra.mrb[34].mxu1 %v16755_v20  ;;  %v16275_v20 = vand.u32 4294901760, %v16274_v53 }
0x1758   :  { %25792 = vmatpush3.bf16.xpose.msra.mxu1 %v25782_v24  ;;  %24894 = vmatprep.mubr.msk.f32.mxu1 %vm26828_vm1, %v26827_v16 }
0x1759   :  { %25793 = vmatprep.subr.bf16.mxu1 %v26840_v21  ;;  %v16276_v18 = vsub.f32 %v16274_v53, %v16275_v20 }
0x175b   :  { %v16277_v13 = vand.u32 4294901760, %v16276_v18 }
0x175f   :  { %24895 = vmatmul.mubr.f32.vlgmr.msra.gmra.mrb[34].mxu1 %v16756_v51 }
0x1760   :  { %25795 = vmatpush3.bf16.xpose.msra.mxu1 %v25794_v49  ;;  %24901 = vmatprep.mubr.msk.f32.mxu1 %vm26828_vm1, %v26827_v16  ;;  %v17151_v49 = vpop.permute.xlu0 %17150 }
0x1761   :  { %25796 = vmatprep.subr.bf16.mxu1 %v26840_v21 }
0x1767   :  { %24902 = vmatmul.mubr.f32.vlgmr.msra.gmra.mrb[34].mxu1 %v16754_v43 }
0x1768   :  { %25798 = vmatpush3.bf16.xpose.msra.mxu1 %v25782_v24  ;;  %24908 = vmatprep.mubr.msk.f32.mxu1 %vm26828_vm1, %v26827_v16 }
0x1769   :  { %25817 = vmatprep.subr.bf16.mxu1 %v26840_v21 }
0x176f   :  { %24909 = vmatmul.mubr.f32.vlgmr.msra.gmra.mrb[34].mxu1 %v16754_v43  ;;  %v16184_v43 = vsel %vm722_vm2, %v28047_v58, 0 }
0x1770   :  { %24957 = vmatprep.mubr.msk.f32.mxu1 %vm26828_vm1, %v26827_v16  ;;  %v16262_v34 = vand.u32 4294901760, %v16184_v43 }
0x1772   :  { %v16263_v59 = vsub.f32 %v16184_v43, %v16262_v34 }
0x1774   :  { %v16264_v58 = vand.u32 4294901760, %v16263_v59 }
0x1776   :  { %v16265_v57 = vsub.f32 %v16263_v59, %v16264_v58 }
0x1778   :  { %v16266_v45 = vand.u32 4294901760, %v16265_v57 }
0x1811   :  { %v15681_v63 = vpop.f32.mrb[32].mxu1 }
0x1812   :  { %v15689_v0 = vsel %vm722_vm2, %v15681_v63, 0  ;;  %v24808_v3 = vpop.f32.mrb[33].mxu1 }
0x1813   :  { %v15767_v46 = vand.u32 4294901760, %v15689_v0 }
0x1815   :  { %v15768_v19 = vsub.f32 %v15689_v0, %v15767_v46  ;;  %v15211_v26 = vpop.f32.mrb[26].mxu0 }
0x1816   :  { %v15686_v7 = vsel %vm722_vm2, %v15211_v26, 0  ;;  %v24766_v8 = vpop.f32.mrb[27].mxu0 }
0x1817   :  { %v15757_v9 = vand.u32 4294901760, %v15686_v7  ;;  %v15769_v15 = vand.u32 4294901760, %v15768_v19 }
0x1819   :  { %v15758_v22 = vsub.f32 %v15686_v7, %v15757_v9  ;;  %v15770_v23 = vsub.f32 %v15768_v19, %v15769_v15 }
0x181b   :  { %v15759_v31 = vand.u32 4294901760, %v15758_v22  ;;  %v15771_v41 = vand.u32 4294901760, %v15770_v23 }
0x181d   :  { %v15760_v6 = vsub.f32 %v15758_v22, %v15759_v31 }
0x181f   :  { %v15761_v25 = vand.u32 4294901760, %v15760_v6 }
0x1821   :  { %24811 = vmatprep.mubr.f32.mxu0 %v15761_v25 }
0x1822   :  { %24812 = vmatmul.mubr.f32.vlgmr.msra.gmra.mrb[28].mxu0 %v15771_v41 }
0x1823   :  { %24816 = vmatprep.mubr.f32.mxu0 %v15757_v9  ;;  %24815 = vmatpush3.msra.mxu0 %v15782_v40 }
0x1824   :  { %24819 = vmatprep.subr.mxu0 %v15779_v5 }
0x182a   :  { %24817 = vmatmul.mubr.f32.vlgmr.msra.gmra.mrb[28].mxu0 %v15767_v46 }
0x182b   :  { %24821 = vmatprep.mubr.f32.mxu0 %v15758_v22  ;;  %24820 = vmatpush3.msra.mxu0 %v15779_v5  ;;  %v17154_v5 = vsel %vm722_vm2, %v17149_v60, 0 }
0x182c   :  { %24824 = vmatprep.subr.mxu0 %v15692_v4  ;;  %v17159_v40 = vand.u32 4294901760, %v17154_v5 }
0x182e   :  { %v17237_v3 = vsub.f32 %v17154_v5, %v17159_v40 }
0x1830   :  { %v17238_v26 = vand.u32 4294901760, %v17237_v3 }
0x1832   :  { %24822 = vmatmul.mubr.f32.vlgmr.msra.gmra.mrb[28].mxu0 %v15768_v19 }
0x1833   :  { %24826 = vmatprep.mubr.f32.mxu0 %v15759_v31  ;;  %24825 = vmatpush3.msra.mxu0 %v15692_v4 }
0x1834   :  { %24829 = vmatprep.subr.mxu0 %v15780_v39 }
0x183a   :  { %24827 = vmatmul.mubr.f32.vlgmr.msra.gmra.mrb[28].mxu0 %v15769_v15  ;;  %v17239_v15 = vsub.f32 %v17237_v3, %v17238_v26 }
0x183b   :  { %24831 = vmatprep.mubr.f32.mxu0 %v15757_v9  ;;  %24830 = vmatpush3.msra.mxu0 %v15780_v39  ;;  %v17152_v39 = vsel %vm722_vm2, %v17147_v54, 0 }
0x183c   :  { %24834 = vmatprep.subr.mxu0 %v15692_v4  ;;  %v17225_v63 = vand.u32 4294901760, %v17152_v39  ;;  %v17240_v23 = vand.u32 4294901760, %v17239_v15 }
0x1842   :  { %v17142_v44 = vpop.f32.mrb[34].mxu1  ;;  %24832 = vmatmul.mubr.f32.vlgmr.msra.gmra.mrb[28].mxu0 %v15767_v46 }
0x1843   :  { %v28172_v51 = vmul.f32 0.35355338, %v17142_v44  ;;  %v24910_v24 = vpop.f32.mrb[35].mxu1  ;;  %24836 = vmatprep.mubr.f32.mxu0 %v15757_v9  ;;  %24835 = vmatpush3.msra.mxu0 %v15692_v4  ;;  %v17156_v4 = vsel %vm722_vm2, %v17151_v49, 0 }
0x1844   :  { %24839 = vmatprep.subr.mxu0 %v16187_v48  ;;  %v17162_v62 = vand.u32 4294901760, %v17156_v4 }
0x1845   :  { %v17619_v36 = vsel %vm12832_vm3, %v28172_v51, -inf }
0x1846   :  { %17620 = vmax.xlane.f32.xlu0 %v17619_v36  ;;  %v17244_v0 = vsub.f32 %v17156_v4, %v17162_v62  ;;  %v25800_v8 = vpack.c.bf16 %v17162_v62, %v17159_v40 }
0x1848   :  { %v17245_v19 = vand.u32 4294901760, %v17244_v0  ;;  %v25806_v41 = vpack.c.bf16 %v17244_v0, %v17237_v3 }
0x184a   :  { %24837 = vmatmul.mubr.f32.vlgmr.msra.gmra.mrb[28].mxu0 %v15767_v46  ;;  %v17226_v46 = vsub.f32 %v17152_v39, %v17225_v63  ;;  %v17246_v9 = vsub.f32 %v17244_v0, %v17245_v19  ;;  %v25812_v38 = vpack.c.bf16 %v17245_v19, %v17238_v26 }
0x184b   :  { %24841 = vmatprep.mubr.f32.mxu0 %v16256_v30  ;;  %24840 = vmatpush3.msra.mxu0 %v16187_v48 }
0x184c   :  { %24844 = vmatprep.subr.mxu0 %v16277_v13  ;;  %v17227_v7 = vand.u32 4294901760, %v17226_v46  ;;  %v17247_v31 = vand.u32 4294901760, %v17246_v9 }
0x184e   :  { %v17228_v22 = vsub.f32 %v17226_v46, %v17227_v7  ;;  %v25803_v25 = vpack.c.bf16 %v17247_v31, %v17240_v23 }
0x1850   :  { %v17229_v6 = vand.u32 4294901760, %v17228_v22 }
0x1852   :  { %24842 = vmatmul.mubr.f32.vlgmr.msra.gmra.mrb[28].mxu0 %v16266_v45 }
0x1853   :  { %24846 = vmatprep.mubr.f32.mxu0 %v16252_v50  ;;  %24845 = vmatpush3.msra.mxu0 %v16277_v13 }
0x1854   :  { %24849 = vmatprep.subr.mxu0 %v16274_v53 }
0x185a   :  { %24847 = vmatmul.mubr.f32.vlgmr.msra.gmra.mrb[28].mxu0 %v16262_v34 }
0x185b   :  { %24851 = vmatprep.mubr.f32.mxu0 %v16253_v11  ;;  %24850 = vmatpush3.msra.mxu0 %v16274_v53 }
0x185c   :  { %24854 = vmatprep.subr.mxu0 %v16187_v48 }
0x1862   :  { %24852 = vmatmul.mubr.f32.vlgmr.msra.gmra.mrb[28].mxu0 %v16263_v59 }
0x1863   :  { %24856 = vmatprep.mubr.f32.mxu0 %v16254_v32  ;;  %24855 = vmatpush3.msra.mxu0 %v16187_v48 }
0x1864   :  { %24859 = vmatprep.subr.mxu0 %v16275_v20 }
0x186a   :  { %24857 = vmatmul.mubr.f32.vlgmr.msra.gmra.mrb[28].mxu0 %v16264_v58 }
0x186b   :  { %24861 = vmatprep.mubr.f32.mxu0 %v16252_v50  ;;  %24860 = vmatpush3.msra.mxu0 %v16275_v20 }
0x186c   :  { %24864 = vmatprep.subr.mxu0 %v16187_v48 }
0x1872   :  { %24862 = vmatmul.mubr.f32.vlgmr.msra.gmra.mrb[28].mxu0 %v16262_v34 }
0x1873   :  { %24865 = vmatpush3.msra.mxu0 %v16187_v48  ;;  %24866 = vmatprep.mubr.f32.mxu0 %v16252_v50 }
0x1874   :  { %25799 = vmatprep.subr.bf16.mxu0 %v26840_v21 }
0x187a   :  { %24867 = vmatmul.mubr.f32.vlgmr.msra.gmra.mrb[28].mxu0 %v16262_v34 }
0x187b   :  { %25801 = vmatpush3.bf16.xpose.msra.mxu0 %v25800_v8  ;;  %24915 = vmatprep.mubr.msk.f32.mxu0 %vm26828_vm1, %v26827_v16 }
0x187c   :  { %25802 = vmatprep.subr.bf16.mxu0 %v26840_v21 }
0x1882   :  { %24916 = vmatmul.mubr.f32.vlgmr.msra.gmra.mrb[30].mxu0 %v17229_v6 }
0x1883   :  { %25804 = vmatpush3.bf16.xpose.msra.mxu0 %v25803_v25  ;;  %24922 = vmatprep.mubr.msk.f32.mxu0 %vm26828_vm1, %v26827_v16 }
0x1884   :  { %25805 = vmatprep.subr.bf16.mxu0 %v26840_v21 }
0x188a   :  { %24923 = vmatmul.mubr.f32.vlgmr.msra.gmra.mrb[30].mxu0 %v17225_v63 }
0x188b   :  { %25807 = vmatpush3.bf16.xpose.msra.mxu0 %v25806_v41  ;;  %24929 = vmatprep.mubr.msk.f32.mxu0 %vm26828_vm1, %v26827_v16 }
0x188c   :  { %25808 = vmatprep.subr.bf16.mxu0 %v26840_v21 }
0x1892   :  { %24930 = vmatmul.mubr.f32.vlgmr.msra.gmra.mrb[30].mxu0 %v17226_v46 }
0x1893   :  { %25810 = vmatpush3.bf16.xpose.msra.mxu0 %v25800_v8  ;;  %24936 = vmatprep.mubr.msk.f32.mxu0 %vm26828_vm1, %v26827_v16 }
0x1894   :  { %25811 = vmatprep.subr.bf16.mxu0 %v26840_v21 }
0x189a   :  { %24937 = vmatmul.mubr.f32.vlgmr.msra.gmra.mrb[30].mxu0 %v17227_v7 }
0x189b   :  { %25813 = vmatpush3.bf16.xpose.msra.mxu0 %v25812_v38  ;;  %24943 = vmatprep.mubr.msk.f32.mxu0 %vm26828_vm1, %v26827_v16 }
0x189c   :  { %25814 = vmatprep.subr.bf16.mxu0 %v26840_v21 }
0x18a2   :  { %24944 = vmatmul.mubr.f32.vlgmr.msra.gmra.mrb[30].mxu0 %v17225_v63 }
0x18a3   :  { %25816 = vmatpush3.bf16.xpose.msra.mxu0 %v25800_v8  ;;  %24950 = vmatprep.mubr.msk.f32.mxu0 %vm26828_vm1, %v26827_v16 }
0x18aa   :  { %24951 = vmatmul.mubr.f32.vlgmr.msra.gmra.mrb[30].mxu0 %v17225_v63 }
0x18d3   :  { %v17621_v35 = vpop.xlane.xlu0 %17620 }
0x18d4   :  { %v17625_v48 = vsub.f32 %v28172_v51, %v17621_v35 }
0x18d6   :  { %v17627_v50 = vmul.f32 1.442695, %v17625_v48 }
0x18d8   :  { %26655 = vpow2.f32 %v17627_v50 }
0x18e2   :  { %v26656_v53 = vpop.eup %26655 }
0x18e3   :  { %v17631_v43 = vsel %vm12832_vm3, %v26656_v53, 0.0 }
0x18e4   :  { %17632 = vadd.xlane.f32.xlu0 %v17631_v43 }
0x18fa   :  { %17641 = vrot.lane.b32.xlu0 %v27844_v61, %s26835_s18 }
0x18fe   :  { %18109 = vrot.lane.b32.xlu0 %v27855_v17, %s26835_s18 }
0x1902   :  { %18111 = vrot.lane.b32.xlu0 %v27849_v29, %s26835_s18 }
0x1906   :  { %19076 = vrot.lane.b32.xlu0 %v27742_v2, %s26837_s20 }
0x190a   :  { %19078 = vrot.lane.b32.xlu0 %v27740_v1, %s26837_s20 }
0x190e   :  { %19074 = vrot.lane.b32.xlu0 %v27791_v37, %s26837_s20 }
0x1912   :  { %19547 = vrot.lane.b32.xlu0 %v27755_v12, %s26837_s20 }
0x1916   :  { %19549 = vrot.lane.b32.xlu0 %v27750_v55, %s26837_s20 }
0x191a   :  { %19545 = vrot.lane.b32.xlu0 %v27789_v33, %s26837_s20 }
0x1971   :  { %v17633_v11 = vpop.xlane.xlu0 %17632 }
0x1972   :  { %26657 = vrcp.f32 %v17633_v11 }
0x1975   :  { %v17642_v34 = vpop.permute.xlu0 %17641 }
0x1976   :  { %v17651_v4 = vand.u32 4294901760, %v17642_v34 }
0x1978   :  { %v17729_v62 = vsub.f32 %v17642_v34, %v17651_v4 }
0x1979   :  { %v28217_v20 = vpop.permute.xlu0 %18109 }
0x197a   :  { %v18119_v2 = vand.u32 4294901760, %v28217_v20  ;;  %v17730_v46 = vand.u32 4294901760, %v17729_v62 }
0x197c   :  { %v28223_v1 = vsub.f32 %v28217_v20, %v18119_v2  ;;  %v26658_v45 = vpop.eup %26657  ;;  %v17731_v9 = vsub.f32 %v17729_v62, %v17730_v46 }
0x197d   :  { %v28225_v37 = vpop.permute.xlu0 %18111  ;;  %v17613_v12 = vpop.f32.mrb[30].mxu0  ;;  %v17639_v60 = vmul.f32 %v26658_v45, %v26656_v53 }
0x197e   :  { %v18198_v32 = vand.u32 4294901760, %v28223_v1  ;;  %v18122_v55 = vand.u32 4294901760, %v28225_v37  ;;  %v17618_v44 = vmul.f32 0.35355338, %v17613_v12  ;;  %v24952_v33 = vpop.f32.mrb[31].mxu0  ;;  %v17732_v23 = vand.u32 4294901760, %v17731_v9 }
0x197f   :  { %v17648_v49 = vsel %vm12832_vm3, %v17639_v60, 0 }
0x1980   :  { %v28232_v51 = vsub.f32 %v28225_v37, %v18122_v55  ;;  %v17622_v24 = vsel %vm12832_vm3, %v17618_v44, -inf  ;;  %v18199_v59 = vsub.f32 %v28223_v1, %v18198_v32  ;;  %v17717_v54 = vand.u32 4294901760, %v17648_v49 }
0x1981   :  { %17623 = vmax.xlane.f32.xlu1 %v17622_v24  ;;  %v25836_v50 = vpack.c.bf16 %v18122_v55, %v18119_v2  ;;  %v19077_v2 = vpop.permute.xlu0 %19076 }
0x1982   :  { %v18205_v18 = vand.u32 4294901760, %v28232_v51  ;;  %v25842_v36 = vpack.c.bf16 %v28232_v51, %v28223_v1  ;;  %v18200_v13 = vand.u32 4294901760, %v18199_v59  ;;  %v17718_v5 = vsub.f32 %v17648_v49, %v17717_v54 }
0x1983   :  { %v19082_v1 = vsel %vm722_vm2, %v19077_v2, 0 }
0x1984   :  { %v18206_v47 = vsub.f32 %v28232_v51, %v18205_v18  ;;  %v28240_v58 = vpack.c.bf16 %v18205_v18, %v18198_v32  ;;  %v17719_v63 = vand.u32 4294901760, %v17718_v5  ;;  %v19087_v18 = vand.u32 4294901760, %v19082_v1 }
0x1985   :  { %v19079_v37 = vpop.permute.xlu0 %19078 }
0x1986   :  { %v18207_v30 = vand.u32 4294901760, %v18206_v47  ;;  %v17720_v26 = vsub.f32 %v17718_v5, %v17719_v63  ;;  %v19084_v55 = vsel %vm722_vm2, %v19079_v37, 0 }
0x1987   :  { %v19090_v51 = vand.u32 4294901760, %v19084_v55 }
0x1988   :  { %v28242_v57 = vpack.c.bf16 %v18207_v30, %v18200_v13  ;;  %v17721_v22 = vand.u32 4294901760, %v17720_v26  ;;  %v19165_v13 = vsub.f32 %v19082_v1, %v19087_v18 }
0x1989   :  { %v19075_v24 = vpop.permute.xlu0 %19074  ;;  %v19172_v47 = vsub.f32 %v19084_v55, %v19090_v51  ;;  %v25854_v60 = vpack.c.bf16 %v19090_v51, %v19087_v18 }
0x198a   :  { %v19080_v59 = vsel %vm722_vm2, %v19075_v24, 0 }
0x198b   :  { %v19173_v30 = vand.u32 4294901760, %v19172_v47 }
0x198d   :  { %v19174_v49 = vsub.f32 %v19172_v47, %v19173_v30 }
0x1992   :  { %17643 = vrot.lane.b32.xlu1 %v27841_v27, %s26835_s18 }
0x1a0e   :  { %v17624_v39 = vpop.xlane.xlu1 %17623 }
0x1a0f   :  { %v17626_v40 = vsub.f32 %v17618_v44, %v17624_v39 }
0x1a11   :  { %v17629_v0 = vmul.f32 1.442695, %v17626_v40 }
0x1a12   :  { %v17644_v3 = vpop.permute.xlu1 %17643 }
0x1a13   :  { %26659 = vpow2.f32 %v17629_v0  ;;  %v17654_v19 = vand.u32 4294901760, %v17644_v3 }
0x1a15   :  { %v25818_v7 = vpack.c.bf16 %v17654_v19, %v17651_v4  ;;  %v17736_v8 = vsub.f32 %v17644_v3, %v17654_v19 }
0x1a17   :  { %v17737_v15 = vand.u32 4294901760, %v17736_v8  ;;  %25819 = vmatpush3.bf16.msra.mxu1 %v25818_v7  ;;  %v25824_v35 = vpack.c.bf16 %v17736_v8, %v17729_v62 }
0x1a18   :  { %25820 = vmatprep.subr.bf16.mxu1 %v26840_v21 }
0x1a19   :  { %v17738_v31 = vsub.f32 %v17736_v8, %v17737_v15  ;;  %v25830_v48 = vpack.c.bf16 %v17737_v15, %v17730_v46 }
0x1a1a   :  { %24958 = vmatmul.mubr.f32.vlgmr.msra.gmra.mrb[36].mxu1 %v17721_v22  ;;  %v135_v22 = vld [vmem:[#allocation8 + $0x90] sm:$0xff] }
0x1a1b   :  { %v17739_v6 = vand.u32 4294901760, %v17738_v31  ;;  %24964 = vmatprep.mubr.msk.f32.mxu1 %vm26828_vm1, %v26827_v16  ;;  %v18584_v31 = vand.u32 4294901760, %v135_v22 }
0x1a1d   :  { %v26660_v25 = vpop.eup %26659  ;;  %v25821_v41 = vpack.c.bf16 %v17739_v6, %v17732_v23  ;;  %25037 = vmatprep.subr.mxu0 %v18584_v31  ;;  %v18671_v23 = vsub.f32 %v135_v22, %v18584_v31 }
0x1a1e   :  { %v17634_v38 = vsel %vm12832_vm3, %v26660_v25, 0.0  ;;  %25038 = vmatpush3.msra.mxu0 %v18584_v31 }
0x1a1f   :  { %17635 = vadd.xlane.f32.xlu1 %v17634_v38  ;;  %25822 = vmatpush3.bf16.msra.mxu1 %v25821_v41  ;;  %v18672_v6 = vand.u32 4294901760, %v18671_v23 }
0x1a20   :  { %25823 = vmatprep.subr.bf16.mxu1 %v26840_v21 }
0x1a22   :  { %24965 = vmatmul.mubr.f32.vlgmr.msra.gmra.mrb[36].mxu1 %v17717_v54 }
0x1a23   :  { %25825 = vmatpush3.bf16.msra.mxu1 %v25824_v35  ;;  %24971 = vmatprep.mubr.msk.f32.mxu1 %vm26828_vm1, %v26827_v16 }
0x1a24   :  { %25826 = vmatprep.subr.bf16.mxu1 %v26840_v21 }
0x1a2a   :  { %24972 = vmatmul.mubr.f32.vlgmr.msra.gmra.mrb[36].mxu1 %v17718_v5  ;;  %v19175_v5 = vand.u32 4294901760, %v19174_v49 }
0x1a2b   :  { %25828 = vmatpush3.bf16.msra.mxu1 %v25818_v7  ;;  %24978 = vmatprep.mubr.msk.f32.mxu1 %vm26828_vm1, %v26827_v16 }
0x1a2c   :  { %25829 = vmatprep.subr.bf16.mxu1 %v26840_v21 }
0x1a32   :  { %24979 = vmatmul.mubr.f32.vlgmr.msra.gmra.mrb[36].mxu1 %v17719_v63  ;;  %v25860_v63 = vpack.c.bf16 %v19172_v47, %v19165_v13 }
0x1a33   :  { %25831 = vmatpush3.bf16.msra.mxu1 %v25830_v48  ;;  %24985 = vmatprep.mubr.msk.f32.mxu1 %vm26828_vm1, %v26827_v16 }
0x1a34   :  { %25832 = vmatprep.subr.bf16.mxu1 %v26840_v21 }
0x1a3a   :  { %24986 = vmatmul.mubr.f32.vlgmr.msra.gmra.mrb[36].mxu1 %v17717_v54 }
0x1a3b   :  { %25834 = vmatpush3.bf16.msra.mxu1 %v25818_v7  ;;  %24992 = vmatprep.mubr.msk.f32.mxu1 %vm26828_vm1, %v26827_v16 }
0x1a3c   :  { %25835 = vmatprep.subr.bf16.mxu1 %v26840_v21 }
0x1a42   :  { %24993 = vmatmul.mubr.f32.vlgmr.msra.gmra.mrb[36].mxu1 %v17717_v54 }
0x1a43   :  { %25837 = vmatpush3.bf16.msra.mxu1 %v25836_v50  ;;  %24999 = vmatprep.mubr.msk.f32.mxu1 %vm26828_vm1, %v26827_v16 }
0x1a44   :  { %25838 = vmatprep.subr.bf16.mxu1 %v26840_v21 }
0x1aac   :  { %v17636_v53 = vpop.xlane.xlu1 %17635 }
0x1aad   :  { %26661 = vrcp.f32 %v17636_v53 }
0x1ab7   :  { %v26662_v43 = vpop.eup %26661 }
0x1ab8   :  { %v17640_v11 = vmul.f32 %v26662_v43, %v26660_v25  ;;  %v18673_v25 = vsub.f32 %v18671_v23, %v18672_v6 }
0x1aba   :  { %v18116_v34 = vsel %vm12832_vm3, %v17640_v11, 0  ;;  %v18674_v41 = vand.u32 4294901760, %v18673_v25 }
0x1abb   :  { %v18185_v12 = vand.u32 4294901760, %v18116_v34 }
0x1abc   :  { %25042 = vmatprep.subr.mxu0 %v18674_v41 }
0x1abd   :  { %v18186_v32 = vsub.f32 %v18116_v34, %v18185_v12 }
0x1abf   :  { %v18187_v44 = vand.u32 4294901760, %v18186_v32 }
0x1ac1   :  { %v18188_v20 = vsub.f32 %v18186_v32, %v18187_v44 }
0x1ac3   :  { %v18189_v33 = vand.u32 4294901760, %v18188_v20 }
0x1ac5   :  { %25000 = vmatmul.mubr.f32.vlgmr.msra.gmra.mrb[38].mxu1 %v18189_v33 }
0x1ac6   :  { %25840 = vmatpush3.bf16.msra.mxu1 %v28242_v57  ;;  %25006 = vmatprep.mubr.msk.f32.mxu1 %vm26828_vm1, %v26827_v16  ;;  %v19166_v57 = vand.u32 4294901760, %v19165_v13 }
0x1ac7   :  { %25841 = vmatprep.subr.bf16.mxu1 %v26840_v21 }
0x1ac8   :  { %v19167_v54 = vsub.f32 %v19165_v13, %v19166_v57  ;;  %v25866_v0 = vpack.c.bf16 %v19173_v30, %v19166_v57 }
0x1aca   :  { %v19168_v39 = vand.u32 4294901760, %v19167_v54 }
0x1acc   :  { %v25857_v40 = vpack.c.bf16 %v19175_v5, %v19168_v39 }
0x1acd   :  { %25007 = vmatmul.mubr.f32.vlgmr.msra.gmra.mrb[38].mxu1 %v18185_v12 }
0x1ace   :  { %25843 = vmatpush3.bf16.msra.mxu1 %v25842_v36  ;;  %25013 = vmatprep.mubr.msk.f32.mxu1 %vm26828_vm1, %v26827_v16  ;;  %v19153_v36 = vand.u32 4294901760, %v19080_v59 }
0x1acf   :  { %25844 = vmatprep.subr.bf16.mxu1 %v26840_v21 }
0x1ad5   :  { %25014 = vmatmul.mubr.f32.vlgmr.msra.gmra.mrb[38].mxu1 %v18186_v32 }
0x1ad6   :  { %25846 = vmatpush3.bf16.msra.mxu1 %v25836_v50  ;;  %25020 = vmatprep.mubr.msk.f32.mxu1 %vm26828_vm1, %v26827_v16 }
0x1ad7   :  { %25847 = vmatprep.subr.bf16.mxu1 %v26840_v21 }
0x1add   :  { %25021 = vmatmul.mubr.f32.vlgmr.msra.gmra.mrb[38].mxu1 %v18187_v44 }
0x1ade   :  { %25849 = vmatpush3.bf16.msra.mxu1 %v28240_v58  ;;  %25027 = vmatprep.mubr.msk.f32.mxu1 %vm26828_vm1, %v26827_v16  ;;  %v19154_v58 = vsub.f32 %v19080_v59, %v19153_v36 }
0x1adf   :  { %25850 = vmatprep.subr.bf16.mxu1 %v26840_v21 }
0x1ae0   :  { %v19155_v45 = vand.u32 4294901760, %v19154_v58 }
0x1ae2   :  { %v19156_v4 = vsub.f32 %v19154_v58, %v19155_v45 }
0x1ae4   :  { %v19157_v62 = vand.u32 4294901760, %v19156_v4 }
0x1ae5   :  { %25028 = vmatmul.mubr.f32.vlgmr.msra.gmra.mrb[38].mxu1 %v18185_v12 }
0x1ae6   :  { %25852 = vmatpush3.bf16.msra.mxu1 %v25836_v50  ;;  %25034 = vmatprep.mubr.msk.f32.mxu1 %vm26828_vm1, %v26827_v16 }
0x1ae7   :  { %25853 = vmatprep.subr.bf16.mxu1 %v26840_v21 }
0x1aed   :  { %25035 = vmatmul.mubr.f32.vlgmr.msra.gmra.mrb[38].mxu1 %v18185_v12  ;;  %v19548_v12 = vpop.permute.xlu0 %19547 }
0x1aee   :  { %25071 = vmatprep.mubr.msk.f32.mxu1 %vm26828_vm1, %v26827_v16  ;;  %v19553_v33 = vsel %vm722_vm2, %v19548_v12, 0 }
0x1aef   :  { %25855 = vmatpush3.bf16.xpose.msra.mxu1 %v25854_v60  ;;  %v19558_v55 = vand.u32 4294901760, %v19553_v33 }
0x1af0   :  { %25856 = vmatprep.subr.bf16.mxu1 %v26840_v21 }
0x1af1   :  { %v19550_v32 = vpop.permute.xlu0 %19549  ;;  %v19636_v51 = vsub.f32 %v19553_v33, %v19558_v55 }
0x1af2   :  { %v19555_v44 = vsel %vm722_vm2, %v19550_v32, 0 }
0x1af3   :  { %v19561_v2 = vand.u32 4294901760, %v19555_v44 }
0x1af5   :  { %v19546_v20 = vpop.permute.xlu0 %19545  ;;  %v19643_v1 = vsub.f32 %v19555_v44, %v19561_v2  ;;  %v25872_v57 = vpack.c.bf16 %v19561_v2, %v19558_v55 }
0x1af6   :  { %25072 = vmatmul.mubr.f32.vlgmr.msra.gmra.mrb[40].mxu1 %v19157_v62  ;;  %v19551_v37 = vsel %vm722_vm2, %v19546_v20, 0 }
0x1af7   :  { %25858 = vmatpush3.bf16.xpose.msra.mxu1 %v25857_v40  ;;  %25078 = vmatprep.mubr.msk.f32.mxu1 %vm26828_vm1, %v26827_v16  ;;  %v19624_v24 = vand.u32 4294901760, %v19551_v37  ;;  %v19644_v18 = vand.u32 4294901760, %v19643_v1  ;;  %v25878_v40 = vpack.c.bf16 %v19643_v1, %v19636_v51 }
0x1af8   :  { %25859 = vmatprep.subr.bf16.mxu1 %v26840_v21 }
0x1af9   :  { %v19625_v59 = vsub.f32 %v19551_v37, %v19624_v24 }
0x1afb   :  { %v19626_v13 = vand.u32 4294901760, %v19625_v59 }
0x1afd   :  { %v19627_v54 = vsub.f32 %v19625_v59, %v19626_v13 }
0x1afe   :  { %25079 = vmatmul.mubr.f32.vlgmr.msra.gmra.mrb[40].mxu1 %v19153_v36 }
0x1aff   :  { %25861 = vmatpush3.bf16.xpose.msra.mxu1 %v25860_v63  ;;  %25085 = vmatprep.mubr.msk.f32.mxu1 %vm26828_vm1, %v26827_v16  ;;  %v19628_v39 = vand.u32 4294901760, %v19627_v54 }
0x1b00   :  { %25862 = vmatprep.subr.bf16.mxu1 %v26840_v21 }
0x1b06   :  { %25086 = vmatmul.mubr.f32.vlgmr.msra.gmra.mrb[40].mxu1 %v19154_v58 }
0x1b07   :  { %25864 = vmatpush3.bf16.xpose.msra.mxu1 %v25854_v60  ;;  %25092 = vmatprep.mubr.msk.f32.mxu1 %vm26828_vm1, %v26827_v16 }
0x1b08   :  { %25865 = vmatprep.subr.bf16.mxu1 %v26840_v21 }
0x1b0e   :  { %25093 = vmatmul.mubr.f32.vlgmr.msra.gmra.mrb[40].mxu1 %v19155_v45  ;;  %v19645_v45 = vsub.f32 %v19643_v1, %v19644_v18 }
0x1b0f   :  { %25867 = vmatpush3.bf16.xpose.msra.mxu1 %v25866_v0  ;;  %25099 = vmatprep.mubr.msk.f32.mxu1 %vm26828_vm1, %v26827_v16 }
0x1b10   :  { %25868 = vmatprep.subr.bf16.mxu1 %v26840_v21  ;;  %v19646_v4 = vand.u32 4294901760, %v19645_v45 }
0x1b15   :  { %v18105_v3 = vpop.f32.mrb[36].mxu1 }
0x1b16   :  { %v18578_v46 = vsel %vm722_vm2, %v18105_v3, 0  ;;  %25100 = vmatmul.mubr.f32.vlgmr.msra.gmra.mrb[40].mxu1 %v19153_v36  ;;  %v24994_v19 = vpop.f32.mrb[37].mxu1 }
0x1b17   :  { %v18649_v26 = vand.u32 4294901760, %v18578_v46  ;;  %25870 = vmatpush3.bf16.xpose.msra.mxu1 %v25854_v60  ;;  %25106 = vmatprep.mubr.msk.f32.mxu1 %vm26828_vm1, %v26827_v16 }
0x1b18   :  { %25889 = vmatprep.subr.bf16.mxu1 %v26840_v21 }
0x1b19   :  { %v18650_v7 = vsub.f32 %v18578_v46, %v18649_v26 }
0x1b1b   :  { %v18651_v8 = vand.u32 4294901760, %v18650_v7 }
0x1b1d   :  { %v18652_v9 = vsub.f32 %v18650_v7, %v18651_v8 }
0x1b1e   :  { %25107 = vmatmul.mubr.f32.vlgmr.msra.gmra.mrb[40].mxu1 %v19153_v36  ;;  %v19637_v36 = vand.u32 4294901760, %v19636_v51 }
0x1b1f   :  { %v18653_v15 = vand.u32 4294901760, %v18652_v9  ;;  %25155 = vmatprep.mubr.msk.f32.mxu1 %vm26828_vm1, %v26827_v16 }
0x1b20   :  { %v19638_v49 = vsub.f32 %v19636_v51, %v19637_v36  ;;  %v25884_v63 = vpack.c.bf16 %v19644_v18, %v19637_v36 }
0x1b21   :  { %25039 = vmatprep.mubr.f32.mxu0 %v18653_v15 }
0x1b22   :  { %v19639_v5 = vand.u32 4294901760, %v19638_v49 }
0x1b24   :  { %v25875_v62 = vpack.c.bf16 %v19646_v4, %v19639_v5 }
0x1bc0   :  { %v18573_v38 = vpop.f32.mrb[38].mxu1 }
0x1bc1   :  { %v18581_v35 = vsel %vm722_vm2, %v18573_v38, 0  ;;  %v25036_v48 = vpop.f32.mrb[39].mxu1 }
0x1bc2   :  { %v18659_v50 = vand.u32 4294901760, %v18581_v35 }
0x1bc4   :  { %v18660_v53 = vsub.f32 %v18581_v35, %v18659_v50 }
0x1bc6   :  { %v18661_v43 = vand.u32 4294901760, %v18660_v53 }
0x1bc8   :  { %v18662_v11 = vsub.f32 %v18660_v53, %v18661_v43 }
0x1bca   :  { %v18663_v34 = vand.u32 4294901760, %v18662_v11 }
0x1bcc   :  { %25040 = vmatmul.mubr.f32.vlgmr.msra.gmra.mrb[28].mxu0 %v18663_v34 }
0x1bcd   :  { %25044 = vmatprep.mubr.f32.mxu0 %v18649_v26  ;;  %25043 = vmatpush3.msra.mxu0 %v18674_v41 }
0x1bce   :  { %25047 = vmatprep.subr.mxu0 %v18671_v23 }
0x1bd4   :  { %25045 = vmatmul.mubr.f32.vlgmr.msra.gmra.mrb[28].mxu0 %v18659_v50 }
0x1bd5   :  { %25049 = vmatprep.mubr.f32.mxu0 %v18650_v7  ;;  %25048 = vmatpush3.msra.mxu0 %v18671_v23 }
0x1bd6   :  { %25052 = vmatprep.subr.mxu0 %v18584_v31 }
0x1bdc   :  { %25050 = vmatmul.mubr.f32.vlgmr.msra.gmra.mrb[28].mxu0 %v18660_v53 }
0x1bdd   :  { %25054 = vmatprep.mubr.f32.mxu0 %v18651_v8  ;;  %25053 = vmatpush3.msra.mxu0 %v18584_v31 }
0x1bde   :  { %25057 = vmatprep.subr.mxu0 %v18672_v6 }
0x1be4   :  { %25055 = vmatmul.mubr.f32.vlgmr.msra.gmra.mrb[28].mxu0 %v18661_v43 }
0x1be5   :  { %25059 = vmatprep.mubr.f32.mxu0 %v18649_v26  ;;  %25058 = vmatpush3.msra.mxu0 %v18672_v6 }
0x1be6   :  { %25062 = vmatprep.subr.mxu0 %v18584_v31 }
0x1bec   :  { %25060 = vmatmul.mubr.f32.vlgmr.msra.gmra.mrb[28].mxu0 %v18659_v50 }
0x1bed   :  { %25063 = vmatpush3.msra.mxu0 %v18584_v31  ;;  %25064 = vmatprep.mubr.f32.mxu0 %v18649_v26 }
0x1bee   :  { %25871 = vmatprep.subr.bf16.mxu0 %v26840_v21 }
0x1bf1   :  { %v19541_v47 = vpop.f32.mrb[40].mxu1 }
0x1bf2   :  { %v20016_v58 = vmul.f32 0.35355338, %v19541_v47  ;;  %v25108_v30 = vpop.f32.mrb[41].mxu1 }
0x1bf4   :  { %25065 = vmatmul.mubr.f32.vlgmr.msra.gmra.mrb[28].mxu0 %v18659_v50  ;;  %v20018_v60 = vsel %vm12832_vm3, %v20016_v58, -inf }
0x1bf5   :  { %25873 = vmatpush3.bf16.xpose.msra.mxu0 %v25872_v57  ;;  %20019 = vmax.xlane.f32.xlu0 %v20018_v60 }
0x1bf6   :  { %25113 = vmatprep.mubr.msk.f32.mxu0 %vm26828_vm1, %v26827_v16  ;;  %25874 = vmatprep.subr.bf16.mxu0 %v26840_v21 }
0x1bfc   :  { %25114 = vmatmul.mubr.f32.vlgmr.msra.gmra.mrb[32].mxu0 %v19628_v39 }
0x1bfd   :  { %25876 = vmatpush3.bf16.xpose.msra.mxu0 %v25875_v62  ;;  %25120 = vmatprep.mubr.msk.f32.mxu0 %vm26828_vm1, %v26827_v16 }
0x1bfe   :  { %25877 = vmatprep.subr.bf16.mxu0 %v26840_v21 }
0x1c04   :  { %25121 = vmatmul.mubr.f32.vlgmr.msra.gmra.mrb[32].mxu0 %v19624_v24 }
0x1c05   :  { %25879 = vmatpush3.bf16.xpose.msra.mxu0 %v25878_v40  ;;  %25127 = vmatprep.mubr.msk.f32.mxu0 %vm26828_vm1, %v26827_v16 }
0x1c06   :  { %25880 = vmatprep.subr.bf16.mxu0 %v26840_v21 }
0x1c0b   :  { %20042 = vrot.lane.b32.xlu0 %v27841_v27, %s26837_s20 }
0x1c0c   :  { %25128 = vmatmul.mubr.f32.vlgmr.msra.gmra.mrb[32].mxu0 %v19625_v59 }
0x1c0d   :  { %25882 = vmatpush3.bf16.xpose.msra.mxu0 %v25872_v57  ;;  %25134 = vmatprep.mubr.msk.f32.mxu0 %vm26828_vm1, %v26827_v16 }
0x1c0e   :  { %25883 = vmatprep.subr.bf16.mxu0 %v26840_v21 }
0x1c14   :  { %25135 = vmatmul.mubr.f32.vlgmr.msra.gmra.mrb[32].mxu0 %v19626_v13 }
0x1c15   :  { %25885 = vmatpush3.bf16.xpose.msra.mxu0 %v25884_v63  ;;  %25141 = vmatprep.mubr.msk.f32.mxu0 %vm26828_vm1, %v26827_v16 }
0x1c16   :  { %25886 = vmatprep.subr.bf16.mxu0 %v26840_v21 }
0x1c1c   :  { %25142 = vmatmul.mubr.f32.vlgmr.msra.gmra.mrb[32].mxu0 %v19624_v24 }
0x1c1d   :  { %25888 = vmatpush3.bf16.xpose.msra.mxu0 %v25872_v57  ;;  %25148 = vmatprep.mubr.msk.f32.mxu0 %vm26828_vm1, %v26827_v16 }
0x1c1e   :  { %25907 = vmatprep.subr.bf16.mxu0 %v26840_v21 }
0x1c24   :  { %25149 = vmatmul.mubr.f32.vlgmr.msra.gmra.mrb[32].mxu0 %v19624_v24 }
0x1c25   :  { %25197 = vmatprep.mubr.msk.f32.mxu0 %vm26828_vm1, %v26827_v16 }
0x1c82   :  { %v20020_v27 = vpop.xlane.xlu0 %20019 }
0x1c83   :  { %v20024_v0 = vsub.f32 %v20016_v58, %v20020_v27 }
0x1c85   :  { %v20026_v3 = vmul.f32 1.442695, %v20024_v0 }
0x1c86   :  { %v20043_v6 = vpop.permute.xlu0 %20042 }
0x1c87   :  { %26663 = vpow2.f32 %v20026_v3  ;;  %v20053_v41 = vand.u32 4294901760, %v20043_v6 }
0x1c91   :  { %v26664_v8 = vpop.eup %26663 }
0x1c92   :  { %v20030_v9 = vsel %vm12832_vm3, %v26664_v8, 0.0 }
0x1cf7   :  { %v20012_v46 = vpop.f32.mrb[32].mxu0 }
0x1cf8   :  { %v20017_v19 = vmul.f32 0.35355338, %v20012_v46  ;;  %v25150_v26 = vpop.f32.mrb[33].mxu0 }
0x1cfa   :  { %v20021_v7 = vsel %vm12832_vm3, %v20017_v19, -inf }
0x1cfb   :  { %20022 = vmax.xlane.f32.xlu1 %v20021_v7 }
0x1cff   :  { %20031 = vadd.xlane.f32.xlu1 %v20030_v9 }
0x1d10   :  { %20040 = vrot.lane.b32.xlu1 %v27844_v61, %s26837_s20  ;;  %v20135_v61 = vsub.f32 %v20043_v6, %v20053_v41 }
0x1d12   :  { %v20136_v34 = vand.u32 4294901760, %v20135_v61 }
0x1d14   :  { %20508 = vrot.lane.b32.xlu1 %v27855_v17, %s26837_s20  ;;  %v20137_v33 = vsub.f32 %v20135_v61, %v20136_v34 }
0x1d16   :  { %v20138_v24 = vand.u32 4294901760, %v20137_v33 }
0x1d88   :  { %v20023_v15 = vpop.xlane.xlu1 %20022 }
0x1d89   :  { %v20025_v22 = vsub.f32 %v20017_v19, %v20023_v15 }
0x1d8b   :  { %v20028_v31 = vmul.f32 1.442695, %v20025_v22 }
0x1d8c   :  { %v20032_v23 = vpop.xlane.xlu1 %20031 }
0x1d8d   :  { %26665 = vpow2.f32 %v20028_v31 }
0x1d8e   :  { %26667 = vrcp.f32 %v20032_v23 }
0x1d90   :  { %v20041_v25 = vpop.permute.xlu1 %20040 }
0x1d91   :  { %v20050_v38 = vand.u32 4294901760, %v20041_v25 }
0x1d93   :  { %v25890_v35 = vpack.c.bf16 %v20053_v41, %v20050_v38  ;;  %v20128_v48 = vsub.f32 %v20041_v25, %v20050_v38  ;;  %v136_v38 = vld [vmem:[#allocation8 + $0x98] sm:$0xff] }
0x1d95   :  { %25891 = vmatpush3.bf16.msra.mxu1 %v25890_v35  ;;  %v20129_v11 = vand.u32 4294901760, %v20128_v48  ;;  %v25896_v59 = vpack.c.bf16 %v20135_v61, %v20128_v48 }
0x1d96   :  { %25892 = vmatprep.subr.bf16.mxu1 %v26840_v21 }
0x1d97   :  { %v26666_v50 = vpop.eup %26665  ;;  %v20130_v44 = vsub.f32 %v20128_v48, %v20129_v11  ;;  %v25902_v18 = vpack.c.bf16 %v20136_v34, %v20129_v11 }
0x1d98   :  { %v26668_v53 = vpop.eup %26667  ;;  %v20033_v17 = vsel %vm12832_vm3, %v26666_v50, 0.0 }
0x1d99   :  { %v20038_v43 = vmul.f32 %v26668_v53, %v26664_v8  ;;  %20034 = vadd.xlane.f32.xlu1 %v20033_v17  ;;  %v20131_v37 = vand.u32 4294901760, %v20130_v44  ;;  %v28387_v44 = vld [vmem:[#allocation7 + $0x8] sm:$0x3f] }
0x1d9b   :  { %v20047_v12 = vsel %vm12832_vm3, %v20038_v43, 0  ;;  %v25893_v51 = vpack.c.bf16 %v20138_v24, %v20131_v37 }
0x1d9c   :  { %v20116_v32 = vand.u32 4294901760, %v20047_v12 }
0x1d9e   :  { %v20117_v20 = vsub.f32 %v20047_v12, %v20116_v32 }
0x1da0   :  { %v20118_v2 = vand.u32 4294901760, %v20117_v20 }
0x1da2   :  { %v20119_v55 = vsub.f32 %v20117_v20, %v20118_v2 }
0x1da4   :  { %v20120_v1 = vand.u32 4294901760, %v20119_v55 }
0x1da6   :  { %25156 = vmatmul.mubr.f32.vlgmr.msra.gmra.mrb[42].mxu1 %v20120_v1 }
0x1da7   :  { %25894 = vmatpush3.bf16.msra.mxu1 %v25893_v51  ;;  %25162 = vmatprep.mubr.msk.f32.mxu1 %vm26828_vm1, %v26827_v16 }
0x1da8   :  { %25895 = vmatprep.subr.bf16.mxu1 %v26840_v21 }
0x1daa   :  { %20510 = vrot.lane.b32.xlu1 %v27849_v29, %s26837_s20  ;;  %v20509_v29 = vpop.permute.xlu1 %20508 }
0x1dab   :  { %v20518_v13 = vand.u32 4294901760, %v20509_v29 }
0x1dad   :  { %v20596_v45 = vsub.f32 %v20509_v29, %v20518_v13 }
0x1dae   :  { %25163 = vmatmul.mubr.f32.vlgmr.msra.gmra.mrb[42].mxu1 %v20116_v32 }
0x1daf   :  { %25897 = vmatpush3.bf16.msra.mxu1 %v25896_v59  ;;  %25169 = vmatprep.mubr.msk.f32.mxu1 %vm26828_vm1, %v26827_v16  ;;  %v20597_v4 = vand.u32 4294901760, %v20596_v45 }
0x1db0   :  { %25898 = vmatprep.subr.bf16.mxu1 %v26840_v21 }
0x1db1   :  { %v20598_v63 = vsub.f32 %v20596_v45, %v20597_v4 }
0x1db3   :  { %v20599_v46 = vand.u32 4294901760, %v20598_v63 }
0x1db6   :  { %25170 = vmatmul.mubr.f32.vlgmr.msra.gmra.mrb[42].mxu1 %v20117_v20  ;;  %v21476_v20 = vrot.slane %v28387_v44, %v177_v56 }
0x1db7   :  { %25900 = vmatpush3.bf16.msra.mxu1 %v25890_v35  ;;  %25176 = vmatprep.mubr.msk.f32.mxu1 %vm26828_vm1, %v26827_v16 }
0x1db8   :  { %25901 = vmatprep.subr.bf16.mxu1 %v26840_v21 }
0x1dbe   :  { %25177 = vmatmul.mubr.f32.vlgmr.msra.gmra.mrb[42].mxu1 %v20118_v2 }
0x1dbf   :  { %25903 = vmatpush3.bf16.msra.mxu1 %v25902_v18  ;;  %25183 = vmatprep.mubr.msk.f32.mxu1 %vm26828_vm1, %v26827_v16 }
0x1dc0   :  { %25904 = vmatprep.subr.bf16.mxu1 %v26840_v21 }
0x1dc6   :  { %25184 = vmatmul.mubr.f32.vlgmr.msra.gmra.mrb[42].mxu1 %v20116_v32 }
0x1dc7   :  { %25906 = vmatpush3.bf16.msra.mxu1 %v25890_v35  ;;  %25190 = vmatprep.mubr.msk.f32.mxu1 %vm26828_vm1, %v26827_v16  ;;  %v20983_v35 = vand.u32 4294901760, %v136_v38 }
0x1dce   :  { %25191 = vmatmul.mubr.f32.vlgmr.msra.gmra.mrb[42].mxu1 %v20116_v32 }
0x1e26   :  { %v20035_v36 = vpop.xlane.xlu1 %20034 }
0x1e27   :  { %26669 = vrcp.f32 %v20035_v36 }
0x1e2a   :  { %v20511_v47 = vpop.permute.xlu1 %20510 }
0x1e2b   :  { %v20521_v58 = vand.u32 4294901760, %v20511_v47 }
0x1e2d   :  { %v25908_v30 = vpack.c.bf16 %v20521_v58, %v20518_v13  ;;  %v20603_v57 = vsub.f32 %v20511_v47, %v20521_v58 }
0x1e2f   :  { %25909 = vmatpush3.bf16.msra.mxu0 %v25908_v30  ;;  %v20604_v54 = vand.u32 4294901760, %v20603_v57  ;;  %v25914_v7 = vpack.c.bf16 %v20603_v57, %v20596_v45  ;;  %v21520_v45 = vld [vmem:[#allocation10 + $0x8] sm:$0xff] }
0x1e30   :  { %25910 = vmatprep.subr.bf16.mxu0 %v26840_v21 }
0x1e31   :  { %v26670_v60 = vpop.eup %26669  ;;  %v20605_v62 = vsub.f32 %v20603_v57, %v20604_v54  ;;  %v25920_v8 = vpack.c.bf16 %v20604_v54, %v20597_v4  ;;  %v21519_v57 = vld [vmem:[#allocation10] sm:$0xff]  ;;  %v21537_v54 = vand.u32 4294901760, %v21520_v45  ;;  %v21522_v4 = vld [vmem:[#allocation10 + $0x18] sm:$0xff] }
0x1e32   :  { %v20039_v49 = vmul.f32 %v26670_v60, %v26666_v50  ;;  %v21521_v60 = vld [vmem:[#allocation10 + $0x10] sm:$0xff] }
0x1e33   :  { %v20606_v0 = vand.u32 4294901760, %v20605_v62 }
0x1e34   :  { %v20515_v5 = vsel %vm12832_vm3, %v20039_v49, 0  ;;  %v21534_v49 = vand.u32 4294901760, %v21519_v57 }
0x1e35   :  { %v20584_v39 = vand.u32 4294901760, %v20515_v5  ;;  %v25911_v26 = vpack.c.bf16 %v20606_v0, %v20599_v46 }
0x1e36   :  { %v28414_v62 = vpack.c.bf16 %v21537_v54, %v21534_v49  ;;  %v21624_v63 = vsub.f32 %v21519_v57, %v21534_v49 }
0x1e37   :  { %v20585_v40 = vsub.f32 %v20515_v5, %v20584_v39  ;;  %v21540_v5 = vand.u32 4294901760, %v21521_v60 }
0x1e38   :  { %25926 = vmatprep.subr.bf16.mxu1 %v28414_v62  ;;  %v21625_v0 = vand.u32 4294901760, %v21624_v63 }
0x1e39   :  { %v20586_v27 = vand.u32 4294901760, %v20585_v40  ;;  %25928 = vmatpush3.bf16.msra.mxu1 %v28414_v62 }
0x1e3a   :  { %v21626_v46 = vsub.f32 %v21624_v63, %v21625_v0 }
0x1e3b   :  { %v20587_v3 = vsub.f32 %v20585_v40, %v20586_v27 }
0x1e3d   :  { %v20588_v19 = vand.u32 4294901760, %v20587_v3 }
0x1e3f   :  { %25198 = vmatmul.mubr.f32.vlgmr.msra.gmra.mrb[34].mxu0 %v20588_v19 }
0x1e40   :  { %25912 = vmatpush3.bf16.msra.mxu0 %v25911_v26  ;;  %25204 = vmatprep.mubr.msk.f32.mxu0 %vm26828_vm1, %v26827_v16  ;;  %v21638_v26 = vsub.f32 %v21521_v60, %v21540_v5 }
0x1e41   :  { %25913 = vmatprep.subr.bf16.mxu0 %v26840_v21 }
0x1e47   :  { %25205 = vmatmul.mubr.f32.vlgmr.msra.gmra.mrb[34].mxu0 %v20584_v39 }
0x1e48   :  { %25915 = vmatpush3.bf16.msra.mxu0 %v25914_v7  ;;  %25211 = vmatprep.mubr.msk.f32.mxu0 %vm26828_vm1, %v26827_v16 }
0x1e49   :  { %25916 = vmatprep.subr.bf16.mxu0 %v26840_v21 }
0x1e4f   :  { %25212 = vmatmul.mubr.f32.vlgmr.msra.gmra.mrb[34].mxu0 %v20585_v40 }
0x1e50   :  { %25918 = vmatpush3.bf16.msra.mxu0 %v25908_v30  ;;  %25218 = vmatprep.mubr.msk.f32.mxu0 %vm26828_vm1, %v26827_v16 }
0x1e51   :  { %25919 = vmatprep.subr.bf16.mxu0 %v26840_v21 }
0x1e57   :  { %25219 = vmatmul.mubr.f32.vlgmr.msra.gmra.mrb[34].mxu0 %v20586_v27  ;;  %v21631_v27 = vsub.f32 %v21520_v45, %v21537_v54 }
0x1e58   :  { %25921 = vmatpush3.bf16.msra.mxu0 %v25920_v8  ;;  %25225 = vmatprep.mubr.msk.f32.mxu0 %vm26828_vm1, %v26827_v16  ;;  %v21627_v8 = vand.u32 4294901760, %v21626_v46  ;;  %v22068_v46 = vld [vmem:[%s28544_s8 + $0x28] sm:$0xff] }
0x1e59   :  { %25922 = vmatprep.subr.bf16.mxu0 %v26840_v21  ;;  %v21070_v21 = vsub.f32 %v136_v38, %v20983_v35  ;;  %v21632_v3 = vand.u32 4294901760, %v21631_v27 }
0x1e5b   :  { %v21071_v48 = vand.u32 4294901760, %v21070_v21  ;;  %v21633_v19 = vsub.f32 %v21631_v27, %v21632_v3 }
0x1e5d   :  { %v21072_v50 = vsub.f32 %v21070_v21, %v21071_v48 }
0x1e5f   :  { %25226 = vmatmul.mubr.f32.vlgmr.msra.gmra.mrb[34].mxu0 %v20584_v39  ;;  %v21073_v61 = vand.u32 4294901760, %v21072_v50 }
0x1e60   :  { %25924 = vmatpush3.bf16.msra.mxu0 %v25908_v30  ;;  %25232 = vmatprep.mubr.msk.f32.mxu0 %vm26828_vm1, %v26827_v16 }
0x1e61   :  { %25235 = vmatprep.subr.mxu0 %v20983_v35 }
0x1e67   :  { %25233 = vmatmul.mubr.f32.vlgmr.msra.gmra.mrb[34].mxu0 %v20584_v39  ;;  %v21543_v39 = vand.u32 4294901760, %v21522_v4 }
0x1e68   :  { %25236 = vmatpush3.msra.mxu0 %v20983_v35 }
0x1e69   :  { %25240 = vmatprep.subr.mxu0 %v21073_v61  ;;  %v28416_v40 = vpack.c.bf16 %v21543_v39, %v21540_v5  ;;  %v21645_v7 = vsub.f32 %v21522_v4, %v21543_v39 }
0x1e6b   :  { %25930 = vmatprep.subr.bf16.mxu1 %v28416_v40 }
0x1e6c   :  { %25932 = vmatpush3.bf16.msra.mxu1 %v28416_v40 }
0x1ea1   :  { %v20504_v9 = vpop.f32.mrb[42].mxu1 }
0x1ea2   :  { %v20977_v15 = vsel %vm722_vm2, %v20504_v9, 0  ;;  %v25192_v22 = vpop.f32.mrb[43].mxu1  ;;  %v21634_v9 = vand.u32 4294901760, %v21633_v19 }
0x1ea3   :  { %v21048_v31 = vand.u32 4294901760, %v20977_v15  ;;  %v21646_v22 = vand.u32 4294901760, %v21645_v7 }
0x1ea5   :  { %v21049_v23 = vsub.f32 %v20977_v15, %v21048_v31  ;;  %v21639_v15 = vand.u32 4294901760, %v21638_v26 }
0x1ea7   :  { %v21050_v6 = vand.u32 4294901760, %v21049_v23  ;;  %v25961_v50 = vpack.c.bf16 %v21646_v22, %v21639_v15 }
0x1ea9   :  { %v21051_v25 = vsub.f32 %v21049_v23, %v21050_v6 }
0x1eab   :  { %v21052_v41 = vand.u32 4294901760, %v21051_v25 }
0x1ead   :  { %25237 = vmatprep.mubr.f32.mxu0 %v21052_v41 }
0x1f3a   :  { %v20972_v16 = vpop.f32.mrb[34].mxu0 }
0x1f3b   :  { %v20980_v53 = vsel %vm722_vm2, %v20972_v16, 0  ;;  %v25234_v17 = vpop.f32.mrb[35].mxu0  ;;  %v28430_v16 = vld [vmem:[%s28544_s8 + $0x8] sm:$0xff] }
0x1f3c   :  { %v21058_v43 = vand.u32 4294901760, %v20980_v53  ;;  %v22086_v17 = vand.u32 4294901760, %v28430_v16 }
0x1f3e   :  { %v21059_v11 = vsub.f32 %v20980_v53, %v21058_v43 }
0x1f40   :  { %v21060_v34 = vand.u32 4294901760, %v21059_v11 }
0x1f42   :  { %v21061_v12 = vsub.f32 %v21059_v11, %v21060_v34 }
0x1f44   :  { %v21062_v32 = vand.u32 4294901760, %v21061_v12 }
0x1f46   :  { %25238 = vmatmul.mubr.f32.vlgmr.msra.gmra.mrb[28].mxu0 %v21062_v32 }
0x1f47   :  { %25242 = vmatprep.mubr.f32.mxu0 %v21048_v31  ;;  %25241 = vmatpush3.msra.mxu0 %v21073_v61  ;;  %v28425_v61 = vld [vmem:[%s28544_s8] sm:$0xff] }
0x1f48   :  { %25245 = vmatprep.subr.mxu0 %v21070_v21  ;;  %v22083_v53 = vand.u32 4294901760, %v28425_v61 }
0x1f4e   :  { %25243 = vmatmul.mubr.f32.vlgmr.msra.gmra.mrb[28].mxu0 %v21058_v43 }
0x1f4f   :  { %25247 = vmatprep.mubr.f32.mxu0 %v21049_v23  ;;  %25246 = vmatpush3.msra.mxu0 %v21070_v21  ;;  %v21640_v23 = vsub.f32 %v21638_v26, %v21639_v15  ;;  %v25945_v21 = vpack.c.bf16 %v21645_v7, %v21638_v26  ;;  %v22098_v26 = vand.u32 4294901760, %v22068_v46 }
0x1f50   :  { %25250 = vmatprep.subr.mxu0 %v20983_v35 }
0x1f51   :  { %v21641_v25 = vand.u32 4294901760, %v21640_v23  ;;  %v22177_v23 = vsub.f32 %v28425_v61, %v22083_v53 }
0x1f56   :  { %25248 = vmatmul.mubr.f32.vlgmr.msra.gmra.mrb[28].mxu0 %v21059_v11 }
0x1f57   :  { %25252 = vmatprep.mubr.f32.mxu0 %v21050_v6  ;;  %25251 = vmatpush3.msra.mxu0 %v20983_v35  ;;  %v21647_v6 = vsub.f32 %v21645_v7, %v21646_v22 }
0x1f58   :  { %25255 = vmatprep.subr.mxu0 %v21071_v48 }
0x1f59   :  { %v21648_v41 = vand.u32 4294901760, %v21647_v6  ;;  %v22184_v6 = vsub.f32 %v28430_v16, %v22086_v17 }
0x1f5b   :  { %v25937_v38 = vpack.c.bf16 %v21648_v41, %v21641_v25  ;;  %v22178_v25 = vand.u32 4294901760, %v22177_v23  ;;  %v22185_v41 = vand.u32 4294901760, %v22184_v6 }
0x1f5e   :  { %25253 = vmatmul.mubr.f32.vlgmr.msra.gmra.mrb[28].mxu0 %v21060_v34 }
0x1f5f   :  { %25257 = vmatprep.mubr.f32.mxu0 %v21048_v31  ;;  %25256 = vmatpush3.msra.mxu0 %v21071_v48  ;;  %v25957_v48 = vpack.c.bf16 %v21632_v3, %v21625_v0 }
0x1f60   :  { %25260 = vmatprep.subr.mxu0 %v20983_v35 }
0x1f66   :  { %25258 = vmatmul.mubr.f32.vlgmr.msra.gmra.mrb[28].mxu0 %v21058_v43 }
0x1f67   :  { %25262 = vmatprep.mubr.f32.mxu0 %v21048_v31  ;;  %25261 = vmatpush3.msra.mxu0 %v20983_v35  ;;  %v25933_v31 = vpack.c.bf16 %v21634_v9, %v21627_v8  ;;  %v25941_v35 = vpack.c.bf16 %v21631_v27, %v21624_v63  ;;  %v22066_v27 = vld [vmem:[%s28544_s8 + $0x18] sm:$0xff]  ;;  %v22069_v8 = vld [vmem:[%s28544_s8 + $0x30] sm:$0xff] }
0x1f68   :  { %v22070_v9 = vld [vmem:[%s28544_s8 + $0x38] sm:$0xff]  ;;  %v22101_v15 = vand.u32 4294901760, %v22069_v8 }
0x1f69   :  { %25934 = vmatprep.subr.bf16.mxu1 %v25933_v31  ;;  %v22104_v22 = vand.u32 4294901760, %v22070_v9 }
0x1f6e   :  { %25263 = vmatmul.mubr.f32.vlgmr.msra.gmra.mrb[28].mxu0 %v21058_v43  ;;  %v28438_v43 = vpack.c.bf16 %v22086_v17, %v22083_v53 }
0x1f70   :  { %26022 = vmatprep.subr.bf16.mxu0 %v28438_v43 }
0x1f71   :  { %26024 = vmatpush3.bf16.msra.mxu0 %v28438_v43 }
0x2041   :  { %v25264_v33 = vpop.f32.mrb[28].mxu0 }
0x2042   :  { %v21478_v2 = vadd.f32 %v25264_v33, %v21476_v20  ;;  %v21461_v37 = vpop.f32.mrb[29].mxu0 }
0x2043   :  { %v21477_v55 = vadd.f32 %v21476_v20, %v21461_v37  ;;  %v26679_v37 = vld [vmem:[#allocation7] sm:$0xff] }
0x2044   :  { %v28393_v24 = vadd.f32 %v21478_v2, %v27470_v14  ;;  %v21515_v2 = vsub.s32 5, %v27005_v52 }
0x2045   :  { %v28396_v1 = vadd.f32 %v21477_v55, %v27472_v10  ;;  %v21510_v55 = vrot.slane %v26679_v37, %v11266_v42 }
0x2046   :  { %v21484_v51 = vsel %vm141_vm0, %v28393_v24, 0.0 }
0x2047   :  { %21485 = vadd.xlane.f32.xlu0 %v21484_v51  ;;  %v21481_v59 = vsel %vm141_vm0, %v28396_v1, 0.0 }
0x2048   :  { %21482 = vadd.xlane.f32.xlu1 %v21481_v59 }
0x20d4   :  { %v21486_v18 = vpop.xlane.xlu0 %21485 }
0x20d5   :  { %v21488_v56 = vmul.f32 0.03125, %v21486_v18  ;;  %v21483_v29 = vpop.xlane.xlu1 %21482  ;;  %v21516_v18 = vrot.slane %v26679_v37, %v21515_v2 }
0x20d6   :  { %v21487_v36 = vmul.f32 0.03125, %v21483_v29 }
0x20d7   :  { %v28403_v47 = vsub.f32 %v28393_v24, %v21488_v56 }
0x20d8   :  { %v28406_v14 = vsub.f32 %v28396_v1, %v21487_v36 }
0x20d9   :  { %v21492_v58 = vmul.f32 %v28403_v47, %v28403_v47 }
0x20da   :  { %v21491_v10 = vmul.f32 %v28406_v14, %v28406_v14 }
0x20db   :  { %v21496_v30 = vsel %vm141_vm0, %v21492_v58, 0.0 }
0x20dc   :  { %v21493_v13 = vsel %vm141_vm0, %v21491_v10, 0.0 }
0x20dd   :  { %21494 = vadd.xlane.f32.xlu1 %v21493_v13 }
0x20e1   :  { %21497 = vadd.xlane.f32.xlu1 %v21496_v30 }
0x216a   :  { %v21495_v11 = vpop.xlane.xlu1 %21494 }
0x216b   :  { %v21499_v34 = vmul.f32 0.03125, %v21495_v11 }
0x216d   :  { %v21501_v12 = vadd.f32 1e-05, %v21499_v34 }
0x216e   :  { %v21498_v32 = vpop.xlane.xlu1 %21497 }
0x216f   :  { %26671 = vrsqrt.f32 %v21501_v12  ;;  %v21500_v20 = vmul.f32 0.03125, %v21498_v32  ;;  %v22212_v32 = vsub.f32 %v22068_v46, %v22098_v26 }
0x2171   :  { %v21502_v33 = vadd.f32 1e-05, %v21500_v20 }
0x2173   :  { %26673 = vrsqrt.f32 %v21502_v33 }
0x2179   :  { %v26672_v51 = vpop.eup %26671 }
0x217a   :  { %v21505_v59 = vmul.f32 %v26672_v51, %v28406_v14  ;;  %v22213_v51 = vand.u32 4294901760, %v22212_v32 }
0x217c   :  { %v21511_v56 = vmul.f32 %v21510_v55, %v21505_v59 }
0x217d   :  { %v26674_v29 = vpop.eup %26673 }
0x217e   :  { %v21506_v36 = vmul.f32 %v26674_v29, %v28403_v47  ;;  %v21517_v10 = vadd.f32 %v21516_v18, %v21511_v56  ;;  %v22065_v47 = vld [vmem:[%s28544_s8 + $0x10] sm:$0xff]  ;;  %v22214_v29 = vsub.f32 %v22212_v32, %v22213_v51 }
0x217f   :  { %v22089_v0 = vand.u32 4294901760, %v22065_v47 }
0x2180   :  { %v21512_v13 = vmul.f32 %v21510_v55, %v21506_v36  ;;  %v21528_v58 = vsel %vm141_vm0, %v21517_v10, 0  ;;  %v22219_v36 = vsub.f32 %v22069_v8, %v22101_v15 }
0x2181   :  { %v21602_v30 = vand.u32 4294901760, %v21528_v58 }
0x2182   :  { %v21518_v57 = vadd.f32 %v21516_v18, %v21512_v13  ;;  %v22226_v13 = vsub.f32 %v22070_v9, %v22104_v22 }
0x2183   :  { %v21603_v45 = vsub.f32 %v21528_v58, %v21602_v30 }
0x2184   :  { %v21531_v60 = vsel %vm141_vm0, %v21518_v57, 0  ;;  %v22220_v57 = vand.u32 4294901760, %v22219_v36 }
0x2185   :  { %v21604_v42 = vand.u32 4294901760, %v21603_v45  ;;  %v21612_v49 = vand.u32 4294901760, %v21531_v60 }
0x2187   :  { %v21605_v54 = vsub.f32 %v21603_v45, %v21604_v42  ;;  %v21613_v14 = vsub.f32 %v21531_v60, %v21612_v49 }
0x2189   :  { %v21606_v4 = vand.u32 4294901760, %v21605_v54  ;;  %v21614_v5 = vand.u32 4294901760, %v21613_v14 }
0x218b   :  { %25273 = vmatprep.mubr.f32.mxu1 %v21606_v4  ;;  %v21615_v39 = vsub.f32 %v21613_v14, %v21614_v5 }
0x218d   :  { %v21616_v63 = vand.u32 4294901760, %v21615_v39  ;;  %v26005_v39 = vpack.c.bf16 %v22184_v6, %v22177_v23 }
0x218f   :  { %25274 = vmatmul.mubr.f32.vlgmr.msra.gmra.mrb[44].mxu1 %v21616_v63 }
0x2190   :  { %25936 = vmatpush3.bf16.msra.mxu1 %v25933_v31  ;;  %25284 = vmatprep.mubr.f32.mxu1 %v21602_v30  ;;  %v28491_v31 = vpack.c.bf16 %v22104_v22, %v22101_v15 }
0x2191   :  { %25938 = vmatprep.subr.bf16.mxu1 %v25937_v38 }
0x2194   :  { %25940 = vmatpush3.bf16.msra.mxu1 %v25937_v38  ;;  %v26037_v38 = vpack.c.bf16 %v22185_v41, %v22178_v25 }
0x2195   :  { %25942 = vmatprep.subr.bf16.mxu1 %v25941_v35 }
0x2197   :  { %25285 = vmatmul.mubr.f32.vlgmr.msra.gmra.mrb[44].mxu1 %v21612_v49 }
0x2198   :  { %25944 = vmatpush3.bf16.msra.mxu1 %v25941_v35  ;;  %25295 = vmatprep.mubr.f32.mxu1 %v21603_v45  ;;  %v22179_v35 = vsub.f32 %v22177_v23, %v22178_v25  ;;  %v22227_v45 = vand.u32 4294901760, %v22226_v13 }
0x2199   :  { %25946 = vmatprep.subr.bf16.mxu1 %v25945_v21 }
0x219a   :  { %v22180_v61 = vand.u32 4294901760, %v22179_v35  ;;  %v22228_v54 = vsub.f32 %v22226_v13, %v22227_v45 }
0x219c   :  { %25948 = vmatpush3.bf16.msra.mxu1 %v25945_v21  ;;  %v22186_v21 = vsub.f32 %v22184_v6, %v22185_v41  ;;  %v22229_v4 = vand.u32 4294901760, %v22228_v54 }
0x219d   :  { %25950 = vmatprep.subr.bf16.mxu1 %v28414_v62 }
0x219e   :  { %v22187_v53 = vand.u32 4294901760, %v22186_v21 }
0x219f   :  { %25296 = vmatmul.mubr.f32.vlgmr.msra.gmra.mrb[44].mxu1 %v21613_v14 }
0x21a0   :  { %25952 = vmatpush3.bf16.msra.mxu1 %v28414_v62  ;;  %25306 = vmatprep.mubr.f32.mxu1 %v21604_v42  ;;  %v25989_v17 = vpack.c.bf16 %v22187_v53, %v22180_v61  ;;  %v22221_v42 = vsub.f32 %v22219_v36, %v22220_v57 }
0x21a1   :  { %25954 = vmatprep.subr.bf16.mxu1 %v28416_v40 }
0x21a2   :  { %v22222_v14 = vand.u32 4294901760, %v22221_v42 }
0x21a4   :  { %25956 = vmatpush3.bf16.msra.mxu1 %v28416_v40 }
0x21a5   :  { %25958 = vmatprep.subr.bf16.mxu1 %v25957_v48 }
0x21a7   :  { %25307 = vmatmul.mubr.f32.vlgmr.msra.gmra.mrb[44].mxu1 %v21614_v5  ;;  %v26001_v5 = vpack.c.bf16 %v22229_v4, %v22222_v14 }
0x21a8   :  { %25960 = vmatpush3.bf16.msra.mxu1 %v25957_v48  ;;  %25317 = vmatprep.mubr.f32.mxu1 %v21602_v30  ;;  %v22191_v48 = vsub.f32 %v22065_v47, %v22089_v0 }
0x21a9   :  { %25962 = vmatprep.subr.bf16.mxu1 %v25961_v50 }
0x21aa   :  { %v22192_v11 = vand.u32 4294901760, %v22191_v48 }
0x21ac   :  { %25964 = vmatpush3.bf16.msra.mxu1 %v25961_v50  ;;  %v22193_v34 = vsub.f32 %v22191_v48, %v22192_v11 }
0x21ad   :  { %25966 = vmatprep.subr.bf16.mxu1 %v28414_v62 }
0x21ae   :  { %v22194_v37 = vand.u32 4294901760, %v22193_v34 }
0x21af   :  { %25318 = vmatmul.mubr.f32.vlgmr.msra.gmra.mrb[44].mxu1 %v21612_v49 }
0x21b0   :  { %25968 = vmatpush3.bf16.msra.mxu1 %v28414_v62  ;;  %25328 = vmatprep.mubr.f32.mxu1 %v21602_v30  ;;  %v22092_v62 = vand.u32 4294901760, %v22066_v27  ;;  %v22215_v30 = vand.u32 4294901760, %v22214_v29 }
0x21b1   :  { %25970 = vmatprep.subr.bf16.mxu1 %v28416_v40 }
0x21b2   :  { %v28467_v3 = vpack.c.bf16 %v22092_v62, %v22089_v0  ;;  %v22198_v50 = vsub.f32 %v22066_v27, %v22092_v62  ;;  %v26017_v27 = vpack.c.bf16 %v22226_v13, %v22219_v36  ;;  %v21526_v0 = vrot.slane %v28387_v44, %v10088_v28 }
0x21b4   :  { %25972 = vmatpush3.bf16.msra.mxu1 %v28416_v40  ;;  %v22067_v40 = vld [vmem:[%s28544_s8 + $0x20] sm:$0xff]  ;;  %26026 = vmatprep.subr.bf16.mxu0 %v28467_v3  ;;  %v22199_v16 = vand.u32 4294901760, %v22198_v50  ;;  %v26009_v63 = vpack.c.bf16 %v22198_v50, %v22191_v48  ;;  %s26841_s8 = smov [#allocation11]  }
0x21b5   :  { %25974 = vmatprep.subr.bf16.mxu1 %v28438_v43  ;;  %v22095_v19 = vand.u32 4294901760, %v22067_v40  ;;  %26028 = vmatpush3.bf16.msra.mxu0 %v28467_v3  ;;  %s22671_s17 = sshll.u32 %s26841_s8, 4  ;;  %s22672_s17 = int_to_ptr.vmem [resolvable:$true] %s22671_s17 }
0x21b6   :  { %v26041_v20 = vpack.c.bf16 %v22199_v16, %v22192_v11  ;;  %v22200_v33 = vsub.f32 %v22198_v50, %v22199_v16  ;;  %s26790_s7 = scalar_lea.vmem %s22672_s17, 256  ;;  %p26795_p13 = scmp.lt.s32.totalorder %s22672_s17, %s22672_s17 }
0x21b7   :  { %25329 = vmatmul.mubr.f32.vlgmr.msra.gmra.mrb[44].mxu1 %v21612_v49  ;;  %v28479_v7 = vpack.c.bf16 %v22098_v26, %v22095_v19  ;;  %v22205_v12 = vsub.f32 %v22067_v40, %v22095_v19  ;;  %v26049_v49 = vpack.c.bf16 %v22227_v45, %v22220_v57  ;;  %p26791_p12 = scmp.ne.s32.totalorder %s22672_s17, %s26790_s7  ;;  %p26796_p0 = scmp.lt.s32.totalorder %s26790_s7, %s26790_s7 }
0x21b8   :  { %25976 = vmatpush3.bf16.msra.mxu1 %v28438_v43  ;;  %v22201_v59 = vand.u32 4294901760, %v22200_v33 }
0x21b9   :  { %25978 = vmatprep.subr.bf16.mxu1 %v28467_v3  ;;  %26030 = vmatprep.subr.bf16.mxu0 %v28479_v7  ;;  %v22206_v55 = vand.u32 4294901760, %v22205_v12  ;;  %v26013_v47 = vpack.c.bf16 %v22212_v32, %v22205_v12  ;;  %p26797_p1 = por %p26796_p0, %p26795_p13 }
0x21ba   :  { %26032 = vmatpush3.bf16.msra.mxu0 %v28479_v7  ;;  %v25993_v10 = vpack.c.bf16 %v22201_v59, %v22194_v37 }
0x21bb   :  { %26034 = vmatprep.subr.bf16.mxu0 %v28491_v31  ;;  %v26045_v18 = vpack.c.bf16 %v22213_v51, %v22206_v55  ;;  %v22207_v56 = vsub.f32 %v22205_v12, %v22206_v55  ;;  %p26798_p2 = pnand %p26797_p1, %p26791_p12 }
0x21bc   :  { %25980 = vmatpush3.bf16.msra.mxu1 %v28467_v3 }
0x21bd   :  { %25982 = vmatprep.subr.bf16.mxu1 %v28479_v7  ;;  %v22208_v58 = vand.u32 4294901760, %v22207_v56 }
0x21be   :  { %26036 = vmatpush3.bf16.msra.mxu0 %v28491_v31 }
0x21bf   :  { %26038 = vmatprep.subr.bf16.mxu0 %v26037_v38  ;;  %v25997_v60 = vpack.c.bf16 %v22215_v30, %v22208_v58 }
0x21c0   :  { %25984 = vmatpush3.bf16.msra.mxu1 %v28479_v7 }
0x21c1   :  { %25986 = vmatprep.subr.bf16.mxu1 %v28491_v31 }
0x21c4   :  { %25988 = vmatpush3.bf16.msra.mxu1 %v28491_v31 }
0x21c5   :  { %25990 = vmatprep.subr.bf16.mxu1 %v25989_v17 }
0x228a   :  { %v25330_v62 = vpop.f32.mrb[44].mxu1 }
0x228b   :  { %v26081_v40 = vadd.f32 %v25330_v62, %v21526_v0  ;;  %v22051_v46 = vpop.f32.mrb[45].mxu1 }
0x228c   :  { %v26082_v19 = vadd.f32 %v22051_v46, %v21526_v0 }
0x228d   :  { %v22062_v26 = vmax.f32 %v26081_v40, 0.0 }
0x228e   :  { %v22061_v8 = vmax.f32 %v26082_v19, 0.0 }
0x228f   :  { %v22080_v9 = vsel %vm22075_vm4, %v22062_v26, 0 }
0x2290   :  { %v22165_v15 = vand.u32 4294901760, %v22080_v9  ;;  %v22077_v22 = vsel %vm22075_vm4, %v22061_v8, 0 }
0x2291   :  { %v22155_v25 = vand.u32 4294901760, %v22077_v22 }
0x2292   :  { %v22166_v41 = vsub.f32 %v22080_v9, %v22165_v15 }
0x2293   :  { %v22156_v23 = vsub.f32 %v22077_v22, %v22155_v25 }
0x2294   :  { %v22167_v6 = vand.u32 4294901760, %v22166_v41 }
0x2295   :  { %v22157_v35 = vand.u32 4294901760, %v22156_v23 }
0x2296   :  { %v22168_v21 = vsub.f32 %v22166_v41, %v22167_v6 }
0x2297   :  { %25404 = vmatprep.mubr.f32.mxu0 %v22157_v35  ;;  %v22158_v48 = vsub.f32 %v22156_v23, %v22157_v35 }
0x2298   :  { %25405 = vmatmul.mubr.f32.vlgmr.msra.gmra.mrb[36].mxu0 %v22167_v6  ;;  %v22169_v50 = vand.u32 4294901760, %v22168_v21 }
0x2299   :  { %26040 = vmatpush3.bf16.msra.mxu0 %v26037_v38  ;;  %25423 = vmatprep.mubr.f32.mxu0 %v22155_v25  ;;  %v22159_v28 = vand.u32 4294901760, %v22158_v48 }
0x229a   :  { %26042 = vmatprep.subr.bf16.mxu0 %v26041_v20 }
0x229b   :  { %25347 = vmatprep.mubr.f32.mxu1 %v22159_v28 }
0x229c   :  { %25348 = vmatmul.mubr.f32.vlgmr.msra.gmra.mrb[46].mxu1 %v22169_v50 }
0x229d   :  { %25992 = vmatpush3.bf16.msra.mxu1 %v25989_v17  ;;  %26044 = vmatpush3.bf16.msra.mxu0 %v26041_v20 }
0x229e   :  { %25366 = vmatprep.mubr.f32.mxu1 %v22155_v25  ;;  %25994 = vmatprep.subr.bf16.mxu1 %v25993_v10 }
0x229f   :  { %26046 = vmatprep.subr.bf16.mxu0 %v26045_v18 }
0x22a1   :  { %25996 = vmatpush3.bf16.msra.mxu1 %v25993_v10  ;;  %26048 = vmatpush3.bf16.msra.mxu0 %v26045_v18 }
0x22a2   :  { %25998 = vmatprep.subr.bf16.mxu1 %v25997_v60  ;;  %26050 = vmatprep.subr.bf16.mxu0 %v26049_v49 }
0x22a5   :  { %26000 = vmatpush3.bf16.msra.mxu1 %v25997_v60  ;;  %26052 = vmatpush3.bf16.msra.mxu0 %v26049_v49 }
0x22a6   :  { %26002 = vmatprep.subr.bf16.mxu1 %v26001_v5  ;;  %26054 = vmatprep.subr.bf16.mxu0 %v28438_v43 }
0x22a8   :  { %25424 = vmatmul.mubr.f32.vlgmr.msra.gmra.mrb[36].mxu0 %v22165_v15 }
0x22a9   :  { %26004 = vmatpush3.bf16.msra.mxu1 %v26001_v5  ;;  %26056 = vmatpush3.bf16.msra.mxu0 %v28438_v43 }
0x22aa   :  { %25442 = vmatprep.mubr.f32.mxu0 %v22155_v25  ;;  %26006 = vmatprep.subr.bf16.mxu1 %v26005_v39 }
0x22ab   :  { %26058 = vmatprep.subr.bf16.mxu0 %v28467_v3 }
0x22ac   :  { %25367 = vmatmul.mubr.f32.vlgmr.msra.gmra.mrb[46].mxu1 %v22165_v15 }
0x22ad   :  { %26008 = vmatpush3.bf16.msra.mxu1 %v26005_v39  ;;  %25385 = vmatprep.mubr.f32.mxu1 %v22156_v23 }
0x22ae   :  { %26060 = vmatpush3.bf16.msra.mxu0 %v28467_v3  ;;  %26010 = vmatprep.subr.bf16.mxu1 %v26009_v63  ;;  %v22074_v3 = vrot.slane %v28387_v44, %v21515_v2 }
0x22af   :  { %26062 = vmatprep.subr.bf16.mxu0 %v28479_v7 }
0x22b1   :  { %26012 = vmatpush3.bf16.msra.mxu1 %v26009_v63 }
0x22b2   :  { %26064 = vmatpush3.bf16.msra.mxu0 %v28479_v7  ;;  %26014 = vmatprep.subr.bf16.mxu1 %v26013_v47 }
0x22b3   :  { %26066 = vmatprep.subr.bf16.mxu0 %v28491_v31 }
0x22b5   :  { %26016 = vmatpush3.bf16.msra.mxu1 %v26013_v47 }
0x22b6   :  { %26068 = vmatpush3.bf16.msra.mxu0 %v28491_v31  ;;  %26018 = vmatprep.subr.bf16.mxu1 %v26017_v27 }
0x22b9   :  { %25443 = vmatmul.mubr.f32.vlgmr.msra.gmra.mrb[36].mxu0 %v22165_v15  ;;  %26020 = vmatpush3.bf16.msra.mxu1 %v26017_v27 }
0x22bc   :  { %25386 = vmatmul.mubr.f32.vlgmr.msra.gmra.mrb[46].mxu1 %v22166_v41 }
0x238c   :  { %v25444_v43 = vpop.f32.mrb[36].mxu0 }
0x238d   :  { %v22652_v38 = vpop.f32.mrb[37].mxu0 }
0x238f   :  { %v25387_v61 = vpop.f32.mrb[46].mxu1 }
0x2390   :  { %v26083_v53 = vadd.f32 %v25387_v61, %v22074_v3  ;;  %v22376_v11 = vpop.f32.mrb[47].mxu1 }
0x2391   :  { %v26085_v7 = vadd.f32 %v22376_v11, %v22074_v3 }
0x2392   :  { %v26084_v16 = vadd.f32 %v26083_v53, %v25444_v43 }
0x2393   :  { %v26086_v17 = vadd.f32 %v26085_v7, %v22652_v38 }
0x2394   :  { %v22663_v31 = vadd.f32 %v26084_v16, %v28393_v24 }
0x2395   :  { %v22662_v34 = vadd.f32 %v26086_v17, %v28396_v1 }
0x2396   :  { %22665 = vst.msk [vmem:[#allocation11 + $0x8] sm:$0xff] %vm141_vm0, %v22663_v31 }
0x2397   :  { %22664 = vst.msk [vmem:[#allocation11] sm:$0xff] %vm141_vm0, %v22662_v34 }
0x2398   :  { %26801 = shalt.err (!%p26798_p2)
}
0x2399   :  { %s26802_s29 = scalar_lea.hbm %s28545_s9, 256 }
0x239a   :  { %p26803_p3 = scmp.ne.s32.totalorder %s28545_s9, %s26802_s29  ;;  %p26806_p4 = scmp.lt.u32.totalorder %s26802_s29, %s28545_s9 }
0x239c   :  { %p26808_p5 = pnand %p26806_p4, %p26803_p3 }
0x239e   :  { %26811 = shalt.err (!%p26808_p5)
}
0x239f   :  { %22677 = dma.vmem_to_hbm [thread:$0]  %s22672_s17, 256, %s28545_s9, [#allocation4], %s26822_s21, %s26822_s21, %s26823_s22  }
0x23a0   :  { %26818 = dma.done.wait [#allocation4], 256  }
0x23a1   :  { %26819 = vsyncadd [#allocation4], 4294967040 }
0x23a2   :  { %22681 = vsyncpa [#allocation3], 1 }
0x23a3   :  { %22682 = vsyncpa [#allocation6], 1 }
0x23a4   :  { %22683 = vsyncpa [#allocation9], 1 }
0x23a5   :  { %22684 = vsyncpa [#allocation4], 1 }

</bundles_post_ra>
